<compile_context>
chip_gen: v5e
topology: v5e:2x2
jax: 0.10.0
libtpu: 0.0.40
codegen_flags: <defaults>
</compile_context>

<pallas_src>
import jax
import jax.numpy as jnp
from jax.experimental import pallas as pl
from jax.experimental.pallas import tpu as pltpu


LANE = 128


# TODO(synk): PyTorch nn.GELU defaults to the exact erf-based GELU; we use the
# tanh approximation (jax.nn.gelu default), which lowers to the TPU EUP and is
# numerically very close.
def _gelu(x):
    return jax.nn.gelu(x, approximate=True)


def _round_up(x, m):
    return (x + m - 1) // m * m


# ---------------------------------------------------------------------------
# Generation-aware VMEM budgeting.
# ---------------------------------------------------------------------------
def _kernel_vmem_bytes(th, W, cp, hidp):
    """Conservative per-step VMEM footprint (bytes) of the fused kernel."""
    m_out = th * W
    m_h = (th + 2) * W
    # bf16 activation streams, double-buffered by the pipeline:
    # centre input, output, and two 1-row halos.
    act = 2 * 2 * (2 * m_out * cp + 2 * W * cp)
    # f32 h1 scratch (haloed hidden activation).
    h1 = 4 * m_h * hidp
    # Live intermediates: one rolled copy of h1, depthwise accumulator / h2,
    # the bf16 copy of h2 fed to conv3, and the conv3 output tile.
    live = 4 * m_h * hidp + 4 * m_out * hidp + 2 * m_out * hidp + 4 * m_out * cp
    # Weights (double-buffer worst case): bf16 w1/w3, f32 depthwise + biases.
    wts = 2 * (2 * (cp * hidp + hidp * cp) + 4 * (9 * hidp + 2 * hidp + 2 * cp))
    return act + h1 + live + wts


def _vmem_budget():
    """(per-step tile budget, vmem_limit_bytes) sized per TPU generation."""
    phys = 128 * 1024 * 1024
    try:
        info = pltpu.get_tpu_info()
        phys = int(getattr(info, "vmem_capacity_bytes", phys))
    except Exception:  # not on a TPU / interpret mode: keep the default
        pass
    if phys <= 64 * 1024 * 1024:
        # v7x: 64 MiB physical per TensorCore -> stay under the 32 MiB scope.
        return 20 * 1024 * 1024, 32 * 1024 * 1024
    # v5e / v6e: 128 MiB physical; raise the scoped limit well past default.
    return 48 * 1024 * 1024, 96 * 1024 * 1024


def _choose_row_tile(H, W, cp, hidp, budget_bytes):
    """Largest divisor of H whose fused-kernel footprint fits the budget.

    Bigger row tiles amortize per-step grid overhead, shrink the 2/(th+2)
    halo-recompute fraction of conv1 and enlarge the MXU M dimension."""
    best = 1
    for d in range(1, H + 1):
        if H % d == 0 and _kernel_vmem_bytes(d, W, cp, hidp) <= budget_bytes:
            best = d
    return best


# ---------------------------------------------------------------------------
# Fused MBConv kernel: one (batch, row-tile) program.
# ---------------------------------------------------------------------------
def _mbconv_kernel(x_top_ref, x_ctr_ref, x_bot_ref, w1_ref, b1_ref, wdw_ref,
                   b2_ref, w3_ref, b3_ref, o_ref, h1_ref):
    r = pl.program_id(1)
    n_r = pl.num_programs(1)
    _, th, w, cp = x_ctr_ref.shape
    hidp = w1_ref.shape[1]
    m_out = th * w                      # output rows, flattened with W
    m_h = (th + 2) * w                  # rows including the two 1-row halos

    w1 = w1_ref[...]                    # (cp, hidp) bf16
    b1 = b1_ref[...]                    # (1, hidp) f32

    # --- conv1: 1x1 conv + folded BN + GELU, computed directly into the
    # haloed h1 scratch (no VMEM->VMEM assembly copy of the input).  The halo
    # rows are the zero padding of conv2's input (pad=1 applied to the hidden
    # activation), so at the image top/bottom they are forced to exact zero.
    x_ctr = x_ctr_ref[0].reshape(m_out, cp)                        # bf16
    h1_ref[w:w + m_out] = _gelu(
        jnp.dot(x_ctr, w1, preferred_element_type=jnp.float32) + b1)
    top_keep = (r > 0).astype(jnp.float32)
    h1_ref[0:w] = top_keep * _gelu(
        jnp.dot(x_top_ref[0, 0], w1, preferred_element_type=jnp.float32) + b1)
    bot_keep = (r < n_r - 1).astype(jnp.float32)
    h1_ref[w + m_out:m_h] = bot_keep * _gelu(
        jnp.dot(x_bot_ref[0, 0], w1, preferred_element_type=jnp.float32) + b1)

    h1 = h1_ref[...]                    # (m_h, hidp) f32

    # --- 3x3 depthwise conv + folded BN + GELU on the row-flattened layout.
    # Column neighbours are +/-1 in the flattened index, produced by a sublane
    # pltpu.roll (XLU) with a NON-NEGATIVE shift (m_h - 1 == roll by -1) plus
    # an image-edge mask; the circular wrap-around only ever lands on the
    # masked first/last columns.  Masks are shape-only and computed once.
    wdw = wdw_ref[...]                  # (3, 3, hidp) f32
    col = jax.lax.broadcasted_iota(jnp.int32, (m_h, 1), 0) % w

    # centre-column taps (dx == 1): no shift needed.
    acc = h1[0:m_out] * wdw[0, 1]
    acc = acc + h1[w:w + m_out] * wdw[1, 1]
    acc = acc + h1[2 * w:2 * w + m_out] * wdw[2, 1]
    # left-column taps (dx == 0): value at column j-1.  Only one shifted copy
    # is kept live at a time to limit vreg pressure.
    left = jnp.where(col == 0, 0.0, pltpu.roll(h1, 1, axis=0))
    for dy in range(3):
        acc = acc + left[dy * w:dy * w + m_out] * wdw[dy, 0]
    # right-column taps (dx == 2): value at column j+1 (positive-shift roll).
    right = jnp.where(col == w - 1, 0.0, pltpu.roll(h1, m_h - 1, axis=0))
    for dy in range(3):
        acc = acc + right[dy * w:dy * w + m_out] * wdw[dy, 2]
    h2 = _gelu(acc + b2_ref[...])       # (m_out, hidp) f32

    # --- conv3: 1x1 conv + folded BN + residual + final GELU.
    # TODO(synk): DropPath with drop_prob > 0 (training-time stochastic depth)
    # is not implemented; eval-mode identity is used (inference behaviour).
    y = jnp.dot(h2.astype(jnp.bfloat16), w3_ref[...],
                preferred_element_type=jnp.float32)
    y = y + b3_ref[...] + x_ctr.astype(jnp.float32)
    o_ref[...] = _gelu(y).reshape(1, th, w, cp).astype(o_ref.dtype)


# ---------------------------------------------------------------------------
# One-time parameter preparation (BN fold, lane padding, bf16 cast).
# ---------------------------------------------------------------------------
def prepare_mbconv_params(raw, in_chans, out_chans):
    """Done ONCE at init time, never per forward call."""
    assert in_chans == out_chans, "MBConv residual needs in_chans == out_chans"
    hidden = raw["hidden"]
    cp = _round_up(in_chans, LANE)
    hidp = _round_up(hidden, LANE)
    # Zero channel padding keeps the padded lanes exactly zero through the
    # whole block, so chained blocks compose in the padded layout.
    w1 = jnp.pad(raw["w1"] * raw["s1"][None, :],
                 ((0, cp - in_chans), (0, hidp - hidden))).astype(jnp.bfloat16)
    b1 = jnp.pad(raw["b1"], (0, hidp - hidden)).reshape(1, hidp).astype(jnp.float32)
    wdw = jnp.pad(raw["w_dw"] * raw["s2"][None, None, :],
                  ((0, 0), (0, 0), (0, hidp - hidden))).astype(jnp.float32)
    b2 = jnp.pad(raw["b2"], (0, hidp - hidden)).reshape(1, hidp).astype(jnp.float32)
    w3 = jnp.pad(raw["w3"] * raw["s3"][None, :],
                 ((0, hidp - hidden), (0, cp - out_chans))).astype(jnp.bfloat16)
    b3 = jnp.pad(raw["b3"], (0, cp - out_chans)).reshape(1, cp).astype(jnp.float32)
    return dict(w1=w1, b1=b1, wdw=wdw, b2=b2, w3=w3, b3=b3,
                c=in_chans, cp=cp, hidden=hidden, hidp=hidp)


# ---------------------------------------------------------------------------
# Layout conversion: done once at network entry / exit only; chained MBConv
# blocks consume and produce lane-padded NHWC bf16 directly.
# ---------------------------------------------------------------------------
def nchw_to_padded_nhwc(x_nchw, cp):
    B, C, H, W = x_nchw.shape
    x = jnp.transpose(x_nchw, (0, 2, 3, 1)).astype(jnp.bfloat16)
    if cp != C:
        x = jnp.pad(x, ((0, 0), (0, 0), (0, 0), (0, cp - C)))
    return x


def padded_nhwc_to_nchw(x, C):
    return jnp.transpose(x[..., :C], (0, 3, 1, 2)).astype(jnp.float32)


# ---------------------------------------------------------------------------
# Forward wrapper on lane-padded NHWC bf16 activations.
# ---------------------------------------------------------------------------
def mbconv_forward(x, prep, *, row_tile=None):
    B, H, W, cp = x.shape
    assert cp == prep["cp"] and x.dtype == jnp.bfloat16
    hidp = prep["hidp"]

    tile_budget, vmem_limit = _vmem_budget()
    th = row_tile if row_tile is not None else _choose_row_tile(
        H, W, cp, hidp, tile_budget)
    assert H % th == 0, (H, th)
    n_r = H // th
    # TODO(synk): for TinyViT stages with W not a multiple of 8 (14, 7) the
    # kernel stays correct but relies on compiler-inserted relayouts; pad W to
    # a multiple of 8 at network entry for best performance.

    in_specs = [
        # top / centre / bottom row windows of the input (halos are 1 row,
        # clamped at the image border and masked to zero inside the kernel).
        pl.BlockSpec((1, 1, W, cp),
                     lambda b, r: (b, jnp.maximum(r * th - 1, 0), 0, 0)),
        pl.BlockSpec((1, th, W, cp), lambda b, r: (b, r, 0, 0)),
        pl.BlockSpec((1, 1, W, cp),
                     lambda b, r: (b, jnp.minimum(r * th + th, H - 1), 0, 0)),
        # weights / biases: whole-array blocks, resident across the grid.
        pl.BlockSpec((cp, hidp), lambda b, r: (0, 0)),
        pl.BlockSpec((1, hidp), lambda b, r: (0, 0)),
        pl.BlockSpec((3, 3, hidp), lambda b, r: (0, 0, 0)),
        pl.BlockSpec((1, hidp), lambda b, r: (0, 0)),
        pl.BlockSpec((hidp, cp), lambda b, r: (0, 0)),
        pl.BlockSpec((1, cp), lambda b, r: (0, 0)),
    ]
    out_spec = pl.BlockSpec((1, th, W, cp), lambda b, r: (b, r, 0, 0))

    m_out = B * H * W
    m_halo = B * n_r * (th + 2) * W
    flops = (2 * m_halo * cp * hidp          # conv1 (incl. recomputed halos)
             + 18 * m_out * hidp             # 3x3 depthwise
             + 2 * m_out * hidp * cp)        # conv3
    transcendentals = m_halo * hidp + m_out * (hidp + cp)
    weight_bytes = (2 * (prep["w1"].size + prep["w3"].size)
                    + 4 * (prep["wdw"].size + prep["b1"].size
                           + prep["b2"].size + prep["b3"].size))
    bytes_accessed = 2 * (m_halo * cp + m_out * cp) + weight_bytes

    out = pl.pallas_call(
        _mbconv_kernel,
        out_shape=jax.ShapeDtypeStruct((B, H, W, cp), jnp.bfloat16),
        grid=(B, n_r),
        in_specs=in_specs,
        out_specs=out_spec,
        scratch_shapes=[pltpu.VMEM(((th + 2) * W, hidp), jnp.float32)],
        compiler_params=pltpu.CompilerParams(
            # (batch, row-tile) programs are fully independent -> megacore OK.
            dimension_semantics=("parallel", "parallel"),
            vmem_limit_bytes=vmem_limit),
        cost_estimate=pl.CostEstimate(
            flops=int(flops),
            transcendentals=int(transcendentals),
            bytes_accessed=int(bytes_accessed)),
    )(x, x, x, prep["w1"], prep["b1"], prep["wdw"], prep["b2"],
      prep["w3"], prep["b3"])
    return out


# ---------------------------------------------------------------------------
# Deterministic synthetic parameters (eval-mode BN folded to scale/bias).
# ---------------------------------------------------------------------------
def _bn_fold(key, c, eps=1e-5):
    k1, k2, k3, k4 = jax.random.split(key, 4)
    gamma = 1.0 + 0.1 * jax.random.normal(k1, (c,), jnp.float32)
    beta = 0.1 * jax.random.normal(k2, (c,), jnp.float32)
    mean = 0.1 * jax.random.normal(k3, (c,), jnp.float32)
    var = jax.random.uniform(k4, (c,), jnp.float32, 0.5, 1.5)
    scale = gamma / jnp.sqrt(var + eps)
    bias = beta - mean * scale
    return scale, bias


def init_mbconv_params(key, in_chans, out_chans, expand_ratio):
    hidden = int(in_chans * expand_ratio)
    ks = jax.random.split(key, 6)
    # conv1: PyTorch weight (hidden, in, 1, 1) -> stored (in, hidden)
    w1 = 0.1 * jax.random.normal(ks[0], (in_chans, hidden), jnp.float32)
    s1, b1 = _bn_fold(ks[1], hidden)
    # conv2: depthwise, PyTorch weight (hidden, 1, 3, 3) -> stored (3, 3, hidden)
    w_dw = 0.1 * jax.random.normal(ks[2], (3, 3, hidden), jnp.float32)
    s2, b2 = _bn_fold(ks[3], hidden)
    # conv3: PyTorch weight (out, hidden, 1, 1) -> stored (hidden, out).
    # NOTE: the real module inits conv3's BN gamma to 0 (bn_weight_init=0); we
    # use random "trained" BN stats so the output is non-trivial.
    w3 = 0.1 * jax.random.normal(ks[4], (hidden, out_chans), jnp.float32)
    s3, b3 = _bn_fold(ks[5], out_chans)
    return dict(w1=w1, s1=s1, b1=b1, w_dw=w_dw, s2=s2, b2=b2,
                w3=w3, s3=s3, b3=b3, hidden=hidden)


# ---------------------------------------------------------------------------
# Pure-JAX reference with the SAME precision policy (bf16 activations / MXU
# operands, f32 accumulation and elementwise math) for validating the kernel.
# ---------------------------------------------------------------------------
def mbconv_reference(x_nchw, raw):
    B, C, H, W = x_nchw.shape
    x = jnp.transpose(x_nchw, (0, 2, 3, 1)).astype(jnp.bfloat16)
    w1 = (raw["w1"] * raw["s1"][None, :]).astype(jnp.bfloat16)
    h1 = jnp.einsum("bhwc,cd->bhwd", x, w1, preferred_element_type=jnp.float32)
    h1 = _gelu(h1 + raw["b1"])
    wdw = raw["w_dw"] * raw["s2"][None, None, :]
    h1p = jnp.pad(h1, ((0, 0), (1, 1), (1, 1), (0, 0)))
    acc = jnp.zeros_like(h1)
    for dy in range(3):
        for dx in range(3):
            acc = acc + h1p[:, dy:dy + H, dx:dx + W, :] * wdw[dy, dx]
    h2 = _gelu(acc + raw["b2"])
    w3 = (raw["w3"] * raw["s3"][None, :]).astype(jnp.bfloat16)
    y = jnp.einsum("bhwd,dc->bhwc", h2.astype(jnp.bfloat16), w3,
                   preferred_element_type=jnp.float32)
    y = _gelu(y + raw["b3"] + x.astype(jnp.float32))
    return jnp.transpose(y, (0, 3, 1, 2))


if __name__ == "__main__":
    key = jax.random.PRNGKey(0)
    k_x, k_p = jax.random.split(key)

    B, C, H, W = 2, 4, 16, 16
    expand_ratio = 4.0  # hidden = 16
    x = jax.random.normal(k_x, (B, C, H, W), jnp.float32)
    raw = init_mbconv_params(k_p, in_chans=C, out_chans=C,
                             expand_ratio=expand_ratio)
    prep = prepare_mbconv_params(raw, C, C)   # BN fold / pad / cast: once

    # Network-entry layout conversion only; chained MBConv blocks stay in the
    # lane-padded NHWC bf16 layout between calls.
    x_p = nchw_to_padded_nhwc(x, prep["cp"])
    out_p = jax.block_until_ready(mbconv_forward(x_p, prep))
    out = padded_nhwc_to_nchw(out_p, C)       # network-exit conversion only

    ref = jax.block_until_ready(mbconv_reference(x, raw))
    # The kernel stores bf16; quantize the f32 reference identically so the
    # comparison measures accumulation-order error, not output rounding.
    ref_q = ref.astype(jnp.bfloat16).astype(jnp.float32)

    assert out.shape == (B, C, H, W)
    assert bool(jnp.all(jnp.isfinite(out)))
    max_err = float(jnp.max(jnp.abs(out - ref_q)))
    assert max_err < 2e-2, f"kernel deviates from reference: {max_err}"
    print("KERNEL_OK")
</pallas_src>

<mosaic_0001>
module attributes {stable_mosaic.version = 11 : i64} {
  func.func @_mbconv_kernel(%arg0: i32, %arg1: i32, %arg2: memref<1x1x16x128xbf16, #tpu.memory_space<vmem>>, %arg3: memref<1x16x16x128xbf16, #tpu.memory_space<vmem>>, %arg4: memref<1x1x16x128xbf16, #tpu.memory_space<vmem>>, %arg5: memref<128x128xbf16, #tpu.memory_space<vmem>>, %arg6: memref<1x128xf32, #tpu.memory_space<vmem>>, %arg7: memref<3x3x128xf32, #tpu.memory_space<vmem>>, %arg8: memref<1x128xf32, #tpu.memory_space<vmem>>, %arg9: memref<128x128xbf16, #tpu.memory_space<vmem>>, %arg10: memref<1x128xf32, #tpu.memory_space<vmem>>, %arg11: memref<1x16x16x128xbf16, #tpu.memory_space<vmem>>, %arg12: memref<288x128xf32, #tpu.memory_space<vmem>>) attributes {dimension_semantics = [#tpu.dimension_semantics<parallel>, #tpu.dimension_semantics<parallel>], iteration_bounds = array<i64: 2, 1>, scalar_prefetch = 0 : i64, scratch_operands = 1 : i64, tpu.core_type = #tpu.core_type<tc>, window_params = [{transform_indices = @transform_0, window_bounds = array<i64: 1, 1, 16, 128>}, {transform_indices = @transform_1, window_bounds = array<i64: 1, 16, 16, 128>}, {transform_indices = @transform_2, window_bounds = array<i64: 1, 1, 16, 128>}, {pipeline_mode = #tpu.pipeline_mode<synchronous>, transform_indices = @transform_3, window_bounds = array<i64: 128, 128>}, {pipeline_mode = #tpu.pipeline_mode<synchronous>, transform_indices = @transform_4, window_bounds = array<i64: 1, 128>}, {pipeline_mode = #tpu.pipeline_mode<synchronous>, transform_indices = @transform_5, window_bounds = array<i64: 3, 3, 128>}, {pipeline_mode = #tpu.pipeline_mode<synchronous>, transform_indices = @transform_6, window_bounds = array<i64: 1, 128>}, {pipeline_mode = #tpu.pipeline_mode<synchronous>, transform_indices = @transform_7, window_bounds = array<i64: 128, 128>}, {pipeline_mode = #tpu.pipeline_mode<synchronous>, transform_indices = @transform_8, window_bounds = array<i64: 1, 128>}, {transform_indices = @transform_9, window_bounds = array<i64: 1, 16, 16, 128>}]} {
    %c0 = arith.constant 0 : index
    %c0_0 = arith.constant 0 : index
    %0 = vector.load %arg5[%c0, %c0_0] : memref<128x128xbf16, #tpu.memory_space<vmem>>, vector<128x128xbf16>
    %c0_1 = arith.constant 0 : index
    %c0_2 = arith.constant 0 : index
    %1 = vector.load %arg6[%c0_1, %c0_2] : memref<1x128xf32, #tpu.memory_space<vmem>>, vector<1x128xf32>
    %c0_3 = arith.constant 0 : index
    %c0_4 = arith.constant 0 : index
    %c0_5 = arith.constant 0 : index
    %c0_6 = arith.constant 0 : index
    %2 = vector.load %arg3[%c0_3, %c0_4, %c0_5, %c0_6] : memref<1x16x16x128xbf16, #tpu.memory_space<vmem>>, vector<1x16x16x128xbf16>
    %3 = vector.shape_cast %2 : vector<1x16x16x128xbf16> to vector<16x16x128xbf16>
    %4 = vector.shape_cast %3 : vector<16x16x128xbf16> to vector<256x128xbf16>
    %cst = arith.constant dense<0.000000e+00> : vector<256x128xf32>
    %5 = tpu.matmul %4, %0, %cst {dimension_numbers = #tpu.dot_dimension_numbers<[1], [0], [0], [1], [0, 0, 1, 1], [], []>} : vector<256x128xbf16>, vector<128x128xbf16>, vector<256x128xf32> -> vector<256x128xf32>
    %6 = vector.broadcast %1 : vector<1x128xf32> to vector<256x128xf32>
    %7 = arith.addf %5, %6 : vector<256x128xf32>
    %8 = arith.mulf %7, %7 : vector<256x128xf32>
    %9 = arith.mulf %7, %8 : vector<256x128xf32>
    %cst_7 = arith.constant 4.471500e-02 : f32
    %10 = vector.broadcast %cst_7 : f32 to vector<256x128xf32>
    %11 = arith.mulf %10, %9 : vector<256x128xf32>
    %12 = arith.addf %7, %11 : vector<256x128xf32>
    %cst_8 = arith.constant 0.797884583 : f32
    %13 = vector.broadcast %cst_8 : f32 to vector<256x128xf32>
    %14 = arith.mulf %13, %12 : vector<256x128xf32>
    %15 = math.tanh %14 : vector<256x128xf32>
    %cst_9 = arith.constant 1.000000e+00 : f32
    %16 = vector.broadcast %cst_9 : f32 to vector<256x128xf32>
    %17 = arith.addf %16, %15 : vector<256x128xf32>
    %cst_10 = arith.constant 5.000000e-01 : f32
    %18 = vector.broadcast %cst_10 : f32 to vector<256x128xf32>
    %19 = arith.mulf %18, %17 : vector<256x128xf32>
    %20 = arith.mulf %7, %19 : vector<256x128xf32>
    %c16 = arith.constant 16 : index
    %c0_11 = arith.constant 0 : index
    %21 = vector.load %arg12[%c16, %c0_11] : memref<288x128xf32, #tpu.memory_space<vmem>>, vector<256x128xf32>
    tpu.vector_store %arg12[%c16, %c0_11], %20 {strides = array<i32>} : memref<288x128xf32, #tpu.memory_space<vmem>>, vector<256x128xf32>,
    %c0_i32 = arith.constant 0 : i32
    %22 = arith.cmpi sgt, %arg1, %c0_i32 : i32
    %23 = arith.extui %22 : i1 to i32
    %24 = arith.sitofp %23 : i32 to f32
    %c0_12 = arith.constant 0 : index
    %c0_13 = arith.constant 0 : index
    %c0_14 = arith.constant 0 : index
    %c0_15 = arith.constant 0 : index
    %25 = vector.load %arg2[%c0_12, %c0_13, %c0_14, %c0_15] : memref<1x1x16x128xbf16, #tpu.memory_space<vmem>>, vector<1x1x16x128xbf16>
    %26 = vector.shape_cast %25 : vector<1x1x16x128xbf16> to vector<16x128xbf16>
    %cst_16 = arith.constant dense<0.000000e+00> : vector<16x128xf32>
    %27 = tpu.matmul %26, %0, %cst_16 {dimension_numbers = #tpu.dot_dimension_numbers<[1], [0], [0], [1], [0, 0, 1, 1], [], []>} : vector<16x128xbf16>, vector<128x128xbf16>, vector<16x128xf32> -> vector<16x128xf32>
    %28 = vector.broadcast %1 : vector<1x128xf32> to vector<16x128xf32>
    %29 = arith.addf %27, %28 : vector<16x128xf32>
    %30 = arith.mulf %29, %29 : vector<16x128xf32>
    %31 = arith.mulf %29, %30 : vector<16x128xf32>
    %cst_17 = arith.constant 4.471500e-02 : f32
    %32 = vector.broadcast %cst_17 : f32 to vector<16x128xf32>
    %33 = arith.mulf %32, %31 : vector<16x128xf32>
    %34 = arith.addf %29, %33 : vector<16x128xf32>
    %cst_18 = arith.constant 0.797884583 : f32
    %35 = vector.broadcast %cst_18 : f32 to vector<16x128xf32>
    %36 = arith.mulf %35, %34 : vector<16x128xf32>
    %37 = math.tanh %36 : vector<16x128xf32>
    %cst_19 = arith.constant 1.000000e+00 : f32
    %38 = vector.broadcast %cst_19 : f32 to vector<16x128xf32>
    %39 = arith.addf %38, %37 : vector<16x128xf32>
    %cst_20 = arith.constant 5.000000e-01 : f32
    %40 = vector.broadcast %cst_20 : f32 to vector<16x128xf32>
    %41 = arith.mulf %40, %39 : vector<16x128xf32>
    %42 = arith.mulf %29, %41 : vector<16x128xf32>
    %43 = vector.broadcast %24 : f32 to vector<16x128xf32>
    %44 = arith.mulf %43, %42 : vector<16x128xf32>
    %c0_21 = arith.constant 0 : index
    %c0_22 = arith.constant 0 : index
    %45 = vector.load %arg12[%c0_21, %c0_22] : memref<288x128xf32, #tpu.memory_space<vmem>>, vector<16x128xf32>
    tpu.vector_store %arg12[%c0_21, %c0_22], %44 {strides = array<i32>} : memref<288x128xf32, #tpu.memory_space<vmem>>, vector<16x128xf32>,
    %c0_i32_23 = arith.constant 0 : i32
    %46 = arith.cmpi slt, %arg1, %c0_i32_23 : i32
    %47 = arith.extui %46 : i1 to i32
    %48 = arith.sitofp %47 : i32 to f32
    %c0_24 = arith.constant 0 : index
    %c0_25 = arith.constant 0 : index
    %c0_26 = arith.constant 0 : index
    %c0_27 = arith.constant 0 : index
    %49 = vector.load %arg4[%c0_24, %c0_25, %c0_26, %c0_27] : memref<1x1x16x128xbf16, #tpu.memory_space<vmem>>, vector<1x1x16x128xbf16>
    %50 = vector.shape_cast %49 : vector<1x1x16x128xbf16> to vector<16x128xbf16>
    %cst_28 = arith.constant dense<0.000000e+00> : vector<16x128xf32>
    %51 = tpu.matmul %50, %0, %cst_28 {dimension_numbers = #tpu.dot_dimension_numbers<[1], [0], [0], [1], [0, 0, 1, 1], [], []>} : vector<16x128xbf16>, vector<128x128xbf16>, vector<16x128xf32> -> vector<16x128xf32>
    %52 = vector.broadcast %1 : vector<1x128xf32> to vector<16x128xf32>
    %53 = arith.addf %51, %52 : vector<16x128xf32>
    %54 = arith.mulf %53, %53 : vector<16x128xf32>
    %55 = arith.mulf %53, %54 : vector<16x128xf32>
    %cst_29 = arith.constant 4.471500e-02 : f32
    %56 = vector.broadcast %cst_29 : f32 to vector<16x128xf32>
    %57 = arith.mulf %56, %55 : vector<16x128xf32>
    %58 = arith.addf %53, %57 : vector<16x128xf32>
    %cst_30 = arith.constant 0.797884583 : f32
    %59 = vector.broadcast %cst_30 : f32 to vector<16x128xf32>
    %60 = arith.mulf %59, %58 : vector<16x128xf32>
    %61 = math.tanh %60 : vector<16x128xf32>
    %cst_31 = arith.constant 1.000000e+00 : f32
    %62 = vector.broadcast %cst_31 : f32 to vector<16x128xf32>
    %63 = arith.addf %62, %61 : vector<16x128xf32>
    %cst_32 = arith.constant 5.000000e-01 : f32
    %64 = vector.broadcast %cst_32 : f32 to vector<16x128xf32>
    %65 = arith.mulf %64, %63 : vector<16x128xf32>
    %66 = arith.mulf %53, %65 : vector<16x128xf32>
    %67 = vector.broadcast %48 : f32 to vector<16x128xf32>
    %68 = arith.mulf %67, %66 : vector<16x128xf32>
    %c272 = arith.constant 272 : index
    %c0_33 = arith.constant 0 : index
    %69 = vector.load %arg12[%c272, %c0_33] : memref<288x128xf32, #tpu.memory_space<vmem>>, vector<16x128xf32>
    tpu.vector_store %arg12[%c272, %c0_33], %68 {strides = array<i32>} : memref<288x128xf32, #tpu.memory_space<vmem>>, vector<16x128xf32>,
    %c0_34 = arith.constant 0 : index
    %c0_35 = arith.constant 0 : index
    %70 = vector.load %arg12[%c0_34, %c0_35] : memref<288x128xf32, #tpu.memory_space<vmem>>, vector<288x128xf32>
    %c0_36 = arith.constant 0 : index
    %c0_37 = arith.constant 0 : index
    %c0_38 = arith.constant 0 : index
    %71 = vector.load %arg7[%c0_36, %c0_37, %c0_38] : memref<3x3x128xf32, #tpu.memory_space<vmem>>, vector<3x3x128xf32>
    %72 = tpu.iota {dimensions = array<i32: 0>} : vector<288x1xi32>
    %c16_i32 = arith.constant 16 : i32
    %c0_i32_39 = arith.constant 0 : i32
    %73 = arith.cmpi eq, %c16_i32, %c0_i32_39 : i32
    %c1_i32 = arith.constant 1 : i32
    %74 = arith.select %73, %c1_i32, %c16_i32 : i32
    %75 = vector.broadcast %74 : i32 to vector<288x1xi32>
    %76 = arith.remsi %72, %75 : vector<288x1xi32>
    %c0_i32_40 = arith.constant 0 : i32
    %77 = vector.broadcast %c0_i32_40 : i32 to vector<288x1xi32>
    %78 = arith.cmpi ne, %76, %77 : vector<288x1xi32>
    %c0_i32_41 = arith.constant 0 : i32
    %79 = vector.broadcast %c0_i32_41 : i32 to vector<288x1xi32>
    %80 = arith.cmpi slt, %76, %79 : vector<288x1xi32>
    %c0_i32_42 = arith.constant 0 : i32
    %81 = arith.cmpi slt, %74, %c0_i32_42 : i32
    %82 = vector.broadcast %81 : i1 to vector<288x1xi1>
    %83 = vector.broadcast %82 : vector<288x1xi1> to vector<288x1xi1>
    %84 = arith.xori %80, %83 : vector<288x1xi1>
    %85 = arith.andi %84, %78 : vector<288x1xi1>
    %86 = vector.broadcast %74 : i32 to vector<288x1xi32>
    %87 = arith.addi %76, %86 : vector<288x1xi32>
    %88 = arith.select %85, %87, %76 : vector<288x1xi1>, vector<288x1xi32>
    %89 = vector.extract_strided_slice %70 {offsets = [0, 0], sizes = [256, 128], strides = [1, 1]} : vector<288x128xf32> to vector<256x128xf32>
    %90 = vector.extract_strided_slice %71 {offsets = [0, 1, 0], sizes = [1, 1, 128], strides = [1, 1, 1]} : vector<3x3x128xf32> to vector<1x1x128xf32>
    %91 = vector.shape_cast %90 : vector<1x1x128xf32> to vector<128xf32>
    %92 = vector.shape_cast %91 : vector<128xf32> to vector<1x128xf32>
    %93 = vector.broadcast %92 : vector<1x128xf32> to vector<256x128xf32>
    %94 = arith.mulf %89, %93 : vector<256x128xf32>
    %95 = vector.extract_strided_slice %70 {offsets = [16, 0], sizes = [256, 128], strides = [1, 1]} : vector<288x128xf32> to vector<256x128xf32>
    %96 = vector.extract_strided_slice %71 {offsets = [1, 1, 0], sizes = [1, 1, 128], strides = [1, 1, 1]} : vector<3x3x128xf32> to vector<1x1x128xf32>
    %97 = vector.shape_cast %96 : vector<1x1x128xf32> to vector<128xf32>
    %98 = vector.shape_cast %97 : vector<128xf32> to vector<1x128xf32>
    %99 = vector.broadcast %98 : vector<1x128xf32> to vector<256x128xf32>
    %100 = arith.mulf %95, %99 : vector<256x128xf32>
    %101 = arith.addf %94, %100 : vector<256x128xf32>
    %102 = vector.extract_strided_slice %70 {offsets = [32, 0], sizes = [256, 128], strides = [1, 1]} : vector<288x128xf32> to vector<256x128xf32>
    %103 = vector.extract_strided_slice %71 {offsets = [2, 1, 0], sizes = [1, 1, 128], strides = [1, 1, 1]} : vector<3x3x128xf32> to vector<1x1x128xf32>
    %104 = vector.shape_cast %103 : vector<1x1x128xf32> to vector<128xf32>
    %105 = vector.shape_cast %104 : vector<128xf32> to vector<1x128xf32>
    %106 = vector.broadcast %105 : vector<1x128xf32> to vector<256x128xf32>
    %107 = arith.mulf %102, %106 : vector<256x128xf32>
    %108 = arith.addf %101, %107 : vector<256x128xf32>
    %c0_i32_43 = arith.constant 0 : i32
    %109 = vector.broadcast %c0_i32_43 : i32 to vector<288x1xi32>
    %110 = arith.cmpi eq, %88, %109 : vector<288x1xi32>
    %c1_i32_44 = arith.constant 1 : i32
    %111 = tpu.dynamic_rotate %70 by %c1_i32_44 dim 0 : vector<288x128xf32>, i32 -> vector<288x128xf32>
    %cst_45 = arith.constant 0.000000e+00 : f32
    %112 = vector.shape_cast %110 : vector<288x1xi1> to vector<288x1xi1>
    %113 = vector.broadcast %112 : vector<288x1xi1> to vector<288x128xi1>
    %114 = vector.broadcast %cst_45 : f32 to vector<288x128xf32>
    %115 = arith.select %113, %114, %111 : vector<288x128xi1>, vector<288x128xf32>
    %116 = vector.extract_strided_slice %115 {offsets = [0, 0], sizes = [256, 128], strides = [1, 1]} : vector<288x128xf32> to vector<256x128xf32>
    %117 = vector.extract_strided_slice %71 {offsets = [0, 0, 0], sizes = [1, 1, 128], strides = [1, 1, 1]} : vector<3x3x128xf32> to vector<1x1x128xf32>
    %118 = vector.shape_cast %117 : vector<1x1x128xf32> to vector<128xf32>
    %119 = vector.shape_cast %118 : vector<128xf32> to vector<1x128xf32>
    %120 = vector.broadcast %119 : vector<1x128xf32> to vector<256x128xf32>
    %121 = arith.mulf %116, %120 : vector<256x128xf32>
    %122 = arith.addf %108, %121 : vector<256x128xf32>
    %123 = vector.extract_strided_slice %115 {offsets = [16, 0], sizes = [256, 128], strides = [1, 1]} : vector<288x128xf32> to vector<256x128xf32>
    %124 = vector.extract_strided_slice %71 {offsets = [1, 0, 0], sizes = [1, 1, 128], strides = [1, 1, 1]} : vector<3x3x128xf32> to vector<1x1x128xf32>
    %125 = vector.shape_cast %124 : vector<1x1x128xf32> to vector<128xf32>
    %126 = vector.shape_cast %125 : vector<128xf32> to vector<1x128xf32>
    %127 = vector.broadcast %126 : vector<1x128xf32> to vector<256x128xf32>
    %128 = arith.mulf %123, %127 : vector<256x128xf32>
    %129 = arith.addf %122, %128 : vector<256x128xf32>
    %130 = vector.extract_strided_slice %115 {offsets = [32, 0], sizes = [256, 128], strides = [1, 1]} : vector<288x128xf32> to vector<256x128xf32>
    %131 = vector.extract_strided_slice %71 {offsets = [2, 0, 0], sizes = [1, 1, 128], strides = [1, 1, 1]} : vector<3x3x128xf32> to vector<1x1x128xf32>
    %132 = vector.shape_cast %131 : vector<1x1x128xf32> to vector<128xf32>
    %133 = vector.shape_cast %132 : vector<128xf32> to vector<1x128xf32>
    %134 = vector.broadcast %133 : vector<1x128xf32> to vector<256x128xf32>
    %135 = arith.mulf %130, %134 : vector<256x128xf32>
    %136 = arith.addf %129, %135 : vector<256x128xf32>
    %c15_i32 = arith.constant 15 : i32
    %137 = vector.broadcast %c15_i32 : i32 to vector<288x1xi32>
    %138 = arith.cmpi eq, %88, %137 : vector<288x1xi32>
    %c287_i32 = arith.constant 287 : i32
    %139 = tpu.dynamic_rotate %70 by %c287_i32 dim 0 : vector<288x128xf32>, i32 -> vector<288x128xf32>
    %cst_46 = arith.constant 0.000000e+00 : f32
    %140 = vector.shape_cast %138 : vector<288x1xi1> to vector<288x1xi1>
    %141 = vector.broadcast %140 : vector<288x1xi1> to vector<288x128xi1>
    %142 = vector.broadcast %cst_46 : f32 to vector<288x128xf32>
    %143 = arith.select %141, %142, %139 : vector<288x128xi1>, vector<288x128xf32>
    %144 = vector.extract_strided_slice %143 {offsets = [0, 0], sizes = [256, 128], strides = [1, 1]} : vector<288x128xf32> to vector<256x128xf32>
    %145 = vector.extract_strided_slice %71 {offsets = [0, 2, 0], sizes = [1, 1, 128], strides = [1, 1, 1]} : vector<3x3x128xf32> to vector<1x1x128xf32>
    %146 = vector.shape_cast %145 : vector<1x1x128xf32> to vector<128xf32>
    %147 = vector.shape_cast %146 : vector<128xf32> to vector<1x128xf32>
    %148 = vector.broadcast %147 : vector<1x128xf32> to vector<256x128xf32>
    %149 = arith.mulf %144, %148 : vector<256x128xf32>
    %150 = arith.addf %136, %149 : vector<256x128xf32>
    %151 = vector.extract_strided_slice %143 {offsets = [16, 0], sizes = [256, 128], strides = [1, 1]} : vector<288x128xf32> to vector<256x128xf32>
    %152 = vector.extract_strided_slice %71 {offsets = [1, 2, 0], sizes = [1, 1, 128], strides = [1, 1, 1]} : vector<3x3x128xf32> to vector<1x1x128xf32>
    %153 = vector.shape_cast %152 : vector<1x1x128xf32> to vector<128xf32>
    %154 = vector.shape_cast %153 : vector<128xf32> to vector<1x128xf32>
    %155 = vector.broadcast %154 : vector<1x128xf32> to vector<256x128xf32>
    %156 = arith.mulf %151, %155 : vector<256x128xf32>
    %157 = arith.addf %150, %156 : vector<256x128xf32>
    %158 = vector.extract_strided_slice %143 {offsets = [32, 0], sizes = [256, 128], strides = [1, 1]} : vector<288x128xf32> to vector<256x128xf32>
    %159 = vector.extract_strided_slice %71 {offsets = [2, 2, 0], sizes = [1, 1, 128], strides = [1, 1, 1]} : vector<3x3x128xf32> to vector<1x1x128xf32>
    %160 = vector.shape_cast %159 : vector<1x1x128xf32> to vector<128xf32>
    %161 = vector.shape_cast %160 : vector<128xf32> to vector<1x128xf32>
    %162 = vector.broadcast %161 : vector<1x128xf32> to vector<256x128xf32>
    %163 = arith.mulf %158, %162 : vector<256x128xf32>
    %164 = arith.addf %157, %163 : vector<256x128xf32>
    %c0_47 = arith.constant 0 : index
    %c0_48 = arith.constant 0 : index
    %165 = vector.load %arg8[%c0_47, %c0_48] : memref<1x128xf32, #tpu.memory_space<vmem>>, vector<1x128xf32>
    %166 = vector.broadcast %165 : vector<1x128xf32> to vector<256x128xf32>
    %167 = arith.addf %164, %166 : vector<256x128xf32>
    %168 = arith.mulf %167, %167 : vector<256x128xf32>
    %169 = arith.mulf %167, %168 : vector<256x128xf32>
    %cst_49 = arith.constant 4.471500e-02 : f32
    %170 = vector.broadcast %cst_49 : f32 to vector<256x128xf32>
    %171 = arith.mulf %170, %169 : vector<256x128xf32>
    %172 = arith.addf %167, %171 : vector<256x128xf32>
    %cst_50 = arith.constant 0.797884583 : f32
    %173 = vector.broadcast %cst_50 : f32 to vector<256x128xf32>
    %174 = arith.mulf %173, %172 : vector<256x128xf32>
    %175 = math.tanh %174 : vector<256x128xf32>
    %cst_51 = arith.constant 1.000000e+00 : f32
    %176 = vector.broadcast %cst_51 : f32 to vector<256x128xf32>
    %177 = arith.addf %176, %175 : vector<256x128xf32>
    %cst_52 = arith.constant 5.000000e-01 : f32
    %178 = vector.broadcast %cst_52 : f32 to vector<256x128xf32>
    %179 = arith.mulf %178, %177 : vector<256x128xf32>
    %180 = arith.mulf %167, %179 : vector<256x128xf32>
    %181 = arith.truncf %180 : vector<256x128xf32> to vector<256x128xbf16>
    %c0_53 = arith.constant 0 : index
    %c0_54 = arith.constant 0 : index
    %182 = vector.load %arg9[%c0_53, %c0_54] : memref<128x128xbf16, #tpu.memory_space<vmem>>, vector<128x128xbf16>
    %cst_55 = arith.constant dense<0.000000e+00> : vector<256x128xf32>
    %183 = tpu.matmul %181, %182, %cst_55 {dimension_numbers = #tpu.dot_dimension_numbers<[1], [0], [0], [1], [0, 0, 1, 1], [], []>} : vector<256x128xbf16>, vector<128x128xbf16>, vector<256x128xf32> -> vector<256x128xf32>
    %c0_56 = arith.constant 0 : index
    %c0_57 = arith.constant 0 : index
    %184 = vector.load %arg10[%c0_56, %c0_57] : memref<1x128xf32, #tpu.memory_space<vmem>>, vector<1x128xf32>
    %185 = vector.broadcast %184 : vector<1x128xf32> to vector<256x128xf32>
    %186 = arith.addf %183, %185 : vector<256x128xf32>
    %187 = arith.extf %4 : vector<256x128xbf16> to vector<256x128xf32>
    %188 = arith.addf %186, %187 : vector<256x128xf32>
    %189 = arith.mulf %188, %188 : vector<256x128xf32>
    %190 = arith.mulf %188, %189 : vector<256x128xf32>
    %cst_58 = arith.constant 4.471500e-02 : f32
    %191 = vector.broadcast %cst_58 : f32 to vector<256x128xf32>
    %192 = arith.mulf %191, %190 : vector<256x128xf32>
    %193 = arith.addf %188, %192 : vector<256x128xf32>
    %cst_59 = arith.constant 0.797884583 : f32
    %194 = vector.broadcast %cst_59 : f32 to vector<256x128xf32>
    %195 = arith.mulf %194, %193 : vector<256x128xf32>
    %196 = math.tanh %195 : vector<256x128xf32>
    %cst_60 = arith.constant 1.000000e+00 : f32
    %197 = vector.broadcast %cst_60 : f32 to vector<256x128xf32>
    %198 = arith.addf %197, %196 : vector<256x128xf32>
    %cst_61 = arith.constant 5.000000e-01 : f32
    %199 = vector.broadcast %cst_61 : f32 to vector<256x128xf32>
    %200 = arith.mulf %199, %198 : vector<256x128xf32>
    %201 = arith.mulf %188, %200 : vector<256x128xf32>
    %202 = vector.shape_cast %201 : vector<256x128xf32> to vector<1x16x16x128xf32>
    %203 = arith.truncf %202 : vector<1x16x16x128xf32> to vector<1x16x16x128xbf16>
    %c0_62 = arith.constant 0 : index
    %c0_63 = arith.constant 0 : index
    %c0_64 = arith.constant 0 : index
    %c0_65 = arith.constant 0 : index
    %204 = vector.load %arg11[%c0_62, %c0_63, %c0_64, %c0_65] : memref<1x16x16x128xbf16, #tpu.memory_space<vmem>>, vector<1x16x16x128xbf16>
    tpu.vector_store %arg11[%c0_62, %c0_63, %c0_64, %c0_65], %203 {strides = array<i32>} : memref<1x16x16x128xbf16, #tpu.memory_space<vmem>>, vector<1x16x16x128xbf16>,
    return
  }
  func.func @transform_0(%arg0: i32, %arg1: i32) -> (i32, i32, i32, i32) {
    %c16_i32 = arith.constant 16 : i32
    %0 = arith.muli %arg1, %c16_i32 : i32
    %c1_i32 = arith.constant 1 : i32
    %1 = arith.subi %0, %c1_i32 : i32
    %c0_i32 = arith.constant 0 : i32
    %2 = arith.maxsi %1, %c0_i32 : i32
    %c0_i32_0 = arith.constant 0 : i32
    %c0_i32_1 = arith.constant 0 : i32
    %c0_i32_2 = arith.constant 0 : i32
    return %arg0, %2, %c0_i32_0, %c0_i32_1 : i32, i32, i32, i32
  }
  func.func @transform_1(%arg0: i32, %arg1: i32) -> (i32, i32, i32, i32) {
    %c0_i32 = arith.constant 0 : i32
    %c0_i32_0 = arith.constant 0 : i32
    %c0_i32_1 = arith.constant 0 : i32
    return %arg0, %arg1, %c0_i32, %c0_i32_0 : i32, i32, i32, i32
  }
  func.func @transform_2(%arg0: i32, %arg1: i32) -> (i32, i32, i32, i32) {
    %c16_i32 = arith.constant 16 : i32
    %0 = arith.muli %arg1, %c16_i32 : i32
    %c16_i32_0 = arith.constant 16 : i32
    %1 = arith.addi %0, %c16_i32_0 : i32
    %c15_i32 = arith.constant 15 : i32
    %2 = arith.minsi %1, %c15_i32 : i32
    %c0_i32 = arith.constant 0 : i32
    %c0_i32_1 = arith.constant 0 : i32
    %c0_i32_2 = arith.constant 0 : i32
    return %arg0, %2, %c0_i32, %c0_i32_1 : i32, i32, i32, i32
  }
  func.func @transform_3(%arg0: i32, %arg1: i32) -> (i32, i32) {
    %c0_i32 = arith.constant 0 : i32
    %c0_i32_0 = arith.constant 0 : i32
    %c0_i32_1 = arith.constant 0 : i32
    return %c0_i32, %c0_i32_0 : i32, i32
  }
  func.func @transform_4(%arg0: i32, %arg1: i32) -> (i32, i32) {
    %c0_i32 = arith.constant 0 : i32
    %c0_i32_0 = arith.constant 0 : i32
    %c0_i32_1 = arith.constant 0 : i32
    return %c0_i32, %c0_i32_0 : i32, i32
  }
  func.func @transform_5(%arg0: i32, %arg1: i32) -> (i32, i32, i32) {
    %c0_i32 = arith.constant 0 : i32
    %c0_i32_0 = arith.constant 0 : i32
    %c0_i32_1 = arith.constant 0 : i32
    %c0_i32_2 = arith.constant 0 : i32
    return %c0_i32, %c0_i32_0, %c0_i32_1 : i32, i32, i32
  }
  func.func @transform_6(%arg0: i32, %arg1: i32) -> (i32, i32) {
    %c0_i32 = arith.constant 0 : i32
    %c0_i32_0 = arith.constant 0 : i32
    %c0_i32_1 = arith.constant 0 : i32
    return %c0_i32, %c0_i32_0 : i32, i32
  }
  func.func @transform_7(%arg0: i32, %arg1: i32) -> (i32, i32) {
    %c0_i32 = arith.constant 0 : i32
    %c0_i32_0 = arith.constant 0 : i32
    %c0_i32_1 = arith.constant 0 : i32
    return %c0_i32, %c0_i32_0 : i32, i32
  }
  func.func @transform_8(%arg0: i32, %arg1: i32) -> (i32, i32) {
    %c0_i32 = arith.constant 0 : i32
    %c0_i32_0 = arith.constant 0 : i32
    %c0_i32_1 = arith.constant 0 : i32
    return %c0_i32, %c0_i32_0 : i32, i32
  }
  func.func @transform_9(%arg0: i32, %arg1: i32) -> (i32, i32, i32, i32) {
    %c0_i32 = arith.constant 0 : i32
    %c0_i32_0 = arith.constant 0 : i32
    %c0_i32_1 = arith.constant 0 : i32
    return %arg0, %arg1, %c0_i32, %c0_i32_0 : i32, i32, i32, i32
  }
}

</mosaic_0001>

<bundles_post_ra>
// kernel: tpu_custom_call.1
= control target key start
LH: loop header
LB: loop body
LE: loop exit
PB: predicated region body
PF: predicated region fallthrough
CT: control target
= control target key end

     0   :  { %s7481_s0 = inlined_call_operand.hbm [shape: bf16[2,16,16,128], index: 0, kind: input, shape index: {}]   ;;  %s7482_s1 = inlined_call_operand.hbm [shape: bf16[2,16,16,128], index: 1, kind: input, shape index: {}]   ;;  %s7483_s2 = inlined_call_operand.hbm [shape: bf16[2,16,16,128], index: 2, kind: input, shape index: {}]   ;;  %s7484_s3 = inlined_call_operand.hbm [shape: bf16[128,128], index: 3, kind: input, shape index: {}]   ;;  %s7485_s4 = inlined_call_operand.vmem [shape: f32[1,128], index: 4, kind: input, shape index: {}]   ;;  %s7486_s5 = inlined_call_operand.hbm [shape: f32[3,3,128], index: 5, kind: input, shape index: {}]   ;;  %s7487_s6 = inlined_call_operand.vmem [shape: f32[1,128], index: 6, kind: input, shape index: {}]   ;;  %s7488_s7 = inlined_call_operand.hbm [shape: bf16[128,128], index: 7, kind: input, shape index: {}]   ;;  %s7489_s8 = inlined_call_operand.vmem [shape: f32[1,128], index: 8, kind: input, shape index: {}]   ;;  %s7490_s9 = inlined_call_operand.hbm [shape: bf16[2,16,16,128], index: 9, kind: output, shape index: {}]  }
   0x1   :  { %7579 = sst [smem:[#allocation93_spill]] %s7482_s1 }
   0x2   :  { %7580 = sst [smem:[#allocation94_spill]] %s7484_s3 }
   0x3   :  { %7581 = sst [smem:[#allocation95_spill]] %s7486_s5 }
   0x4   :  { %14 = vsyncpa [#allocation4], 0 }
   0x5   :  { %16 = vsyncpa [#allocation4 + $0x1], 0 }
   0x6   :  { %17 = vsyncpa [#allocation7], 0 }
   0x7   :  { %19 = vsyncpa [#allocation7 + $0x1], 0 }
   0x8   :  { %20 = vsyncpa [#allocation10], 0 }
   0x9   :  { %21 = vsyncpa [#allocation13], 0 }
   0xa   :  { %22 = vsyncpa [#allocation5], 0 }
   0xb   :  { %24 = vsyncpa [#allocation5 + $0x1], 0  ;;  %s4802_s30 = smov 0   ;;  %s4804_s10 = smov 0  }
   0xc   :  { %s4806_s11 = smov 0   ;;  %s4808_s12 = smov 0  }
   0xd   :  { %s4810_s13 = smov 0   ;;  %s4812_s14 = smov 0  }
   0xe LB: > { %7582 = sst [smem:[#allocation20_spill]] %s4723_s30  ;;  %s4833_s15 = sadd.s32 4294967295, %s4743_s14   ;;  %s4743_s14 = sphi %s4812_s14, %s30_s14   ;;  %s4739_s13 = sphi %s4810_s13, %s7894_s13   ;;  %s4735_s12 = sphi %s4808_s12, %s7893_s12   ;;  %s4731_s11 = sphi %s4806_s11, %s7892_s11   ;;  %s4727_s10 = sphi %s4804_s10, %s7896_s10   ;;  %s4723_s30 = sphi %s4802_s30, %s7895_s30  }
   0xf   : > { %7583 = sst [smem:[#allocation21_spill]] %s4731_s11  ;;  %s3839_s16 = sadd.s32 4294967294, %s4743_s14  }
  0x10   : > { %7584 = sst [smem:[#allocation22_spill]] %s4739_s13  ;;  %p72_p0 = scmp.ne.s32.totalorder %s4727_s10, %s4723_s30 }
  0x11   : > { %7585 = sst [smem:[#allocation23_spill]] %s4743_s14  ;;  %p73_p1 = scmp.eq.s32.totalorder %s4833_s15, 0 }
  0x12   : > { %p288_p2 = scmp.eq.s32.totalorder %s4833_s15, 1  ;;  %p294_p3 = scmp.eq.s32.totalorder %s3839_s16, 1 }
  0x13   : > { %p4842_p4 = por %p73_p1, %p72_p0  ;;  %p3840_p5 = scmp.ge.s32.totalorder %s4743_s14, 1 }
  0x14   : > { %p4847_p6 = por %p294_p3, %p72_p0  ;;  %p301_p7 = scmp.lt.s32.totalorder %s4743_s14, 3 }
  0x15   : > { %s7589_s3 = sld [smem:[#allocation94_spill]]  ;;  %s4745_s23 = smov [#allocation9]  }
  0x16   : > { %s7587_s18 = scalar_select %p4847_p6, 1, 0 }
  0x17   : > { %p4855_p8 = pnand %p3840_p5, %p301_p7  ;;  %s314_s24 = sshll.u32 %s4745_s23, 4  ;;  %s315_s24 = int_to_ptr.vmem [resolvable:$true] %s314_s24 }
  0x18   : > { %7588 = sst [smem:[#allocation24_spill]] %s7587_s18  ;;  %s7491_s26 = smov 64  }
  0x19   : > { %p4174_p9 = pneg %p4855_p8  ;;  %s7493_s27 = smov 4  }
  0x1a   : > { %s42_s28 = sadd.s32 1, %s4739_s13  ;;  %s59_s29 = sadd.s32 1, %s4731_s11 }
  0x1b   : > { %s312_s21 = sshll.u32 %s7589_s3, 4  ;;  %p4863_p10 = pnand %p4174_p9, %p73_p1  ;;  %s313_s21 = int_to_ptr.hbm [resolvable:$true] %s312_s21 }
  0x1c   : > { %p44_p12 = scmp.ge.s32.totalorder %s42_s28, 2  ;;  %p66_p13 = scmp.ne.s32.totalorder %s4731_s11, %s4727_s10 }
  0x1d   : > { %4177 = dma.hbm_to_vmem [thread:$0]  (!%p4863_p10), %s313_s21, 1024, %s315_s24, [#allocation10], %s7491_s26, %s7491_s26, %s7493_s27  }
  0x1e   : > { %p67_p0 = scmp.eq.s32.totalorder %s4743_s14, 0  ;;  %s7898_s28 = smov (%p44_p12, %s42_s28), 0 }
  0x1f   : > { %7592 = sst [smem:[#allocation25_spill]] %s7898_s28  ;;  %p4882_p5 = por %p288_p2, %p66_p13 }
  0x20   : > { %p68_p3 = por %p67_p0, %p66_p13  ;;  %s54_s19 = ssub.s32 %s4739_s13, %s7898_s28 }
  0x21   : > { %s7593_s16 = scalar_select %p4882_p5, 1, 0 }
  0x22   : > { %p4201_p7 = scmp.lt.s32.totalorder %s4743_s14, 2  ;;  %p57_p9 = scmp.eq.s32.totalorder %s54_s19, 0 }
  0x23   : > { %7594 = sst [smem:[#allocation26_spill]] %s7593_s16  ;;  %s4890_s20 = sand.u32 1, %s4731_s11  }
  0x24   : > { %s4893_s21 = sshll.u32 %s4739_s13, 7  ;;  %p4895_p11 = pnand %p4201_p7, %p68_p3 }
  0x25   : > { %s4900_s24 = scalar_select %p57_p9, %s4731_s11, %s59_s29  }
  0x26   : > { %s393_s26 = sand.u32 1, %s4743_s14   ;;  %s3848_s27 = sshll.u32 %s4890_s20, 7 }
  0x27   : > { %7596 = sst [smem:[#allocation27_spill]] %s4900_s24  ;;  %s397_s30 = scalar_lea.vmem [#allocation6], %s3848_s27 }
  0x28   : > { %s7597_s1 = sld [smem:[#allocation93_spill]]  ;;  %s408_s16 = sshll.u32 %s397_s30, 4  ;;  %s409_s16 = int_to_ptr.vmem [resolvable:$true] %s408_s16 }
  0x29   : > { %s4908_s13 = scalar_lea.sflag [#allocation7], %s393_s26  ;;  %s7598_s29 = smov 4  }
  0x2a   : > { %s7599_s24 = smov 64   ;;  %s7600_s5 = sld [smem:[#allocation95_spill]] }
  0x2b   : > { %s4748_s27 = smov [#allocation11]   ;;  %s346_s26 = sshll.u32 %s7488_s7, 4  ;;  %s347_s26 = int_to_ptr.hbm [resolvable:$true] %s346_s26 }
  0x2c   : > { %s331_s30 = sshll.u32 %s4748_s27, 4  ;;  %s3845_s14 = sshll.u32 %s4890_s20, 3  ;;  %s332_s30 = int_to_ptr.vmem [resolvable:$true] %s331_s30 }
  0x2d   : > { %s380_s28 = scalar_lea.hbm %s7481_s0, %s4893_s21  ;;  %s4006_s25 = sadd.s32 120, %s4893_s21 }
  0x2e   : > { %s405_s19 = scalar_lea.hbm %s7597_s1, %s4893_s21  ;;  %s369_s1 = scalar_lea.vmem [#allocation3], %s3845_s14 }
  0x2f   : > { %s406_s18 = sshll.u32 %s405_s19, 4  ;;  %s381_s19 = sshll.u32 %s380_s28, 4  ;;  %s407_s18 = int_to_ptr.hbm [resolvable:$true] %s406_s18  ;;  %s382_s19 = int_to_ptr.hbm [resolvable:$true] %s381_s19 }
  0x30   : > { %4190 = dma.hbm_to_vmem [thread:$0]  (!%p4895_p11), %s407_s18, 2048, %s409_s16, %s4908_s13, %s7599_s24, %s7599_s24, %s7598_s29  }
  0x31   : > { %s329_s3 = sshll.u32 %s7600_s5, 4  ;;  %s4749_s18 = smov [#allocation12]   ;;  %s330_s3 = int_to_ptr.hbm [resolvable:$true] %s329_s3 }
  0x32   : > { %4180 = dma.hbm_to_vmem [thread:$0]  (!%p4863_p10), %s330_s3, 192, %s332_s30, [#allocation10], %s7599_s24, %s7599_s24, %s7598_s29  }
  0x33   : > { %s348_s11 = sshll.u32 %s4749_s18, 4  ;;  %s383_s5 = sshll.u32 %s369_s1, 4  ;;  %s349_s11 = int_to_ptr.vmem [resolvable:$true] %s348_s11  ;;  %s384_s5 = int_to_ptr.vmem [resolvable:$true] %s383_s5 }
  0x34   : > { %4183 = dma.hbm_to_vmem [thread:$0]  (!%p4863_p10), %s347_s26, 1024, %s349_s11, [#allocation13], %s7599_s24, %s7599_s24, %s7598_s29  }
  0x35   : > { %s366_s3 = scalar_lea.sflag [#allocation4], %s4890_s20  ;;  %s422_s30 = scalar_lea.vmem [#allocation8], %s3845_s14 }
  0x36   : > { %4187 = dma.hbm_to_vmem [thread:$0]  (!%p4895_p11), %s382_s19, 128, %s384_s5, %s366_s3, %s7599_s24, %s7599_s24, %s7598_s29  }
  0x37   : > { %s436_s26 = sshll.u32 %s422_s30, 4  ;;  %s433_s16 = scalar_lea.hbm %s7483_s2, %s4006_s25  ;;  %s437_s26 = int_to_ptr.vmem [resolvable:$true] %s436_s26 }
  0x38   : > { %s434_s27 = sshll.u32 %s433_s16, 4  ;;  %448 = sbr.rel (%p4855_p8) target bundleno = 851 (0x353), region = 56  ;;  %s435_s27 = int_to_ptr.hbm [resolvable:$true] %s434_s27 }
  0x39   : > { %4193 = dma.hbm_to_vmem [thread:$0]  (!%p4895_p11), %s435_s27, 128, %s437_s26, %s4908_s13, %s7599_s24, %s7599_s24, %s7598_s29  }
  0x3d   : > { %s4956_s1 = sand.u32 1, %s4727_s10  }
  0x3e   : > { %s3855_s5 = sshll.u32 %s4956_s1, 3  ;;  %s451_s20 = scalar_lea.sflag [#allocation4], %s4956_s1 }
  0x3f   : > { %s4960_s21 = scalar_lea.vmem [#allocation3], %s3855_s5 }
  0x40   : > { %4702 = dma.done.wait (%p4842_p4), %s451_s20, 128  }
  0x41   : > { %4704 = vsyncadd (%p4842_p4), %s451_s20, 4294967168  ;;  %s460_s13 = sand.u32 1, %s4833_s15   ;;  %s3856_s22 = sshll.u32 %s4956_s1, 7 }
  0x42   : > { %s461_s23 = scalar_lea.sflag [#allocation7], %s460_s13  ;;  %s4970_s24 = scalar_lea.vmem [#allocation6], %s3856_s22 }
  0x43   : > { %4706 = dma.done.wait (%p4842_p4), %s461_s23, 2176  }
  0x44   : > { %4708 = vsyncadd (%p4842_p4), %s461_s23, 4294965120  ;;  %s4976_s29 = scalar_lea.vmem [#allocation8], %s3855_s5 }
  0x45   : > { %4710 = dma.done.wait (%p73_p1), [#allocation10], 1216  }
  0x46   : > { %4712 = vsyncadd (%p73_p1), [#allocation10], 4294966080 }
  0x47   : > { %4714 = dma.done.wait (%p73_p1), [#allocation13], 1024  }
  0x48   : > { %4716 = vsyncadd (%p73_p1), [#allocation13], 4294966272  ;;  %v4014_v0 = vld [vmem:[#allocation9 + $0x38] sm:$0xff]  ;;  %v4013_v1 = vld [vmem:[#allocation9 + $0x30] sm:$0xff]  ;;  %s7299_s11 = scalar_lea.vmem [#allocation14], %s3856_s22  ;;  %s4041_s5 = sshll.u32 %s4735_s12, 7 }
  0x49   : > { %741 = vmatpush.bf16.msra.mxu0 %v4014_v0  ;;  %4138 = vmatpush.bf16.msra.mxu1 %v4014_v0  ;;  %v4012_v2 = vld [vmem:[#allocation9 + $0x28] sm:$0xff]  ;;  %v4011_v3 = vld [vmem:[#allocation9 + $0x20] sm:$0xff]  ;;  %v4010_v4 = vld [vmem:[#allocation9 + $0x18] sm:$0xff]  ;;  %s3669_s13 = scalar_lea.hbm %s7490_s9, %s4041_s5  ;;  %s3670_s23 = sshll.u32 %s7299_s11, 4  ;;  %s3671_s23 = int_to_ptr.vmem [resolvable:$true] %s3670_s23 }
  0x4a   : > { %1209 = vmatpush.bf16.msra.mxu2 %v4014_v0  ;;  %v4009_v5 = vld [vmem:[#allocation9 + $0x10] sm:$0xff]  ;;  %v4008_v6 = vld [vmem:[#allocation9 + $0x8] sm:$0xff]  ;;  %v4007_v7 = vld [vmem:[#allocation9] sm:$0xff]  ;;  %s4669_s28 = scalar_lea.hbm %s7490_s9, 256 }
  0x4b   : > { %v4015_v8 = vld [vmem:[%s4970_s24] sm:$0xff]  ;;  %v4024_v9 = vld [vmem:[%s4970_s24 + $0x48] sm:$0xff]  ;;  %v4025_v11 = vld [vmem:[%s4970_s24 + $0x50] sm:$0xff] }
  0x4c   : > { %v4016_v10 = vld [vmem:[%s4970_s24 + $0x8] sm:$0xff]  ;;  %v4017_v12 = vld [vmem:[%s4970_s24 + $0x10] sm:$0xff]  ;;  %v4026_v13 = vld [vmem:[%s4970_s24 + $0x58] sm:$0xff] }
  0x4d   : > { %742 = vmatpush.bf16.msra.mxu0 %v4013_v1  ;;  %4139 = vmatpush.bf16.msra.mxu1 %v4013_v1  ;;  %v4018_v14 = vld [vmem:[%s4970_s24 + $0x18] sm:$0xff]  ;;  %v4027_v15 = vld [vmem:[%s4970_s24 + $0x60] sm:$0xff]  ;;  %v4028_v18 = vld [vmem:[%s4970_s24 + $0x68] sm:$0xff] }
  0x4e   : > { %1210 = vmatpush.bf16.msra.mxu2 %v4013_v1  ;;  %v4032_v16 = vld [vmem:[%s4976_s29] sm:$0xff]  ;;  %v4029_v20 = vld [vmem:[%s4970_s24 + $0x70] sm:$0xff]  ;;  %v4030_v22 = vld [vmem:[%s4970_s24 + $0x78] sm:$0xff]  ;;  %s3655_s29 = scalar_lea.sflag [#allocation5], %s4956_s1 }
  0x4f   : > { %v4019_v17 = vld [vmem:[%s4970_s24 + $0x20] sm:$0xff]  ;;  %v4020_v19 = vld [vmem:[%s4970_s24 + $0x28] sm:$0xff]  ;;  %v4021_v21 = vld [vmem:[%s4970_s24 + $0x30] sm:$0xff] }
  0x50   : > { %v4022_v23 = vld [vmem:[%s4970_s24 + $0x38] sm:$0xff]  ;;  %v5006_v25 = vld [vmem:[%s7485_s4] ss:$0 sm:$0xff]  ;;  %v4023_v26 = vld [vmem:[%s4970_s24 + $0x40] sm:$0xff] }
  0x51   : > { %743 = vmatpush.bf16.msra.mxu0 %v4012_v2  ;;  %4140 = vmatpush.bf16.msra.mxu1 %v4012_v2  ;;  %v4031_v24 = vld [vmem:[%s4960_s21] sm:$0xff] }
  0x52   : > { %1211 = vmatpush.bf16.msra.mxu2 %v4012_v2 }
  0x55   : > { %744 = vmatpush.bf16.msra.mxu0 %v4011_v3  ;;  %4141 = vmatpush.bf16.msra.mxu1 %v4011_v3 }
  0x56   : > { %1212 = vmatpush.bf16.msra.mxu2 %v4011_v3 }
  0x59   : > { %745 = vmatpush.bf16.msra.mxu0 %v4010_v4  ;;  %4142 = vmatpush.bf16.msra.mxu1 %v4010_v4 }
  0x5a   : > { %1213 = vmatpush.bf16.msra.mxu2 %v4010_v4 }
  0x5d   : > { %746 = vmatpush.bf16.msra.mxu0 %v4009_v5  ;;  %4143 = vmatpush.bf16.msra.mxu1 %v4009_v5 }
  0x5e   : > { %1214 = vmatpush.bf16.msra.mxu2 %v4009_v5 }
  0x61   : > { %747 = vmatpush.bf16.msra.mxu0 %v4008_v6  ;;  %4144 = vmatpush.bf16.msra.mxu1 %v4008_v6 }
  0x62   : > { %1215 = vmatpush.bf16.msra.mxu2 %v4008_v6 }
  0x65   : > { %748 = vmatpush.bf16.msra.mxu0 %v4007_v7  ;;  %4145 = vmatpush.bf16.msra.mxu1 %v4007_v7 }
  0x66   : > { %1216 = vmatpush.bf16.msra.mxu2 %v4007_v7 }
  0x68   : > { %749 = vmatmul.bf16.vlgmr.msra.gmra.mxu0 %v4015_v8  ;;  %794 = vmatmul.bf16.vlgmr.msra.gmra.mxu1 %v4024_v9 }
  0x69   : > { %1161 = vmatpush.bf16.msrb.mxu1 %v4014_v0  ;;  %1217 = vmatmul.bf16.vlgmr.msra.gmra.mxu2 %v4032_v16 }
  0x6d   : > { %1162 = vmatpush.bf16.msrb.mxu1 %v4013_v1 }
  0x71   : > { %1163 = vmatpush.bf16.msrb.mxu1 %v4012_v2 }
  0x75   : > { %1164 = vmatpush.bf16.msrb.mxu1 %v4011_v3 }
  0x78   : > { %754 = vmatmul.bf16.gmra.mxu0 %v4016_v10  ;;  %799 = vmatmul.bf16.gmra.mxu1 %v4025_v11 }
  0x79   : > { %1165 = vmatpush.bf16.msrb.mxu1 %v4010_v4 }
  0x7d   : > { %1166 = vmatpush.bf16.msrb.mxu1 %v4009_v5  ;;  %v5043_v5 = vld [vmem:[#allocation11] sm:$0x7] }
  0x81   : > { %1167 = vmatpush.bf16.msrb.mxu1 %v4008_v6  ;;  %v1285_v6 = vlaneseq }
  0x85   : > { %1168 = vmatpush.bf16.msrb.mxu1 %v4007_v7 }
  0x88   : > { %759 = vmatmul.bf16.gmra.mxu0 %v4017_v12  ;;  %804 = vmatmul.bf16.gmra.mxu1 %v4026_v13  ;;  %v1283_v13 = vld [vmem:[#allocation11 + $0x4] sm:$0x7] }
  0x98   : > { %764 = vmatmul.bf16.gmra.mxu0 %v4018_v14  ;;  %809 = vmatmul.bf16.gmra.mxu1 %v4027_v15  ;;  %v5051_v15 = vperm.slane %v5043_v5, 1 }
  0xa8   : > { %769 = vmatmul.bf16.gmra.mxu0 %v4019_v17  ;;  %814 = vmatmul.bf16.gmra.mxu1 %v4028_v18  ;;  %v5053_v17 = vld [vmem:[#allocation11 + $0x8] sm:$0x7] }
  0xb8   : > { %774 = vmatmul.bf16.gmra.mxu0 %v4020_v19  ;;  %819 = vmatmul.bf16.gmra.mxu1 %v4029_v20  ;;  %v5055_v20 = vshrl.u32 %v1285_v6, 7 }
  0xba   : > { %vm1989_vm0 = vcmp.lt.s32.totalorder %v5055_v20, 1  ;;  %vm2401_vm7 = vcmp.lt.s32.totalorder %v5055_v20, 7 }
  0xc8   : > { %779 = vmatmul.bf16.gmra.mxu0 %v4021_v21  ;;  %824 = vmatmul.bf16.gmra.mxu1 %v4030_v22 }
  0xd8   : > { %784 = vmatmul.bf16.gmra.mxu0 %v4022_v23  ;;  %1169 = vmatmul.bf16.vlgmr.msrb.gmra.mxu1 %v4031_v24  ;;  %v5057_v23 = vperm.slane %v1283_v13, 1 }
  0xe5   : > { %v750_v27 = vpop.f32.mrf.mxu0  ;;  %v795_v28 = vpop.f32.mrf.mxu1 }
  0xe6   : > { %v5010_v29 = vadd.f32 %v5006_v25, %v750_v27  ;;  %v5013_v30 = vadd.f32 %v5006_v25, %v795_v28 }
  0xe8   : > { %v830_v31 = vmul.f32 %v5010_v29, %v5010_v29  ;;  %v848_v32 = vmul.f32 %v5013_v30, %v5013_v30  ;;  %789 = vmatmul.bf16.gmra.mxu0 %v4023_v26 }
  0xea   : > { %v862_v33 = vmul.f32 %v830_v31, %v5010_v29  ;;  %v880_v34 = vmul.f32 %v848_v32, %v5013_v30  ;;  %v5068_v31 = vperm.slane %v5053_v17, 1 }
  0xec   : > { %v894_v35 = vmul.f32 0.044715, %v862_v33  ;;  %v912_v36 = vmul.f32 0.044715, %v880_v34 }
  0xed   : > { %v752_v37 = vpop.f32.mrf.mxu0  ;;  %v797_v38 = vpop.f32.mrf.mxu1 }
  0xee   : > { %v926_v39 = vadd.f32 %v894_v35, %v5010_v29  ;;  %v944_v40 = vadd.f32 %v912_v36, %v5013_v30  ;;  %v753_v41 = vadd.f32 %v5006_v25, %v752_v37  ;;  %v5025_v42 = vadd.f32 %v5006_v25, %v797_v38 }
  0xef   : > { %v5082_v37 = vperm.slane %v1283_v13, 0 }
  0xf0   : > { %v958_v43 = vmul.f32 0.7978846, %v926_v39  ;;  %v976_v44 = vmul.f32 0.7978846, %v944_v40  ;;  %v831_v45 = vmul.f32 %v753_v41, %v753_v41  ;;  %v849_v46 = vmul.f32 %v5025_v42, %v5025_v42 }
  0xf2   : > { %4264 = vtanh.f32 %v958_v43  ;;  %v863_v47 = vmul.f32 %v831_v45, %v753_v41  ;;  %v881_v48 = vmul.f32 %v849_v46, %v5025_v42 }
  0xf3   : > { %4266 = vtanh.f32 %v976_v44 }
  0xf4   : > { %v895_v49 = vmul.f32 0.044715, %v863_v47  ;;  %v913_v50 = vmul.f32 0.044715, %v881_v48 }
  0xf5   : > { %v755_v51 = vpop.f32.mrf.mxu0  ;;  %v800_v52 = vpop.f32.mrf.mxu1 }
  0xf6   : > { %v927_v53 = vadd.f32 %v895_v49, %v753_v41  ;;  %v945_v54 = vadd.f32 %v913_v50, %v5025_v42  ;;  %v5032_v55 = vadd.f32 %v5006_v25, %v755_v51  ;;  %v5035_v56 = vadd.f32 %v5006_v25, %v800_v52 }
  0xf8   : > { %v4265_v57 = vpop.eup %4264  ;;  %v959_v58 = vmul.f32 0.7978846, %v927_v53  ;;  %v977_v59 = vmul.f32 0.7978846, %v945_v54  ;;  %v832_v60 = vmul.f32 %v5032_v55, %v5032_v55  ;;  %v850_v61 = vmul.f32 %v5035_v56, %v5035_v56 }
  0xf9   : > { %v4267_v62 = vpop.eup %4266  ;;  %v1022_v1 = vadd.f32 1.0, %v4265_v57 }
  0xfa   : > { %4268 = vtanh.f32 %v959_v58  ;;  %v864_v63 = vmul.f32 %v832_v60, %v5032_v55  ;;  %v882_v0 = vmul.f32 %v850_v61, %v5035_v56  ;;  %v1040_v2 = vadd.f32 1.0, %v4267_v62 }
  0xfb   : > { %4270 = vtanh.f32 %v977_v59  ;;  %v1054_v12 = vmul.f32 0.5, %v1022_v1 }
  0xfc   : > { %v896_v3 = vmul.f32 0.044715, %v864_v63  ;;  %v914_v4 = vmul.f32 0.044715, %v882_v0  ;;  %v1072_v16 = vmul.f32 0.5, %v1040_v2 }
  0xfd   : > { %v757_v7 = vpop.f32.mrf.mxu0  ;;  %v802_v8 = vpop.f32.mrf.mxu1  ;;  %v5065_v28 = vmul.f32 %v1054_v12, %v5010_v29  ;;  %v5080_v29 = vperm.slane %v5043_v5, 0 }
  0xfe   : > { %v928_v9 = vadd.f32 %v896_v3, %v5032_v55  ;;  %v946_v10 = vadd.f32 %v914_v4, %v5035_v56  ;;  %v5048_v11 = vadd.f32 %v5006_v25, %v757_v7  ;;  %v5062_v27 = vadd.f32 %v5006_v25, %v802_v8 }
  0xff   : > { %v5071_v33 = vmul.f32 %v1072_v16, %v5013_v30  ;;  %v5092_v45 = vmul.f32 %v5057_v23, %v5065_v28  ;;  %v7505_v46 = vrot.slane %v5065_v28, 7 }
 0x100   : > { %v4269_v14 = vpop.eup %4268  ;;  %v960_v21 = vmul.f32 0.7978846, %v928_v9  ;;  %v978_v22 = vmul.f32 0.7978846, %v946_v10  ;;  %v833_v26 = vmul.f32 %v5048_v11, %v5048_v11  ;;  %v851_v35 = vmul.f32 %v5062_v27, %v5062_v27 }
 0x101   : > { %v4271_v18 = vpop.eup %4270  ;;  %v1023_v19 = vadd.f32 1.0, %v4269_v14  ;;  %7601 = vst [vmem:[#allocation28_spill] sm:$0xff] %v5071_v33  ;;  %v1775_v49 = vmul.f32 %v5051_v15, %v5071_v33  ;;  %v5101_v50 = vmul.f32 %v5057_v23, %v5071_v33  ;;  %v5105_v51 = vmul.f32 %v5068_v31, %v5071_v33 }
 0x102   : > { %v1041_v24 = vadd.f32 1.0, %v4271_v18  ;;  %4272 = vtanh.f32 %v960_v21  ;;  %v865_v34 = vmul.f32 %v833_v26, %v5048_v11  ;;  %v883_v43 = vmul.f32 %v851_v35, %v5062_v27 }
 0x103   : > { %v1055_v32 = vmul.f32 0.5, %v1023_v19  ;;  %4274 = vtanh.f32 %v978_v22  ;;  %7602 = vst [vmem:[#allocation29_spill] sm:$0xff] %v5101_v50 }
 0x104   : > { %v1073_v40 = vmul.f32 0.5, %v1041_v24  ;;  %v897_v30 = vmul.f32 0.044715, %v865_v34  ;;  %7603 = vst [vmem:[#allocation30_spill] sm:$0xff] %v5105_v51  ;;  %v915_v58 = vmul.f32 0.044715, %v883_v43 }
 0x105   : > { %v5076_v36 = vmul.f32 %v1055_v32, %v753_v41  ;;  %v760_v38 = vpop.f32.mrf.mxu0  ;;  %v805_v39 = vpop.f32.mrf.mxu1  ;;  %v1757_v41 = vmul.f32 %v5051_v15, %v5065_v28 }
 0x106   : > { %v5086_v44 = vadd.f32 %v5006_v25, %v760_v38  ;;  %v929_v57 = vadd.f32 %v897_v30, %v5048_v11  ;;  %v5115_v61 = vmul.f32 %v1073_v40, %v5025_v42  ;;  %v947_v2 = vadd.f32 %v915_v58, %v5062_v27 }
 0x107   : > { %v1956_v47 = vrot.slane %v5076_v36, 7  ;;  %v5121_v3 = vadd.f32 %v5006_v25, %v805_v39  ;;  %v5125_v4 = vmul.f32 %v5051_v15, %v5076_v36  ;;  %v5129_v6 = vmul.f32 %v5057_v23, %v5076_v36 }
 0x108   : > { %v4273_v52 = vpop.eup %4272  ;;  %7604 = vst [vmem:[#allocation31_spill] sm:$0xff] %v5115_v61  ;;  %v834_v63 = vmul.f32 %v5086_v44, %v5086_v44  ;;  %v961_v1 = vmul.f32 0.7978846, %v929_v57  ;;  %v979_v9 = vmul.f32 0.7978846, %v947_v2  ;;  %v5150_v26 = vmul.f32 %v5051_v15, %v5115_v61 }
 0x109   : > { %v2022_v54 = vsel %vm1989_vm0, %v7505_v46, %v1956_v47  ;;  %v4275_v59 = vpop.eup %4274  ;;  %v1024_v62 = vadd.f32 1.0, %v4273_v52  ;;  %v852_v10 = vmul.f32 %v5121_v3, %v5121_v3  ;;  %v5161_v34 = vmul.f32 %v5068_v31, %v5115_v61 }
 0x10a   : > { %v1042_v0 = vadd.f32 1.0, %v4275_v59  ;;  %v866_v7 = vmul.f32 %v834_v63, %v5086_v44  ;;  %4276 = vtanh.f32 %v961_v1  ;;  %v5168_v40 = vmul.f32 %v5080_v29, %v2022_v54 }
 0x10b   : > { %v1056_v42 = vmul.f32 0.5, %v1024_v62  ;;  %4278 = vtanh.f32 %v979_v9  ;;  %v884_v22 = vmul.f32 %v852_v10, %v5121_v3  ;;  %7607 = vst [vmem:[#allocation34_spill] sm:$0xff] %v5161_v34  ;;  %v5193_v10 = vperm.slane %v5053_v17, 0 }
 0x10c   : > { %v1074_v8 = vmul.f32 0.5, %v1042_v0  ;;  %v898_v18 = vmul.f32 0.044715, %v866_v7  ;;  %7608 = vst [vmem:[#allocation35_spill] sm:$0xff] %v5168_v40  ;;  %v5184_v0 = vmul.f32 %v5082_v37, %v2022_v54 }
 0x10d   : > { %v762_v12 = vpop.f32.mrf.mxu0  ;;  %v807_v13 = vpop.f32.mrf.mxu1  ;;  %v5136_v16 = vmul.f32 %v1056_v42, %v5032_v55  ;;  %v5154_v55 = vmul.f32 %v5057_v23, %v5115_v61  ;;  %v916_v59 = vmul.f32 0.044715, %v884_v22 }
 0x10e   : > { %v5139_v19 = vadd.f32 %v5006_v25, %v762_v12  ;;  %v5142_v21 = vmul.f32 %v1074_v8, %v5035_v56  ;;  %v5146_v24 = vadd.f32 %v5006_v25, %v807_v13  ;;  %v930_v52 = vadd.f32 %v898_v18, %v5086_v44 }
 0x10f   : > { %7606 = vst [vmem:[#allocation33_spill] sm:$0xff] %v5154_v55  ;;  %v1790_v32 = vmul.f32 %v5057_v23, %v5136_v16  ;;  %v1957_v56 = vrot.slane %v5136_v16, 7  ;;  %v948_v42 = vadd.f32 %v916_v59, %v5121_v3 }
 0x110   : > { %7605 = vst [vmem:[#allocation32_spill] sm:$0xff] %v5142_v21  ;;  %v1808_v39 = vmul.f32 %v5057_v23, %v5142_v21  ;;  %v4277_v57 = vpop.eup %4276  ;;  %v835_v62 = vmul.f32 %v5139_v19, %v5139_v19  ;;  %v853_v63 = vmul.f32 %v5146_v24, %v5146_v24  ;;  %v962_v1 = vmul.f32 0.7978846, %v930_v52 }
 0x111   : > { %v5170_v30 = vadd.f32 %v1790_v32, %v1757_v41  ;;  %v5174_v43 = vsel %vm1989_vm0, %v1956_v47, %v1957_v56  ;;  %v1025_v41 = vadd.f32 1.0, %v4277_v57  ;;  %v5187_v47 = vperm.slane %v5043_v5, 2  ;;  %v4279_v2 = vpop.eup %4278 }
 0x112   : > { %v5177_v58 = vadd.f32 %v1808_v39, %v1775_v49  ;;  %v867_v49 = vmul.f32 %v835_v62, %v5139_v19  ;;  %v885_v7 = vmul.f32 %v853_v63, %v5146_v24  ;;  %v1043_v54 = vadd.f32 1.0, %v4279_v2 }
 0x113   : > { %v1057_v12 = vmul.f32 0.5, %v1025_v41  ;;  %4280 = vtanh.f32 %v962_v1  ;;  %v980_v5 = vmul.f32 0.7978846, %v948_v42  ;;  %v5203_v39 = vmul.f32 %v5051_v15, %v5136_v16 }
 0x114   : > { %v899_v18 = vmul.f32 0.044715, %v867_v49  ;;  %v917_v22 = vmul.f32 0.044715, %v885_v7  ;;  %v1075_v17 = vmul.f32 0.5, %v1043_v54  ;;  %v5217_v1 = vmul.f32 %v5051_v15, %v5142_v21 }
 0x115   : > { %v765_v8 = vpop.f32.mrf.mxu0  ;;  %v810_v9 = vpop.f32.mrf.mxu1  ;;  %v5206_v52 = vmul.f32 %v1057_v12, %v5048_v11  ;;  %4282 = vtanh.f32 %v980_v5  ;;  %v5228_v12 = vmul.f32 %v5068_v31, %v5142_v21 }
 0x116   : > { %v5196_v13 = vadd.f32 %v5006_v25, %v765_v8  ;;  %v5199_v32 = vadd.f32 %v5006_v25, %v810_v9  ;;  %v931_v59 = vadd.f32 %v899_v18, %v5139_v19  ;;  %v949_v62 = vadd.f32 %v917_v22, %v5146_v24 }
 0x117   : > { %v1791_v11 = vmul.f32 %v5057_v23, %v5206_v52  ;;  %v7504_v2 = vrot.slane %v5206_v52, 7  ;;  %v5223_v42 = vmul.f32 %v1075_v17, %v5062_v27  ;;  %7610 = vst [vmem:[#allocation37_spill] sm:$0xff] %v5228_v12 }
 0x118   : > { %v836_v57 = vmul.f32 %v5196_v13, %v5196_v13  ;;  %v854_v63 = vmul.f32 %v5199_v32, %v5199_v32  ;;  %v963_v49 = vmul.f32 0.7978846, %v931_v59  ;;  %v981_v7 = vmul.f32 0.7978846, %v949_v62 }
 0x119   : > { %7609 = vst [vmem:[#allocation36_spill] sm:$0xff] %v5223_v42  ;;  %v4281_v9 = vpop.eup %4280  ;;  %v5231_v54 = vadd.f32 %v1791_v11, %v5125_v4  ;;  %v5237_v5 = vsel %vm1989_vm0, %v1957_v56, %v7504_v2  ;;  %v1809_v17 = vmul.f32 %v5057_v23, %v5223_v42  ;;  %v5245_v4 = vadd.s32 24, %v5055_v20 }
 0x11a   : > { %v868_v8 = vmul.f32 %v836_v57, %v5196_v13  ;;  %v886_v27 = vmul.f32 %v854_v63, %v5199_v32  ;;  %v1026_v62 = vadd.f32 1.0, %v4281_v9  ;;  %4284 = vtanh.f32 %v963_v49 }
 0x11b   : > { %v5249_v56 = vmul.f32 %v5068_v31, %v5136_v16  ;;  %v4283_v63 = vpop.eup %4282  ;;  %v5252_v18 = vadd.f32 %v1809_v17, %v5150_v26  ;;  %4286 = vtanh.f32 %v981_v7  ;;  %v1290_v49 = vadd.s32 32, %v5055_v20 }
 0x11c   : > { %v900_v11 = vmul.f32 0.044715, %v868_v8  ;;  %v918_v38 = vmul.f32 0.044715, %v886_v27  ;;  %v1058_v53 = vmul.f32 0.5, %v1026_v62  ;;  %v1044_v35 = vadd.f32 1.0, %v4283_v63 }
 0x11d   : > { %v767_v57 = vpop.f32.mrf.mxu0  ;;  %v812_v59 = vpop.f32.mrf.mxu1  ;;  %v1760_v7 = vmul.f32 %v5051_v15, %v5206_v52  ;;  %v5299_v61 = vmul.f32 %v5068_v31, %v5223_v42 }
 0x11e   : > { %v5255_v22 = vadd.f32 %v5006_v25, %v767_v57  ;;  %v932_v60 = vadd.f32 %v900_v11, %v5196_v13  ;;  %v950_v8 = vadd.f32 %v918_v38, %v5199_v32  ;;  %v5263_v2 = vadd.f32 %v5006_v25, %v812_v59 }
 0x11f   : > { %v5269_v27 = vmul.f32 %v1058_v53, %v5086_v44  ;;  %v1076_v17 = vmul.f32 0.5, %v1044_v35  ;;  %v1778_v38 = vmul.f32 %v5051_v15, %v5223_v42  ;;  %v5276_v59 = vmul.f32 %v5068_v31, %v5206_v52  ;;  %7612 = vst [vmem:[#allocation39_spill] sm:$0xff] %v5299_v61 }
 0x120   : > { %v837_v9 = vmul.f32 %v5255_v22, %v5255_v22  ;;  %v964_v57 = vmul.f32 0.7978846, %v932_v60  ;;  %v982_v11 = vmul.f32 0.7978846, %v950_v8  ;;  %v4285_v63 = vpop.eup %4284  ;;  %v5284_v60 = vadd.s32 40, %v5055_v20 }
 0x121   : > { %v1792_v46 = vmul.f32 %v5057_v23, %v5269_v27  ;;  %v1855_v44 = vmul.f32 %v5068_v31, %v5269_v27  ;;  %v4287_v35 = vpop.eup %4286  ;;  %v5287_v48 = vmul.f32 %v1076_v17, %v5121_v3  ;;  %v1027_v8 = vadd.f32 1.0, %v4285_v63 }
 0x122   : > { %v869_v53 = vmul.f32 %v837_v9, %v5255_v22  ;;  %4288 = vtanh.f32 %v964_v57  ;;  %v855_v14 = vmul.f32 %v5263_v2, %v5263_v2  ;;  %v1045_v9 = vadd.f32 1.0, %v4287_v35 }
 0x123   : > { %7611 = vst [vmem:[#allocation38_spill] sm:$0xff] %v5287_v48  ;;  %v5292_v26 = vadd.f32 %v1792_v46, %v5203_v39  ;;  %v5295_v21 = vadd.f32 %v1855_v44, %v5170_v30  ;;  %4290 = vtanh.f32 %v982_v11  ;;  %v1810_v3 = vmul.f32 %v5057_v23, %v5287_v48 }
 0x124   : > { %v1873_v17 = vmul.f32 %v5068_v31, %v5287_v48  ;;  %v1354_v57 = vand.u32 15, %v1290_v49  ;;  %v1059_v46 = vmul.f32 0.5, %v1027_v8  ;;  %v1077_v39 = vmul.f32 0.5, %v1045_v9 }
 0x125   : > { %v770_v41 = vpop.f32.mrf.mxu0  ;;  %v815_v62 = vpop.f32.mrf.mxu1  ;;  %v901_v40 = vmul.f32 0.044715, %v869_v53  ;;  %v5307_v30 = vadd.f32 %v1810_v3, %v5217_v1  ;;  %v887_v44 = vmul.f32 %v855_v14, %v5263_v2  ;;  %v1779_v53 = vmul.f32 %v5051_v15, %v5287_v48 }
 0x126   : > { %v5310_v11 = vadd.f32 %v1873_v17, %v5177_v58  ;;  %v5314_v35 = vadd.f32 %v5006_v25, %v770_v41  ;;  %v5318_v49 = vmul.f32 %v1059_v46, %v5139_v19  ;;  %v5321_v8 = vmul.f32 %v1077_v39, %v5146_v24 }
 0x127   : > { %v1761_v58 = vmul.f32 %v5051_v15, %v5269_v27  ;;  %v933_v9 = vadd.f32 %v901_v40, %v5255_v22  ;;  %v5328_v14 = vadd.f32 %v5006_v25, %v815_v62  ;;  %vm5330_vm1 = vcmp.eq.s32.totalorder %v1354_v57, 0 }
 0x128   : > { %7613 = vst [vmem:[#allocation40_spill] sm:$0xff] %v5310_v11  ;;  %v4289_v1 = vpop.eup %4288  ;;  %v1793_v24 = vmul.f32 %v5057_v23, %v5318_v49  ;;  %v1856_v3 = vmul.f32 %v5068_v31, %v5318_v49  ;;  %v919_v17 = vmul.f32 0.044715, %v887_v44  ;;  %v838_v46 = vmul.f32 %v5314_v35, %v5314_v35 }
 0x129   : > { %7614 = vst [vmem:[#allocation41_spill] sm:$0xff] %v5318_v49  ;;  %v4291_v19 = vpop.eup %4290  ;;  %v1811_v57 = vmul.f32 %v5057_v23, %v5321_v8  ;;  %v1874_v39 = vmul.f32 %v5068_v31, %v5321_v8  ;;  %v1028_v61 = vadd.f32 1.0, %v4289_v1  ;;  %v965_v55 = vmul.f32 0.7978846, %v933_v9 }
 0x12a   : > { %7615 = vst [vmem:[#allocation42_spill] sm:$0xff] %v5321_v8  ;;  %v5349_v11 = vadd.f32 %v1793_v24, %v1760_v7  ;;  %v5352_v42 = vadd.f32 %v1856_v3, %v5231_v54  ;;  %v1046_v34 = vadd.f32 1.0, %v4291_v19  ;;  %v951_v12 = vadd.f32 %v919_v17, %v5263_v2 }
 0x12b   : > { %v5354_v40 = vadd.f32 %v1811_v57, %v1778_v38  ;;  %v5357_v62 = vadd.f32 %v1874_v39, %v5252_v18  ;;  %v870_v51 = vmul.f32 %v838_v46, %v5314_v35  ;;  %v856_v44 = vmul.f32 %v5328_v14, %v5328_v14 }
 0x12c   : > { %7618 = vst [vmem:[#allocation43_spill] sm:$0xff] %v5352_v42  ;;  %v1060_v7 = vmul.f32 0.5, %v1028_v61  ;;  %v1078_v24 = vmul.f32 0.5, %v1046_v34  ;;  %4292 = vtanh.f32 %v965_v55  ;;  %v983_v18 = vmul.f32 0.7978846, %v951_v12 }
 0x12d   : > { %v772_v33 = vpop.f32.mrf.mxu0  ;;  %v817_v63 = vpop.f32.mrf.mxu1  ;;  %7619 = vst [vmem:[#allocation44_spill] sm:$0xff] %v5357_v62  ;;  %v902_v1 = vmul.f32 0.044715, %v870_v51  ;;  %v888_v9 = vmul.f32 %v856_v44, %v5328_v14  ;;  %v1762_v61 = vmul.f32 %v5051_v15, %v5318_v49  ;;  %v1780_v44 = vmul.f32 %v5051_v15, %v5321_v8 }
 0x12e   : > { %v5364_v54 = vadd.f32 %v5006_v25, %v772_v33  ;;  %v5367_v38 = vadd.f32 %v5006_v25, %v817_v63  ;;  %v5372_v3 = vmul.f32 %v1060_v7, %v5196_v13  ;;  %v5375_v17 = vmul.f32 %v1078_v24, %v5199_v32 }
 0x12f   : > { %v5380_v33 = vsel %vm5330_vm1, 0.0, %v5174_v43  ;;  %4294 = vtanh.f32 %v983_v18  ;;  %v934_v51 = vadd.f32 %v902_v1, %v5314_v35  ;;  %v920_v55 = vmul.f32 0.044715, %v888_v9 }
 0x130   : > { %7620 = vst [vmem:[#allocation45_spill] sm:$0xff] %v5372_v3  ;;  %v1794_v34 = vmul.f32 %v5057_v23, %v5372_v3  ;;  %v1857_v13 = vmul.f32 %v5068_v31, %v5372_v3  ;;  %v839_v32 = vmul.f32 %v5364_v54, %v5364_v54  ;;  %v857_v43 = vmul.f32 %v5367_v38, %v5367_v38 }
 0x131   : > { %7621 = vst [vmem:[#allocation46_spill] sm:$0xff] %v5375_v17  ;;  %v1812_v57 = vmul.f32 %v5057_v23, %v5375_v17  ;;  %v1875_v39 = vmul.f32 %v5068_v31, %v5375_v17  ;;  %v966_v46 = vmul.f32 0.7978846, %v934_v51  ;;  %v952_v41 = vadd.f32 %v920_v55, %v5328_v14 }
 0x132   : > { %v5402_v24 = vadd.f32 %v1794_v34, %v1761_v58  ;;  %v5405_v18 = vadd.f32 %v1857_v13, %v5292_v26  ;;  %v4293_v1 = vpop.eup %4292  ;;  %v871_v48 = vmul.f32 %v839_v32, %v5364_v54  ;;  %v889_v42 = vmul.f32 %v857_v43, %v5367_v38 }
 0x133   : > { %v5407_v9 = vadd.f32 %v1812_v57, %v1779_v53  ;;  %v5410_v19 = vadd.f32 %v1875_v39, %v5307_v30  ;;  %v1029_v62 = vadd.f32 1.0, %v4293_v1  ;;  %4296 = vtanh.f32 %v966_v46 }
 0x134   : > { %7622 = vst [vmem:[#allocation47_spill] sm:$0xff] %v5405_v18  ;;  %v984_v53 = vmul.f32 0.7978846, %v952_v41  ;;  %v903_v57 = vmul.f32 0.044715, %v871_v48  ;;  %v1763_v39 = vmul.f32 %v5051_v15, %v5372_v3 }
 0x135   : > { %v775_v12 = vpop.f32.mrf.mxu0  ;;  %v820_v63 = vpop.f32.mrf.mxu1  ;;  %7623 = vst [vmem:[#allocation48_spill] sm:$0xff] %v5410_v19  ;;  %v1061_v30 = vmul.f32 0.5, %v1029_v62  ;;  %v921_v55 = vmul.f32 0.044715, %v889_v42 }
 0x136   : > { %v5416_v58 = vadd.f32 %v5006_v25, %v775_v12  ;;  %v4295_v34 = vpop.eup %4294  ;;  %v5420_v13 = vadd.f32 %v5006_v25, %v820_v63  ;;  %4298 = vtanh.f32 %v984_v53  ;;  %v5427_v12 = vadd.s32 224, %v5055_v20 }
 0x137   : > { %v1047_v51 = vadd.f32 1.0, %v4295_v34  ;;  %v5430_v46 = vmul.f32 %v1061_v30, %v5255_v22  ;;  %v935_v63 = vadd.f32 %v903_v57, %v5364_v54  ;;  %v953_v62 = vadd.f32 %v921_v55, %v5367_v38 }
 0x138   : > { %v840_v32 = vmul.f32 %v5416_v58, %v5416_v58  ;;  %v858_v43 = vmul.f32 %v5420_v13, %v5420_v13  ;;  %v1781_v22 = vmul.f32 %v5051_v15, %v5375_v17 }
 0x139   : > { %7624 = vst [vmem:[#allocation49_spill] sm:$0xff] %v5430_v46  ;;  %v1079_v41 = vmul.f32 0.5, %v1047_v51  ;;  %v1795_v30 = vmul.f32 %v5057_v23, %v5430_v46  ;;  %v1858_v51 = vmul.f32 %v5068_v31, %v5430_v46  ;;  %v4297_v55 = vpop.eup %4296  ;;  %v967_v7 = vmul.f32 0.7978846, %v935_v63 }
 0x13a   : > { %v872_v53 = vmul.f32 %v840_v32, %v5416_v58  ;;  %v890_v57 = vmul.f32 %v858_v43, %v5420_v13  ;;  %v985_v1 = vmul.f32 0.7978846, %v953_v62  ;;  %v1030_v8 = vadd.f32 1.0, %v4297_v55 }
 0x13b   : > { %v5447_v26 = vmul.f32 %v1079_v41, %v5263_v2  ;;  %v5452_v32 = vadd.f32 %v1795_v30, %v1762_v61  ;;  %v5455_v19 = vadd.f32 %v1858_v51, %v5349_v11  ;;  %4300 = vtanh.f32 %v967_v7 }
 0x13c   : > { %v904_v18 = vmul.f32 0.044715, %v872_v53  ;;  %v4299_v3 = vpop.eup %4298  ;;  %v1062_v63 = vmul.f32 0.5, %v1030_v8  ;;  %4302 = vtanh.f32 %v985_v1  ;;  %v922_v55 = vmul.f32 0.044715, %v890_v57 }
 0x13d   : > { %v777_v48 = vpop.f32.mrf.mxu0  ;;  %v822_v42 = vpop.f32.mrf.mxu1  ;;  %7625 = vst [vmem:[#allocation50_spill] sm:$0xff] %v5447_v26  ;;  %v1813_v43 = vmul.f32 %v5057_v23, %v5447_v26  ;;  %v1876_v2 = vmul.f32 %v5068_v31, %v5447_v26  ;;  %v1048_v62 = vadd.f32 1.0, %v4299_v3  ;;  %v1764_v8 = vmul.f32 %v5051_v15, %v5430_v46 }
 0x13e   : > { %v5450_v34 = vadd.f32 %v5006_v25, %v777_v48  ;;  %7626 = vst [vmem:[#allocation51_spill] sm:$0xff] %v5455_v19  ;;  %v5463_v41 = vadd.f32 %v5006_v25, %v822_v42  ;;  %v936_v53 = vadd.f32 %v904_v18, %v5416_v58  ;;  %v5473_v30 = vmul.f32 %v1062_v63, %v5314_v35 }
 0x13f   : > { %v5466_v11 = vadd.f32 %v1813_v43, %v1780_v44  ;;  %v5469_v48 = vadd.f32 %v1876_v2, %v5354_v40  ;;  %v1080_v51 = vmul.f32 0.5, %v1048_v62  ;;  %v1522_v44 = vand.u32 15, %v5427_v12 }
 0x140   : > { %7628 = vst [vmem:[#allocation53_spill] sm:$0xff] %v5473_v30  ;;  %v841_v42 = vmul.f32 %v5450_v34, %v5450_v34  ;;  %v968_v3 = vmul.f32 0.7978846, %v936_v53  ;;  %v859_v40 = vmul.f32 %v5463_v41, %v5463_v41  ;;  %v1796_v18 = vmul.f32 %v5057_v23, %v5473_v30 }
 0x141   : > { %7627 = vst [vmem:[#allocation52_spill] sm:$0xff] %v5469_v48  ;;  %v1859_v1 = vmul.f32 %v5068_v31, %v5473_v30  ;;  %v5489_v43 = vmul.f32 %v1080_v51, %v5328_v14  ;;  %v954_v2 = vadd.f32 %v922_v55, %v5420_v13  ;;  %v4301_v12 = vpop.eup %4300  ;;  %vm5545_vm2 = vcmp.eq.s32.totalorder %v1522_v44, 0 }
 0x142   : > { %4304 = vtanh.f32 %v968_v3  ;;  %v5495_v62 = vadd.f32 %v1796_v18, %v1763_v39  ;;  %v873_v61 = vmul.f32 %v841_v42, %v5450_v34  ;;  %v891_v7 = vmul.f32 %v859_v40, %v5463_v41  ;;  %v4303_v35 = vpop.eup %4302 }
 0x143   : > { %7629 = vst [vmem:[#allocation54_spill] sm:$0xff] %v5489_v43  ;;  %v5498_v53 = vadd.f32 %v1859_v1, %v5402_v24  ;;  %v1814_v14 = vmul.f32 %v5057_v23, %v5489_v43  ;;  %v1877_v51 = vmul.f32 %v5068_v31, %v5489_v43  ;;  %v1031_v24 = vadd.f32 1.0, %v4301_v12 }
 0x144   : > { %v1049_v3 = vadd.f32 1.0, %v4303_v35  ;;  %v986_v18 = vmul.f32 0.7978846, %v954_v2  ;;  %v7632_v1 = vrot.slane %v5447_v26, 7  ;;  %v923_v12 = vmul.f32 0.044715, %v891_v7 }
 0x145   : > { %v780_v50 = vpop.f32.mrf.mxu0  ;;  %v825_v57 = vpop.f32.mrf.mxu1  ;;  %7630 = vst [vmem:[#allocation55_spill] sm:$0xff] %v5498_v53  ;;  %v5511_v42 = vadd.f32 %v1814_v14, %v1781_v22  ;;  %v5514_v40 = vadd.f32 %v1877_v51, %v5407_v9  ;;  %v1063_v17 = vmul.f32 0.5, %v1031_v24  ;;  %v1782_v22 = vmul.f32 %v5051_v15, %v5447_v26 }
 0x146   : > { %v5493_v63 = vadd.f32 %v5006_v25, %v780_v50  ;;  %v7522_v50 = vrot.slane %v5489_v43, 7  ;;  %v5508_v55 = vadd.f32 %v5006_v25, %v825_v57  ;;  %v905_v57 = vmul.f32 0.044715, %v873_v61 }
 0x147   : > { %7631 = vst [vmem:[#allocation56_spill] sm:$0xff] %v5514_v40  ;;  %v1081_v53 = vmul.f32 0.5, %v1049_v3  ;;  %4306 = vtanh.f32 %v986_v18  ;;  %v1765_v61 = vmul.f32 %v5051_v15, %v5473_v30  ;;  %v5535_v24 = vmul.f32 %v1063_v17, %v5364_v54 }
 0x148   : > { %v5522_v48 = vsel %vm1989_vm0, %v7632_v1, %v7522_v50  ;;  %v4305_v35 = vpop.eup %4304  ;;  %v937_v9 = vadd.f32 %v905_v57, %v5450_v34  ;;  %v842_v2 = vmul.f32 %v5493_v63, %v5493_v63  ;;  %v860_v14 = vmul.f32 %v5508_v55, %v5508_v55 }
 0x149   : > { %7633 = vst [vmem:[#allocation57_spill] sm:$0xff] %v5535_v24  ;;  %v5538_v7 = vmul.f32 %v1081_v53, %v5367_v38  ;;  %v1032_v18 = vadd.f32 1.0, %v4305_v35  ;;  %v955_v1 = vadd.f32 %v923_v12, %v5463_v41  ;;  %v5543_v57 = vadd.s32 112, %v5055_v20 }
 0x14a   : > { %v1797_v51 = vmul.f32 %v5057_v23, %v5535_v24  ;;  %v1860_v54 = vmul.f32 %v5068_v31, %v5535_v24  ;;  %v969_v38 = vmul.f32 0.7978846, %v937_v9  ;;  %v874_v17 = vmul.f32 %v842_v2, %v5493_v63 }
 0x14b   : > { %7634 = vst [vmem:[#allocation58_spill] sm:$0xff] %v5538_v7  ;;  %v1815_v12 = vmul.f32 %v5057_v23, %v5538_v7  ;;  %v1878_v44 = vmul.f32 %v5068_v31, %v5538_v7  ;;  %v892_v35 = vmul.f32 %v860_v14, %v5508_v55  ;;  %v1783_v50 = vmul.f32 %v5051_v15, %v5489_v43 }
 0x14c   : > { %v5563_v26 = vadd.f32 %v1797_v51, %v1764_v8  ;;  %v5566_v9 = vadd.f32 %v1860_v54, %v5452_v32  ;;  %v1064_v30 = vmul.f32 0.5, %v1032_v18  ;;  %4308 = vtanh.f32 %v969_v38  ;;  %v1218_v51 = vpop.f32.mrf.mxu2 }
 0x14d   : > { %v4307_v3 = vpop.eup %4306  ;;  %v5568_v2 = vadd.f32 %v1815_v12, %v1782_v22  ;;  %v5571_v53 = vadd.f32 %v1878_v44, %v5466_v11  ;;  %v987_v14 = vmul.f32 0.7978846, %v955_v1  ;;  %v906_v46 = vmul.f32 0.044715, %v874_v17 }
 0x14e   : > { %7637 = vst [vmem:[#allocation59_spill] sm:$0xff] %v5566_v9  ;;  %v1050_v19 = vadd.f32 1.0, %v4307_v3  ;;  %v5576_v40 = vmul.f32 %v5051_v15, %v5535_v24  ;;  %v5579_v8 = vmul.f32 %v1064_v30, %v5416_v58  ;;  %v924_v22 = vmul.f32 0.044715, %v892_v35  ;;  %v782_v30 = vpop.f32.mrf.mxu0 }
 0x14f   : > { %7638 = vst [vmem:[#allocation60_spill] sm:$0xff] %v5571_v53  ;;  %4310 = vtanh.f32 %v987_v14  ;;  %v938_v3 = vadd.f32 %v906_v46, %v5493_v63  ;;  %v5586_v1 = vmul.f32 %v5051_v15, %v5538_v7  ;;  %v1982_v54 = vrot.slane %v5538_v7, 7 }
 0x150   : > { %7639 = vst [vmem:[#allocation61_spill] sm:$0xff] %v5579_v8  ;;  %v1082_v32 = vmul.f32 0.5, %v1050_v19  ;;  %v1798_v58 = vmul.f32 %v5057_v23, %v5579_v8  ;;  %v1861_v19 = vmul.f32 %v5068_v31, %v5579_v8  ;;  %v956_v12 = vadd.f32 %v924_v22, %v5508_v55 }
 0x151   : > { %v970_v17 = vmul.f32 0.7978846, %v938_v3  ;;  %v5598_v46 = vadd.f32 %v5006_v25, %v1218_v51  ;;  %v1318_v18 = vadd.s32 256, %v5055_v20  ;;  %v5615_v51 = vsel %vm5545_vm2, 0.0, %v5522_v48  ;;  %v827_v48 = vpop.f32.mrf.mxu1 }
 0x152   : > { %v5594_v38 = vmul.f32 %v1082_v32, %v5420_v13  ;;  %v5601_v35 = vadd.f32 %v1798_v58, %v1765_v61  ;;  %v5604_v14 = vadd.f32 %v1861_v19, %v5495_v62  ;;  %v4309_v11 = vpop.eup %4308  ;;  %7642 = vst [vmem:[#allocation64_spill] sm:$0xff] %v5615_v51  ;;  %v5619_v62 = vmul.f32 %v5051_v15, %v5579_v8 }
 0x153   : > { %v1033_v61 = vadd.f32 1.0, %v4309_v11  ;;  %4312 = vtanh.f32 %v970_v17  ;;  %v988_v3 = vmul.f32 0.7978846, %v956_v12  ;;  %v1223_v49 = vmul.f32 %v5598_v46, %v5598_v46 }
 0x154   : > { %7640 = vst [vmem:[#allocation62_spill] sm:$0xff] %v5594_v38  ;;  %v1816_v13 = vmul.f32 %v5057_v23, %v5594_v38  ;;  %v1879_v32 = vmul.f32 %v5068_v31, %v5594_v38  ;;  %v1316_v39 = vadd.s32 240, %v5055_v20  ;;  %v5637_v12 = vadd.f32 %v5006_v25, %v782_v30 }
 0x155   : > { %7641 = vst [vmem:[#allocation63_spill] sm:$0xff] %v5604_v14  ;;  %v4311_v58 = vpop.eup %4310  ;;  %v1065_v7 = vmul.f32 0.5, %v1033_v61  ;;  %4314 = vtanh.f32 %v988_v3  ;;  %v1225_v17 = vmul.f32 %v1223_v49, %v5598_v46  ;;  %v1550_v22 = vand.u32 15, %v1318_v18 }
 0x156   : > { %v5622_v19 = vadd.f32 %v1879_v32, %v5511_v42  ;;  %v5624_v44 = vadd.f32 %v1816_v13, %v1783_v50  ;;  %v1051_v53 = vadd.f32 1.0, %v4311_v58  ;;  %v7644_v42 = vrot.slane %v5594_v38, 7 }
 0x157   : > { %v5640_v13 = vmul.f32 %v1065_v7, %v5450_v34  ;;  %v5644_v61 = vmul.f32 %v5080_v29, %v5615_v51  ;;  %v1227_v3 = vmul.f32 0.044715, %v1225_v17  ;;  %v1536_v58 = vand.u32 15, %v1316_v39  ;;  %v5661_v39 = vpop.f32.mrf.mxu0 }
 0x158   : > { %7643 = vst [vmem:[#allocation65_spill] sm:$0xff] %v5622_v19  ;;  %v1995_v50 = vsel %vm1989_vm0, %v1982_v54, %v7644_v42  ;;  %v1083_v32 = vmul.f32 0.5, %v1051_v53  ;;  %v843_v49 = vmul.f32 %v5637_v12, %v5637_v12  ;;  %v7646_v11 = vrot.slane %v5489_v43, 7 }
 0x159   : > { %7645 = vst [vmem:[#allocation66_spill] sm:$0xff] %v5640_v13  ;;  %v4313_v42 = vpop.eup %4312  ;;  %v1799_v7 = vmul.f32 %v5057_v23, %v5640_v13  ;;  %v1862_v53 = vmul.f32 %v5068_v31, %v5640_v13  ;;  %v1785_v18 = vmul.f32 %v5051_v15, %v5594_v38  ;;  %v5678_v8 = vadd.s32 272, %v5055_v20 }
 0x15a   : > { %v5652_v30 = vsel %vm1989_vm0, %v7646_v11, %v1982_v54  ;;  %v5664_v17 = vmul.f32 %v1083_v32, %v5463_v41  ;;  %v1034_v19 = vadd.f32 1.0, %v4313_v42  ;;  %v1229_v54 = vadd.f32 %v1227_v3, %v5598_v46 }
 0x15b   : > { %7647 = vst [vmem:[#allocation67_spill] sm:$0xff] %v5652_v30  ;;  %v5668_v11 = vadd.f32 %v5006_v25, %v827_v48  ;;  %v4315_v34 = vpop.eup %4314  ;;  %v5671_v51 = vadd.f32 %v1799_v7, %v5576_v40  ;;  %v5674_v43 = vadd.f32 %v1862_v53, %v5563_v26  ;;  %v875_v14 = vmul.f32 %v843_v49, %v5637_v12  ;;  %v5745_v53 = vld [vmem:[%s7485_s4] ss:$0 sm:$0xff] }
 0x15c   : > { %7648 = vst [vmem:[#allocation68_spill] sm:$0xff] %v5664_v17  ;;  %v5682_v41 = vmul.f32 %v5051_v15, %v5640_v13  ;;  %v1817_v25 = vmul.f32 %v5057_v23, %v5664_v17  ;;  %v1880_v48 = vmul.f32 %v5068_v31, %v5664_v17  ;;  %vm5688_vm3 = vcmp.eq.s32.totalorder %v1536_v58, 0 }
 0x15d   : > { %7649 = vst [vmem:[#allocation69_spill] sm:$0xff] %v5674_v43  ;;  %v1066_v32 = vmul.f32 0.5, %v1034_v19  ;;  %v7652_v3 = vand.u32 15, %v5543_v57  ;;  %v1052_v42 = vadd.f32 1.0, %v4315_v34  ;;  %v1231_v7 = vmul.f32 0.7978846, %v1229_v54  ;;  %v1170_v57 = vpop.f32.mrf.mxu1 }
 0x15e   : > { %v5701_v43 = vadd.f32 %v1880_v48, %v5568_v2  ;;  %vm5703_vm5 = vcmp.eq.s32.totalorder %v1550_v22, 0  ;;  %v907_v9 = vmul.f32 0.044715, %v875_v14  ;;  %v861_v19 = vmul.f32 %v5668_v11, %v5668_v11  ;;  %v1220_v48 = vpop.f32.mrf.mxu2 }
 0x15f   : > { %vm5695_vm4 = vcmp.eq.s32.totalorder %v7652_v3, 0  ;;  %v5710_v3 = vmul.f32 %v1066_v32, %v5493_v63  ;;  %v1084_v26 = vmul.f32 0.5, %v1052_v42  ;;  %4316 = vtanh.f32 %v1231_v7 }
 0x160   : > { %7655 = vst [vmem:[#allocation70_spill] sm:$0xff] %v5701_v43  ;;  %v5713_v34 = vadd.f32 %v1817_v25, %v5586_v1  ;;  %v1984_v2 = vrot.slane %v5664_v17, 7  ;;  %v5718_v22 = vsel %vm5688_vm3, 0.0, %v1995_v50  ;;  %v939_v14 = vadd.f32 %v907_v9, %v5637_v12 }
 0x161   : > { %7658 = vst [vmem:[#allocation71_spill] sm:$0xff] %v5718_v22  ;;  %v893_v54 = vmul.f32 %v861_v19, %v5668_v11  ;;  %v1800_v63 = vmul.f32 %v5057_v23, %v5710_v3  ;;  %v1863_v1 = vmul.f32 %v5068_v31, %v5710_v3  ;;  %v7547_v25 = vrot.slane %v5710_v3, 7 }
 0x162   : > { %v5729_v32 = vmul.f32 %v1084_v26, %v5508_v55  ;;  %v5733_v50 = vmul.f32 %v5080_v29, %v5718_v22  ;;  %v971_v9 = vmul.f32 0.7978846, %v939_v14  ;;  %v1564_v19 = vand.u32 15, %v5678_v8  ;;  %v787_v26 = vpop.f32.mrf.mxu0 }
 0x163   : > { %v925_v40 = vmul.f32 0.044715, %v893_v54  ;;  %v5736_v42 = vadd.f32 %v1800_v63, %v5619_v62  ;;  %v5739_v7 = vadd.f32 %v1863_v1, %v5601_v35  ;;  %v5748_v55 = vadd.f32 %v5745_v53, %v1220_v48 }
 0x164   : > { %7659 = vst [vmem:[#allocation72_spill] sm:$0xff] %v5729_v32  ;;  %v1818_v14 = vmul.f32 %v5057_v23, %v5729_v32  ;;  %v1881_v62 = vmul.f32 %v5068_v31, %v5729_v32  ;;  %v5757_v8 = vmul.f32 %v5080_v29, %v5652_v30  ;;  %v7661_v63 = vrot.slane %v5640_v13, 7 }
 0x165   : > { %7660 = vst [vmem:[#allocation73_spill] sm:$0xff] %v5739_v7  ;;  %v4317_v54 = vpop.eup %4316  ;;  %4318 = vtanh.f32 %v971_v9  ;;  %v957_v1 = vadd.f32 %v925_v40, %v5668_v11  ;;  %v1224_v22 = vmul.f32 %v5748_v55, %v5748_v55  ;;  %v7662_v43 = vrot.slane %v5729_v32, 7 }
 0x166   : > { %v2011_v48 = vsel %vm1989_vm0, %v7661_v63, %v7547_v25  ;;  %v1913_v35 = vadd.f32 %v1881_v62, %v5624_v44  ;;  %v1235_v7 = vadd.f32 1.0, %v4317_v54  ;;  %v1850_v24 = vadd.f32 %v1818_v14, %v1785_v18  ;;  %v1172_v14 = vpop.f32.mrf.mxu1 }
 0x167   : > { %v1993_v30 = vsel %vm1989_vm0, %v1984_v2, %v7662_v43  ;;  %v5775_v13 = vmul.f32 %v5051_v15, %v5710_v3  ;;  %v989_v63 = vmul.f32 0.7978846, %v957_v1  ;;  %v1226_v40 = vmul.f32 %v1224_v22, %v5748_v55 }
 0x168   : > { %v5781_v25 = vsel %vm5695_vm4, 0.0, %v2011_v48  ;;  %v5784_v44 = vadd.f32 %v5644_v61, %v1913_v35  ;;  %v1237_v62 = vmul.f32 0.5, %v1235_v7  ;;  %v7665_v43 = vrot.slane %v5594_v38, 7 }
 0x169   : > { %7663 = vst [vmem:[#allocation74_spill] sm:$0xff] %v5781_v25  ;;  %v5794_v54 = vsel %vm5703_vm5, 0.0, %v1993_v30  ;;  %4320 = vtanh.f32 %v989_v63  ;;  %v1228_v22 = vmul.f32 0.044715, %v1226_v40  ;;  %v5798_v49 = vadd.f32 %v5745_v53, %v5661_v39 }
 0x16a   : > { %7664 = vst [vmem:[#allocation75_spill] sm:$0xff] %v5784_v44  ;;  %v5790_v18 = vsel %vm1989_vm0, %v7665_v43, %v1984_v2  ;;  %v1239_v7 = vmul.f32 %v1237_v62, %v5598_v46  ;;  %v5803_v35 = vadd.f32 %v5745_v53, %v1170_v57  ;;  %v5806_v2 = vadd.f32 %v5745_v53, %v787_v26 }
 0x16b   : > { %7666 = vst [vmem:[#allocation76_spill] sm:$0xff] %v5790_v18  ;;  %v4319_v48 = vpop.eup %4318  ;;  %v1230_v30 = vadd.f32 %v1228_v22, %v5748_v55  ;;  %v5811_v58 = vmul.f32 %v5051_v15, %v5664_v17  ;;  %v844_v39 = vmul.f32 %v5798_v49, %v5798_v49  ;;  %v5816_v1 = vadd.f32 %v5745_v53, %v1172_v14  ;;  %v790_v22 = vpop.f32.mrf.mxu0 }
 0x16c   : > { %7667 = vst [vmem:[#allocation77_spill] sm:$0xff] %v5794_v54  ;;  %v5818_v46 = vmul.f32 0.0, %v1239_v7  ;;  %v2230_v57 = vmul.f32 %v5082_v37, %v5794_v54  ;;  %v1035_v26 = vadd.f32 1.0, %v4319_v48  ;;  %v1175_v63 = vmul.f32 %v5803_v35, %v5803_v35 }
 0x16d   : > { %v1232_v40 = vmul.f32 0.7978846, %v1230_v30  ;;  %v5826_v62 = vmul.f32 %v5080_v29, %v5790_v18  ;;  %v876_v43 = vmul.f32 %v844_v39, %v5798_v49  ;;  %v845_v14 = vmul.f32 %v5806_v2, %v5806_v2 }
 0x16e   : > { %7668 = vst [vmem:[#allocation78_spill] sm:$0xff] %v5818_v46  ;;  %v1883_v7 = vmul.f32 %v5068_v31, %v5818_v46  ;;  %v1067_v61 = vmul.f32 0.5, %v1035_v26  ;;  %v1176_v9 = vmul.f32 %v5816_v1, %v5816_v1  ;;  %v1177_v44 = vmul.f32 %v1175_v63, %v5803_v35 }
 0x16f   : > { %v4321_v30 = vpop.eup %4320  ;;  %4322 = vtanh.f32 %v1232_v40  ;;  %v908_v54 = vmul.f32 0.044715, %v876_v43  ;;  %v877_v39 = vmul.f32 %v845_v14, %v5806_v2  ;;  %vm5841_vm6 = vcmp.eq.s32.totalorder %v1564_v19, 0 }
 0x170   : > { %v1915_v17 = vadd.f32 %v1883_v7, %v1850_v24  ;;  %v5839_v18 = vmul.f32 %v1067_v61, %v5637_v12  ;;  %v1053_v38 = vadd.f32 1.0, %v4321_v30  ;;  %v7669_v25 = vmov 0 }
 0x171   : > { %v7670_v25 = vsel %vm5841_vm6, 4294967295, %v7669_v25  ;;  %v5846_v26 = vadd.f32 %v5745_v53, %v790_v22  ;;  %v7556_v48 = vrot.slane %v5818_v46, 7  ;;  %v940_v40 = vadd.f32 %v908_v54, %v5798_v49 }
 0x172   : > { %7671 = vst [vmem:[#allocation79_spill] sm:$0xff] %v7670_v25  ;;  %v1179_v43 = vmul.f32 0.044715, %v1177_v44  ;;  %v909_v63 = vmul.f32 0.044715, %v877_v39  ;;  %v2197_v14 = vadd.f32 %v5733_v50, %v1915_v17  ;;  %v1801_v24 = vmul.f32 %v5057_v23, %v5839_v18 }
 0x173   : > { %v1864_v12 = vmul.f32 %v5068_v31, %v5839_v18  ;;  %v1178_v19 = vmul.f32 %v1176_v9, %v5816_v1  ;;  %v1085_v22 = vmul.f32 0.5, %v1053_v38  ;;  %v972_v7 = vmul.f32 0.7978846, %v940_v40 }
 0x174   : > { %v5858_v30 = vadd.s32 8, %v5055_v20  ;;  %v5860_v54 = vadd.f32 %v2230_v57, %v2197_v14  ;;  %v5863_v44 = vadd.f32 %v1801_v24, %v5682_v41  ;;  %v1181_v50 = vadd.f32 %v1179_v43, %v5803_v35 }
 0x175   : > { %v5866_v17 = vadd.f32 %v1864_v12, %v5671_v51  ;;  %v4323_v39 = vpop.eup %4322  ;;  %v5871_v9 = vmul.f32 %v5051_v15, %v5839_v18  ;;  %v5874_v38 = vmul.f32 %v1085_v22, %v5668_v11  ;;  %4324 = vtanh.f32 %v972_v7 }
 0x176   : > { %7672 = vst [vmem:[#allocation80_spill] sm:$0xff] %v5860_v54  ;;  %v941_v57 = vadd.f32 %v909_v63, %v5806_v2  ;;  %v7557_v40 = vrot.slane %v5839_v18, 7  ;;  %v1236_v41 = vadd.f32 1.0, %v4323_v39  ;;  %v1183_v14 = vmul.f32 0.7978846, %v1181_v50 }
 0x177   : > { %7673 = vst [vmem:[#allocation81_spill] sm:$0xff] %v5866_v17  ;;  %v1180_v24 = vmul.f32 0.044715, %v1178_v19  ;;  %v1819_v51 = vmul.f32 %v5057_v23, %v5874_v38  ;;  %v1882_v43 = vmul.f32 %v5068_v31, %v5874_v38  ;;  %v1986_v12 = vrot.slane %v5874_v38, 7 }
 0x178   : > { %7674 = vst [vmem:[#allocation82_spill] sm:$0xff] %v5874_v38  ;;  %v5884_v61 = vadd.s32 16, %v5055_v20  ;;  %v1238_v11 = vmul.f32 0.5, %v1236_v41  ;;  %4326 = vtanh.f32 %v1183_v14  ;;  %v973_v22 = vmul.f32 0.7978846, %v941_v57  ;;  %v792_v14 = vpop.f32.mrf.mxu0 }
 0x179   : > { %v1182_v63 = vadd.f32 %v1180_v24, %v5816_v1  ;;  %v1914_v7 = vadd.f32 %v1882_v43, %v5713_v34  ;;  %v5892_v19 = vsel %vm1989_vm0, %v1986_v12, %v7556_v48  ;;  %v7676_v50 = vrot.slane %v5729_v32, 7 }
 0x17a   : > { %7675 = vst [vmem:[#allocation83_spill] sm:$0xff] %v5892_v19  ;;  %v1851_v41 = vadd.f32 %v1819_v51, %v5811_v58  ;;  %v7678_v57 = vrot.slane %v5710_v3, 7  ;;  %v1240_v43 = vmul.f32 %v1238_v11, %v5748_v55  ;;  %4328 = vtanh.f32 %v973_v22 }
 0x17b   : > { %v5898_v39 = vsel %vm1989_vm0, %v7676_v50, %v1986_v12  ;;  %v4325_v48 = vpop.eup %4324  ;;  %v5915_v58 = vadd.f32 %v5757_v8, %v1914_v7  ;;  %v1184_v50 = vmul.f32 0.7978846, %v1182_v63  ;;  %v846_v24 = vmul.f32 %v5846_v26, %v5846_v26 }
 0x17c   : > { %7677 = vst [vmem:[#allocation84_spill] sm:$0xff] %v5898_v39  ;;  %v5907_v34 = vsel %vm1989_vm0, %v7678_v57, %v7557_v40  ;;  %v5918_v54 = vmul.f32 0.0, %v1240_v43  ;;  %v1036_v57 = vadd.f32 1.0, %v4325_v48  ;;  %v5923_v55 = vadd.f32 %v5745_v53, %v792_v14  ;;  %v4040_v14 = vld [vmem:[#allocation12 + $0x38] sm:$0xff] }
 0x17d   : > { %7679 = vst [vmem:[#allocation85_spill] sm:$0xff] %v5907_v34  ;;  %v2231_v11 = vmul.f32 %v5082_v37, %v5898_v39  ;;  %4330 = vtanh.f32 %v1184_v50  ;;  %v1333_v22 = vand.u32 15, %v5858_v30  ;;  %v1340_v8 = vand.u32 15, %v5884_v61  ;;  %3149 = vmatpush.bf16.msrb.mxu2 %v4040_v14  ;;  %4146 = vmatpush.bf16.msra.mxu3 %v4040_v14 }
 0x17e   : > { %7680 = vst [vmem:[#allocation86_spill] sm:$0xff] %v5915_v58  ;;  %v4327_v63 = vpop.eup %4326  ;;  %v1884_v48 = vmul.f32 %v5068_v31, %v5918_v54  ;;  %v1988_v7 = vrot.slane %v5918_v54, 7  ;;  %v1068_v43 = vmul.f32 0.5, %v1036_v57  ;;  %v5935_v53 = vmul.f32 %v5193_v10, %v5380_v33 }
 0x17f   : > { %7681 = vst [vmem:[#allocation87_spill] sm:$0xff] %v5918_v54  ;;  %v1187_v50 = vadd.f32 1.0, %v4327_v63  ;;  %v7682_v30 = vand.u32 15, %v5055_v20  ;;  %v878_v12 = vmul.f32 %v846_v24, %v5846_v26  ;;  %v847_v51 = vmul.f32 %v5923_v55, %v5923_v55 }
 0x180   : > { %v4329_v40 = vpop.eup %4328  ;;  %v1916_v57 = vadd.f32 %v1884_v48, %v1851_v41  ;;  %v7685_v19 = vrot.slane %v5818_v46, 7  ;;  %v5952_v63 = vmul.f32 %v1068_v43, %v5798_v49  ;;  %vm5998_vm10 = vcmp.eq.s32.totalorder %v1340_v8, 0 }
 0x181   : > { %vm5940_vm8 = vcmp.eq.s32.totalorder %v7682_v30, 0  ;;  %v5956_v30 = vmul.f32 %v5193_v10, %v5237_v5  ;;  %v1189_v54 = vmul.f32 0.5, %v1187_v50  ;;  %v1037_v38 = vadd.f32 1.0, %v4329_v40  ;;  %v4039_v50 = vld [vmem:[#allocation12 + $0x30] sm:$0xff] }
 0x182   : > { %v1990_v25 = vsel %vm1989_vm0, %v7685_v19, %v1988_v7  ;;  %v910_v39 = vmul.f32 0.044715, %v878_v12  ;;  %v2198_v41 = vadd.f32 %v5826_v62, %v1916_v57  ;;  %v5964_v48 = vmul.f32 %v5051_v15, %v5952_v63  ;;  %3150 = vmatpush.bf16.msrb.mxu2 %v4039_v50  ;;  %4147 = vmatpush.bf16.msra.mxu3 %v4039_v50 }
 0x183   : > { %v5959_v24 = vmul.f32 %v5193_v10, %v1990_v25  ;;  %v1802_v49 = vmul.f32 %v5057_v23, %v5952_v63  ;;  %v1865_v19 = vmul.f32 %v5068_v31, %v5952_v63  ;;  %v4331_v43 = vpop.eup %4330  ;;  %v1969_v25 = vrot.slane %v5952_v63, 7 }
 0x184   : > { %v1191_v40 = vmul.f32 %v1189_v54, %v5803_v35  ;;  %v1069_v12 = vmul.f32 0.5, %v1037_v38  ;;  %v7687_v62 = vand.u32 15, %v5245_v4  ;;  %v1188_v32 = vadd.f32 1.0, %v4331_v43 }
 0x185   : > { %7686 = vst [vmem:[#allocation88_spill] sm:$0xff] %v5959_v24  ;;  %v5979_v24 = vadd.f32 %v2231_v11, %v2198_v41  ;;  %v5982_v46 = vadd.f32 %v1802_v49, %v5775_v13  ;;  %v5985_v58 = vadd.f32 %v1865_v19, %v5736_v42  ;;  %v7692_v35 = vrot.slane %v5839_v18, 7  ;;  %v4038_v49 = vld [vmem:[#allocation12 + $0x28] sm:$0xff] }
 0x186   : > { %vm5975_vm9 = vcmp.eq.s32.totalorder %v7687_v62, 15  ;;  %v5993_v4 = vmul.f32 0.0, %v1191_v40  ;;  %v5996_v38 = vmul.f32 %v1069_v12, %v5806_v2  ;;  %vm6002_vm11 = vcmp.eq.s32.totalorder %v1333_v22, 15  ;;  %3151 = vmatpush.bf16.msrb.mxu2 %v4038_v49  ;;  %4148 = vmatpush.bf16.msra.mxu3 %v4038_v49 }
 0x187   : > { %7690 = vst [vmem:[#allocation89_spill] sm:$0xff] %v5979_v24  ;;  %v5991_v54 = vsel %vm1989_vm0, %v7692_v35, %v1969_v25  ;;  %v942_v42 = vadd.f32 %v910_v39, %v5846_v26  ;;  %v1190_v14 = vmul.f32 0.5, %v1188_v32  ;;  %v879_v41 = vmul.f32 %v847_v51, %v5923_v55 }
 0x188   : > { %7691 = vst [vmem:[#allocation90_spill] sm:$0xff] %v5985_v58  ;;  %v7698_v19 = vand.u32 15, %v5284_v60  ;;  %v7701_v8 = vrot.slane %v5269_v27, 1  ;;  %v7702_v22 = vrot.slane %v5206_v52, 1  ;;  %v1755_v32 = vmul.f32 %v5051_v15, %v5993_v4 }
 0x189   : > { %7693 = vst [vmem:[#allocation91_spill] sm:$0xff] %v5993_v4  ;;  %v1953_v39 = vrot.slane %v5993_v4, 7  ;;  %v6026_v60 = vmul.f32 %v5051_v15, %v5996_v38  ;;  %v1803_v40 = vmul.f32 %v5057_v23, %v5996_v38  ;;  %v1866_v12 = vmul.f32 %v5068_v31, %v5996_v38 }
 0x18a   : > { %vm6010_vm12 = vcmp.eq.s32.totalorder %v7698_v19, 15  ;;  %v2431_v43 = vsel %vm2401_vm7, %v7702_v22, %v7701_v8  ;;  %v7569_v62 = vrot.slane %v5996_v38, 7  ;;  %v1820_v19 = vadd.f32 %v5092_v45, %v1755_v32 }
 0x18b   : > { %v2025_v8 = vsel %vm1989_vm0, %v1988_v7, %v1953_v39  ;;  %v1192_v22 = vmul.f32 %v1190_v14, %v5816_v1  ;;  %v974_v51 = vmul.f32 0.7978846, %v942_v42  ;;  %v6041_v24 = vadd.f32 %v1803_v40, %v5871_v9  ;;  %v4037_v7 = vld [vmem:[#allocation12 + $0x20] sm:$0xff] }
 0x18c   : > { %v2098_v50 = vsel %vm5940_vm8, 0.0, %v2025_v8  ;;  %v6044_v58 = vadd.f32 %v1866_v12, %v5863_v44  ;;  %v6050_v45 = vsel %vm1989_vm0, %v1969_v25, %v7569_v62  ;;  %v1885_v1 = vadd.f32 %v5249_v56, %v1820_v19  ;;  %3152 = vmatpush.bf16.msrb.mxu2 %v4037_v7  ;;  %4149 = vmatpush.bf16.msra.mxu3 %v4037_v7 }
 0x18d   : > { %v2135_v42 = vmul.f32 %v5080_v29, %v2098_v50  ;;  %v1195_v61 = vmul.f32 0.0, %v1192_v22  ;;  %4332 = vtanh.f32 %v974_v51  ;;  %v911_v9 = vmul.f32 0.044715, %v879_v41  ;;  %v4036_v50 = vld [vmem:[#allocation12 + $0x18] sm:$0xff] }
 0x18e   : > { %7703 = vst [vmem:[#allocation92_spill] sm:$0xff] %v6044_v58  ;;  %v7704_v14 = vrot.slane %v5206_v52, 1  ;;  %v7705_v44 = vrot.slane %v5136_v16, 1  ;;  %v7707_v40 = vrot.slane %v5076_v36, 1  ;;  %v7709_v49 = vrot.slane %v5065_v28, 1 }
 0x18f   : > { %v2167_v51 = vadd.f32 %v2135_v42, %v1885_v1  ;;  %v1756_v19 = vmul.f32 %v5051_v15, %v1195_v61  ;;  %v1954_v8 = vrot.slane %v1195_v61, 7  ;;  %v2366_v22 = vrot.slane %v1195_v61, 1 }
 0x190   : > { %v6060_v32 = vsel %vm2401_vm7, %v7705_v44, %v7704_v14  ;;  %v7706_v25 = vmov %v7705_v44  ;;  %v7708_v12 = vmov %v7707_v40  ;;  %v943_v16 = vadd.f32 %v911_v9, %v5923_v55  ;;  %v4465_v44 = vld [vmem:[#allocation11 + $0x4] sm:$0x7]  ;;  %3153 = vmatpush.bf16.msrb.mxu2 %v4036_v50  ;;  %4150 = vmatpush.bf16.msra.mxu3 %v4036_v50 }
 0x191   : > { %v2433_v56 = vsel %vm2401_vm7, %v7707_v40, %v7706_v25  ;;  %v6074_v41 = vsel %vm2401_vm7, %v7709_v49, %v7708_v12  ;;  %v6084_v36 = vsel %vm6010_vm12, 0.0, %v2431_v43  ;;  %v6086_v25 = vperm.slane %v4465_v44, 2 }
 0x192   : > { %v6080_v14 = vsel %vm5975_vm9, 0.0, %v2433_v56  ;;  %v1821_v1 = vadd.f32 %v5129_v6, %v1756_v19  ;;  %v7710_v42 = vrot.slane %v5065_v28, 7  ;;  %v2024_v9 = vsel %vm1989_vm0, %v1953_v39, %v1954_v8 }
 0x193   : > { %v7711_v57 = vmov %v7709_v49  ;;  %v2136_v40 = vmul.f32 %v5080_v29, %v2024_v9  ;;  %v7712_v6 = vrot.slane %v5993_v4, 1  ;;  %v4333_v39 = vpop.eup %4332  ;;  %v975_v44 = vmul.f32 0.7978846, %v943_v16 }
 0x194   : > { %v2023_v61 = vsel %vm1989_vm0, %v1954_v8, %v7710_v42  ;;  %v2435_v2 = vsel %vm2401_vm7, %v2366_v22, %v7711_v57  ;;  %v1886_v28 = vadd.f32 %v5276_v59, %v1821_v1  ;;  %v1038_v8 = vadd.f32 1.0, %v4333_v39  ;;  %v4035_v42 = vld [vmem:[#allocation12 + $0x10] sm:$0xff]  ;;  %v4466_v57 = vld [vmem:[#allocation11 + $0x8] sm:$0x7]  ;;  %v4034_v39 = vld [vmem:[#allocation12 + $0x8] sm:$0xff] }
 0x195   : > { %v2100_v43 = vsel %vm5998_vm10, 0.0, %v2023_v61  ;;  %v2436_v56 = vsel %vm2401_vm7, %v7712_v6, %v2366_v22  ;;  %v2511_v12 = vsel %vm6002_vm11, 0.0, %v2435_v2  ;;  %v2612_v22 = vmul.f32 %v6086_v25, %v6074_v41  ;;  %3154 = vmatpush.bf16.msrb.mxu2 %v4035_v42  ;;  %4151 = vmatpush.bf16.msra.mxu3 %v4035_v42 }
 0x196   : > { %v2137_v49 = vmul.f32 %v5080_v29, %v2100_v43  ;;  %v2200_v7 = vmul.f32 %v5082_v37, %v2100_v43  ;;  %v2547_v11 = vmul.f32 %v5187_v47, %v2436_v56  ;;  %v2548_v19 = vmul.f32 %v5187_v47, %v2511_v12 }
 0x197   : > { %v2168_v13 = vadd.f32 %v2136_v40, %v1886_v28  ;;  %v2613_v1 = vmul.f32 %v6086_v25, %v6080_v14  ;;  %v1070_v9 = vmul.f32 0.5, %v1038_v8  ;;  %4334 = vtanh.f32 %v975_v44 }
 0x198   : > { %v6116_v61 = vadd.f32 %v2137_v49, %v5295_v21  ;;  %v2232_v59 = vadd.f32 %v2200_v7, %v2167_v51  ;;  %v6120_v2 = vperm.slane %v4466_v57, 2  ;;  %v1292_v16 = vadd.s32 48, %v5055_v20  ;;  %v7713_v21 = vld [vmem:[#allocation41_spill] sm:$0xff] }
 0x199   : > { %v2233_v43 = vadd.f32 %v5184_v0, %v2168_v13  ;;  %v6126_v40 = vadd.s32 56, %v5055_v20  ;;  %v7714_v51 = vrot.slane %v7713_v21, 7  ;;  %v7715_v50 = vrot.slane %v5269_v27, 7  ;;  %3155 = vmatpush.bf16.msrb.mxu2 %v4034_v39  ;;  %4152 = vmatpush.bf16.msra.mxu3 %v4034_v39 }
 0x19a   : > { %v2297_v6 = vadd.f32 %v5935_v53, %v2232_v59  ;;  %v6137_v12 = vmul.f32 %v1070_v9, %v5846_v26  ;;  %v2677_v0 = vmul.f32 %v6120_v2, %v6060_v32  ;;  %v2678_v53 = vmul.f32 %v6120_v2, %v6084_v36 }
 0x19b   : > { %v6134_v56 = vsel %vm1989_vm0, %v7715_v50, %v7714_v51  ;;  %v1368_v28 = vand.u32 15, %v1292_v16  ;;  %v2298_v49 = vadd.f32 %v5956_v30, %v2233_v43  ;;  %v7716_v44 = vmov %v7715_v50 }
 0x19c   : > { %v2579_v7 = vadd.f32 %v2547_v11, %v2297_v6  ;;  %v7717_v26 = vrot.slane %v5206_v52, 7  ;;  %v1773_v59 = vmul.f32 %v5051_v15, %v6137_v12  ;;  %v1804_v9 = vmul.f32 %v5057_v23, %v6137_v12  ;;  %v7718_v6 = vld [vmem:[#allocation29_spill] sm:$0xff] }
 0x19d   : > { %v1867_v30 = vmul.f32 %v5068_v31, %v6137_v12  ;;  %v1971_v11 = vrot.slane %v6137_v12, 7  ;;  %v2383_v42 = vrot.slane %v6137_v12, 1  ;;  %v2580_v57 = vadd.f32 %v2548_v19, %v2298_v49  ;;  %v4335_v52 = vpop.eup %4334  ;;  %v6167_v19 = vld [vmem:[%s7487_s6] ss:$0 sm:$0xff]  ;;  %v7720_v49 = vld [vmem:[#allocation37_spill] sm:$0xff] }
 0x19e   : > { %v2019_v13 = vsel %vm1989_vm0, %v7717_v26, %v7716_v44  ;;  %v2644_v16 = vadd.f32 %v2612_v22, %v2579_v7  ;;  %vm1923_vm13 = vcmp.eq.s32.totalorder %v1368_v28, 0  ;;  %v1836_v43 = vadd.f32 %v1804_v9, %v5964_v48  ;;  %v4033_v44 = vld [vmem:[#allocation12] sm:$0xff]  ;;  %v7719_v48 = vld [vmem:[#allocation30_spill] sm:$0xff] }
 0x19f   : > { %v1838_v51 = vadd.f32 %v7718_v6, %v1773_v59  ;;  %v1899_v50 = vadd.f32 %v1867_v30, %v5982_v46  ;;  %v6162_v26 = vsel %vm1923_vm13, 0.0, %v2019_v13  ;;  %v1039_v8 = vadd.f32 1.0, %v4335_v52  ;;  %3156 = vmatpush.bf16.msrb.mxu2 %v4033_v44  ;;  %4153 = vmatpush.bf16.msra.mxu3 %v4033_v44 }
 0x1a0   : > { %v2645_v35 = vadd.f32 %v2613_v1, %v2580_v57  ;;  %v2709_v62 = vadd.f32 %v2677_v0, %v2644_v16  ;;  %v1301_v22 = vadd.s32 120, %v5055_v20  ;;  %v6171_v28 = vadd.f32 %v7719_v48, %v1836_v43 }
 0x1a1   : > { %v6174_v46 = vadd.f32 %v7720_v49, %v1838_v51  ;;  %v1302_v7 = vadd.s32 128, %v5055_v20  ;;  %v1303_v13 = vadd.s32 136, %v5055_v20  ;;  %v1071_v1 = vmul.f32 0.5, %v1039_v8 }
 0x1a2   : > { %v2710_v0 = vadd.f32 %v2678_v53, %v2645_v35  ;;  %v6179_v59 = vadd.f32 %v6167_v19, %v2709_v62  ;;  %v1304_v9 = vadd.s32 144, %v5055_v20  ;;  %v1305_v39 = vadd.s32 152, %v5055_v20 }
 0x1a3   : > { %v1431_v30 = vand.u32 15, %v1301_v22  ;;  %v1438_v57 = vand.u32 15, %v1302_v7  ;;  %v1445_v16 = vand.u32 15, %v1303_v13  ;;  %v6184_v52 = vmul.f32 %v1071_v1, %v5923_v55  ;;  %v7724_v55 = vld [vmem:[#allocation74_spill] sm:$0xff] }
 0x1a4   : > { %v6187_v43 = vadd.f32 %v6167_v19, %v2710_v0  ;;  %v2777_v35 = vmul.f32 %v6179_v59, %v6179_v59  ;;  %v1452_v62 = vand.u32 15, %v1304_v9  ;;  %v1459_v53 = vand.u32 15, %v1305_v39  ;;  %v7725_v39 = vld [vmem:[#allocation33_spill] sm:$0xff] }
 0x1a5   : > { %vm6191_vm14 = vcmp.eq.s32.totalorder %v1438_v57, 0  ;;  %v7723_v6 = vrot.slane %v5996_v38, 7  ;;  %v2149_v22 = vmul.f32 %v5080_v29, %v7724_v55  ;;  %v1774_v48 = vmul.f32 %v5051_v15, %v6184_v52 }
 0x1a6   : > { %v1805_v44 = vmul.f32 %v5057_v23, %v6184_v52  ;;  %v1868_v49 = vmul.f32 %v5068_v31, %v6184_v52  ;;  %v7570_v7 = vrot.slane %v6184_v52, 7  ;;  %v2384_v13 = vrot.slane %v6184_v52, 1 }
 0x1a7   : > { %v2007_v51 = vsel %vm1989_vm0, %v7723_v6, %v1971_v11  ;;  %v2778_v1 = vmul.f32 %v6187_v43, %v6187_v43  ;;  %v2809_v0 = vmul.f32 %v2777_v35, %v6179_v59  ;;  %vm1935_vm15 = vcmp.eq.s32.totalorder %v1452_v62, 0 }
 0x1a8   : > { %v1837_v9 = vadd.f32 %v1805_v44, %v6026_v60  ;;  %v1839_v15 = vadd.f32 %v7725_v39, %v1774_v48  ;;  %v1900_v57 = vadd.f32 %v1868_v49, %v6041_v24  ;;  %v6219_v23 = vsel %vm1989_vm0, %v1971_v11, %v7570_v7  ;;  %v7726_v60 = vld [vmem:[#allocation34_spill] sm:$0xff]  ;;  %v7727_v24 = vld [vmem:[#allocation39_spill] sm:$0xff] }
 0x1a9   : > { %v2810_v31 = vmul.f32 %v2778_v1, %v6187_v43  ;;  %v2841_v6 = vmul.f32 0.044715, %v2809_v0  ;;  %v6225_v35 = vsel %vm6191_vm14, 0.0, %v5991_v54  ;;  %v6227_v62 = vsel %vm1935_vm15, 0.0, %v2007_v51 }
 0x1aa   : > { %v6230_v48 = vadd.f32 %v7726_v60, %v1837_v9  ;;  %v6233_v44 = vadd.f32 %v7727_v24, %v1839_v15  ;;  %v2150_v11 = vmul.f32 %v5080_v29, %v5907_v34  ;;  %v2181_v49 = vadd.f32 %v2149_v22, %v1899_v50  ;;  %v7730_v60 = vld [vmem:[#allocation28_spill] sm:$0xff] }
 0x1ab   : > { %v2842_v39 = vmul.f32 0.044715, %v2810_v31  ;;  %v2873_v1 = vadd.f32 %v2841_v6, %v6179_v59  ;;  %v2214_v8 = vmul.f32 %v5082_v37, %v6225_v35  ;;  %v2215_v54 = vmul.f32 %v5082_v37, %v6050_v45 }
 0x1ac   : > { %v2182_v51 = vadd.f32 %v2150_v11, %v1900_v57  ;;  %v2279_v0 = vmul.f32 %v5193_v10, %v6227_v62  ;;  %v2280_v9 = vmul.f32 %v5193_v10, %v6219_v23  ;;  %vm6246_vm1 = vcmp.eq.s32.totalorder %v1431_v30, 15 }
 0x1ad   : > { %v2874_v50 = vadd.f32 %v2842_v39, %v6187_v43  ;;  %v2905_v22 = vmul.f32 0.7978846, %v2873_v1  ;;  %v2246_v31 = vadd.f32 %v2214_v8, %v2181_v49  ;;  %vm2346_vm2 = vcmp.eq.s32.totalorder %v1445_v16, 15 }
 0x1ae   : > { %v2247_v6 = vadd.f32 %v2215_v54, %v2182_v51  ;;  %vm2348_vm3 = vcmp.eq.s32.totalorder %v1459_v53, 15  ;;  %v7731_v24 = vrot.slane %v7730_v60, 1  ;;  %v6259_v30 = vsel %vm2401_vm7, %v2383_v42, %v2384_v13 }
 0x1af   : > { %v2906_v11 = vmul.f32 0.7978846, %v2874_v50  ;;  %4336 = vtanh.f32 %v2905_v22  ;;  %v2311_v7 = vadd.f32 %v2279_v0, %v2246_v31  ;;  %v7732_v16 = vrot.slane %v5996_v38, 1 }
 0x1b0   : > { %v2417_v57 = vsel %vm2401_vm7, %v2384_v13, %v7731_v24  ;;  %v2312_v49 = vadd.f32 %v2280_v9, %v2247_v6  ;;  %v7734_v1 = vrot.slane %v5952_v63, 1  ;;  %v7736_v54 = vrot.slane %v5839_v18, 1  ;;  %v7742_v24 = vld [vmem:[#allocation43_spill] sm:$0xff] }
 0x1b1   : > { %v2419_v53 = vsel %vm2401_vm7, %v7732_v16, %v2383_v42  ;;  %v7733_v39 = vmov %v7732_v16  ;;  %v7738_v42 = vrot.slane %v5710_v3, 1  ;;  %4338 = vtanh.f32 %v2906_v11 }
 0x1b2   : > { %v6273_v8 = vsel %vm2401_vm7, %v7734_v1, %v7733_v39  ;;  %v7735_v13 = vmov %v7734_v1  ;;  %v7737_v51 = vmov %v7736_v54  ;;  %v6293_v9 = vsel %vm2346_vm2, 0.0, %v2419_v53 }
 0x1b3   : > { %v2421_v12 = vsel %vm2401_vm7, %v7736_v54, %v7735_v13  ;;  %v6287_v38 = vsel %vm2401_vm7, %v7738_v42, %v7737_v51  ;;  %7741 = vst [vmem:[#allocation30_spill] sm:$0xff] %v6293_v9  ;;  %v6295_v63 = vsel %vm2348_vm3, 0.0, %v2417_v57  ;;  %v2626_v22 = vmul.f32 %v6086_v25, %v6273_v8  ;;  %v7743_v57 = vld [vmem:[#allocation35_spill] sm:$0xff]  ;;  %v7745_v42 = vld [vmem:[#allocation45_spill] sm:$0xff] }
 0x1b4   : > { %7739 = vst [vmem:[#allocation41_spill] sm:$0xff] %v6287_v38  ;;  %v6291_v0 = vsel %vm6246_vm1, 0.0, %v2421_v12  ;;  %v2561_v50 = vmul.f32 %v5187_v47, %v6287_v38  ;;  %v2627_v31 = vmul.f32 %v6086_v25, %v6293_v9  ;;  %v2691_v15 = vmul.f32 %v6120_v2, %v6259_v30 }
 0x1b5   : > { %7740 = vst [vmem:[#allocation29_spill] sm:$0xff] %v6291_v0  ;;  %v2562_v18 = vmul.f32 %v5187_v47, %v6291_v0  ;;  %v2692_v6 = vmul.f32 %v6120_v2, %v6295_v63  ;;  %v2170_v11 = vadd.f32 %v7743_v57, %v7742_v24  ;;  %v2202_v16 = vmul.f32 %v5082_v37, %v5380_v33  ;;  %v4337_v54 = vpop.eup %4336 }
 0x1b6   : > { %v2593_v53 = vadd.f32 %v2561_v50, %v2311_v7  ;;  %v2203_v1 = vmul.f32 %v5082_v37, %v5237_v5  ;;  %v2267_v13 = vmul.f32 %v5193_v10, %v6162_v26  ;;  %v2268_v12 = vmul.f32 %v5193_v10, %v6134_v56 }
 0x1b7   : > { %v2594_v39 = vadd.f32 %v2562_v18, %v2312_v49  ;;  %v7744_v51 = vand.u32 15, %v6126_v40  ;;  %v7746_v24 = vrot.slane %v7745_v42, 1  ;;  %v7747_v57 = vrot.slane %v7713_v21, 1 }
 0x1b8   : > { %v7749_v50 = vrot.slane %v5269_v27, 1  ;;  %v2969_v4 = vadd.f32 1.0, %v4337_v54  ;;  %v2658_v58 = vadd.f32 %v2626_v22, %v2593_v53  ;;  %v2234_v40 = vadd.f32 %v2202_v16, %v6116_v61 }
 0x1b9   : > { %vm2336_vm4 = vcmp.eq.s32.totalorder %v7744_v51, 15  ;;  %v2429_v7 = vsel %vm2401_vm7, %v7747_v57, %v7746_v24  ;;  %v7748_v49 = vmov %v7747_v57  ;;  %v2659_v0 = vadd.f32 %v2627_v31, %v2594_v39  ;;  %v4339_v51 = vpop.eup %4338  ;;  %v7750_v39 = vld [vmem:[#allocation31_spill] sm:$0xff] }
 0x1ba   : > { %v6333_v18 = vsel %vm2401_vm7, %v7749_v50, %v7748_v49  ;;  %v2235_v38 = vadd.f32 %v2203_v1, %v2170_v11  ;;  %v6336_v34 = vsel %vm2336_vm4, 0.0, %v2429_v7  ;;  %v2549_v24 = vmul.f32 %v5187_v47, %v6074_v41 }
 0x1bb   : > { %v2550_v57 = vmul.f32 %v5187_v47, %v6080_v14  ;;  %v2970_v27 = vadd.f32 1.0, %v4339_v51  ;;  %v3001_v55 = vmul.f32 0.5, %v2969_v4  ;;  %v2723_v17 = vadd.f32 %v2691_v15, %v2658_v58 }
 0x1bc   : > { %v2724_v49 = vadd.f32 %v2692_v6, %v2659_v0  ;;  %v2299_v50 = vadd.f32 %v2267_v13, %v2234_v40  ;;  %v2300_v54 = vadd.f32 %v2268_v12, %v2235_v38  ;;  %v2614_v22 = vmul.f32 %v6086_v25, %v6060_v32 }
 0x1bd   : > { %v2615_v61 = vmul.f32 %v6086_v25, %v6084_v36  ;;  %v3002_v31 = vmul.f32 0.5, %v2970_v27  ;;  %v3033_v11 = vmul.f32 %v3001_v55, %v6179_v59  ;;  %v6348_v41 = vadd.f32 %v6167_v19, %v2723_v17 }
 0x1be   : > { %v6351_v14 = vadd.f32 %v6167_v19, %v2724_v49  ;;  %v2581_v4 = vadd.f32 %v2549_v24, %v2299_v50  ;;  %v2582_v58 = vadd.f32 %v2550_v57, %v2300_v54  ;;  %v2679_v38 = vmul.f32 %v6120_v2, %v6333_v18 }
 0x1bf   : > { %v2680_v0 = vmul.f32 %v6120_v2, %v6336_v34  ;;  %v3034_v15 = vmul.f32 %v3002_v31, %v6187_v43  ;;  %v2791_v6 = vmul.f32 %v6348_v41, %v6348_v41  ;;  %v1307_v59 = vadd.s32 168, %v5055_v20 }
 0x1c0   : > { %v2792_v17 = vmul.f32 %v6351_v14, %v6351_v14  ;;  %v2646_v55 = vadd.f32 %v2614_v22, %v2581_v4  ;;  %v2647_v16 = vadd.f32 %v2615_v61, %v2582_v58  ;;  %v1306_v53 = vadd.s32 160, %v5055_v20 }
 0x1c1   : > { %v7751_v1 = vrot.slane %v7750_v39, 7  ;;  %v7752_v13 = vrot.slane %v7730_v60, 7  ;;  %v3065_v43 = vpack.c.bf16 %v3034_v15, %v3033_v11  ;;  %v2823_v7 = vmul.f32 %v2791_v6, %v6348_v41 }
 0x1c2   : > { %v2824_v40 = vmul.f32 %v2792_v17, %v6351_v14  ;;  %v1473_v51 = vand.u32 15, %v1307_v59  ;;  %v2711_v24 = vadd.f32 %v2679_v38, %v2646_v55  ;;  %v2712_v57 = vadd.f32 %v2680_v0, %v2647_v16 }
 0x1c3   : > { %v6370_v12 = vsel %vm1989_vm0, %v7752_v13, %v7751_v1  ;;  %v1466_v27 = vand.u32 15, %v1306_v53  ;;  %v7753_v49 = vmov %v7752_v13  ;;  %v7754_v50 = vrot.slane %v6184_v52, 7  ;;  %3157 = vmatmul.bf16.vlgmr.msrb.gmra.mxu2 %v3065_v43 }
 0x1c4   : > { %v2855_v22 = vmul.f32 0.044715, %v2823_v7  ;;  %v2856_v61 = vmul.f32 0.044715, %v2824_v40  ;;  %v2151_v31 = vmul.f32 %v5080_v29, %v6225_v35  ;;  %v2152_v11 = vmul.f32 %v5080_v29, %v6050_v45 }
 0x1c5   : > { %v2005_v54 = vsel %vm1989_vm0, %v7754_v50, %v7753_v49  ;;  %v6385_v4 = vadd.f32 %v6167_v19, %v2711_v24  ;;  %v6388_v58 = vadd.f32 %v6167_v19, %v2712_v57  ;;  %vm1937_vm5 = vcmp.eq.s32.totalorder %v1466_v27, 0 }
 0x1c6   : > { %v2216_v52 = vmul.f32 %v5082_v37, %v6227_v62  ;;  %v2887_v38 = vadd.f32 %v2855_v22, %v6348_v41  ;;  %v2888_v0 = vadd.f32 %v2856_v61, %v6351_v14  ;;  %v6394_v15 = vsel %vm1937_vm5, 0.0, %v2005_v54 }
 0x1c7   : > { %v2183_v6 = vadd.f32 %v2151_v31, %v6171_v28  ;;  %v2779_v17 = vmul.f32 %v6385_v4, %v6385_v4  ;;  %v2780_v59 = vmul.f32 %v6388_v58, %v6388_v58  ;;  %v2184_v55 = vadd.f32 %v2152_v11, %v6230_v48  ;;  %v7755_v48 = vld [vmem:[#allocation32_spill] sm:$0xff] }
 0x1c8   : > { %v2217_v16 = vmul.f32 %v5082_v37, %v6219_v23  ;;  %v2919_v53 = vmul.f32 0.7978846, %v2887_v38  ;;  %v2920_v1 = vmul.f32 0.7978846, %v2888_v0  ;;  %v2281_v43 = vmul.f32 %v5193_v10, %v6394_v15 }
 0x1c9   : > { %v2248_v13 = vadd.f32 %v2216_v52, %v2183_v6  ;;  %v2811_v7 = vmul.f32 %v2779_v17, %v6385_v4  ;;  %v2812_v28 = vmul.f32 %v2780_v59, %v6388_v58  ;;  %v2282_v24 = vmul.f32 %v5193_v10, %v6370_v12 }
 0x1ca   : > { %v2249_v40 = vadd.f32 %v2217_v16, %v2184_v55  ;;  %4340 = vtanh.f32 %v2919_v53  ;;  %vm2350_vm8 = vcmp.eq.s32.totalorder %v1473_v51, 15  ;;  %v7756_v27 = vrot.slane %v7755_v48, 1 }
 0x1cb   : > { %v2313_v57 = vadd.f32 %v2281_v43, %v2248_v13  ;;  %v7757_v49 = vrot.slane %v7750_v39, 1  ;;  %4342 = vtanh.f32 %v2920_v1  ;;  %v2843_v54 = vmul.f32 0.044715, %v2811_v7 }
 0x1cc   : > { %v2844_v22 = vmul.f32 0.044715, %v2812_v28  ;;  %v2314_v61 = vadd.f32 %v2282_v24, %v2249_v40  ;;  %v7759_v11 = vrot.slane %v7730_v60, 1  ;;  %v2563_v38 = vmul.f32 %v5187_v47, %v6273_v8  ;;  %v7760_v28 = vld [vmem:[#allocation49_spill] sm:$0xff] }
 0x1cd   : > { %v2415_v50 = vsel %vm2401_vm7, %v7757_v49, %v7756_v27  ;;  %v7758_v31 = vmov %v7757_v49  ;;  %v2564_v0 = vmul.f32 %v5187_v47, %v6293_v9  ;;  %v2875_v6 = vadd.f32 %v2843_v54, %v6385_v4 }
 0x1ce   : > { %v6422_v52 = vsel %vm2401_vm7, %v7759_v11, %v7758_v31  ;;  %v6424_v51 = vsel %vm2350_vm8, 0.0, %v2415_v50  ;;  %v2876_v17 = vadd.f32 %v2844_v22, %v6388_v58  ;;  %v2628_v59 = vmul.f32 %v6086_v25, %v6259_v30 }
 0x1cf   : > { %v2629_v60 = vmul.f32 %v6086_v25, %v6295_v63  ;;  %v2595_v55 = vadd.f32 %v2563_v38, %v2313_v57  ;;  %v2596_v16 = vadd.f32 %v2564_v0, %v2314_v61  ;;  %v2693_v53 = vmul.f32 %v6120_v2, %v6422_v52 }
 0x1d0   : > { %v2694_v1 = vmul.f32 %v6120_v2, %v6424_v51  ;;  %v2907_v13 = vmul.f32 0.7978846, %v2875_v6  ;;  %v2908_v43 = vmul.f32 0.7978846, %v2876_v17  ;;  %v1294_v7 = vadd.s32 64, %v5055_v20  ;;  %v4341_v57 = vpop.eup %4340 }
 0x1d1   : > { %v7761_v40 = vrot.slane %v7760_v28, 7  ;;  %v7762_v24 = vrot.slane %v7745_v42, 7  ;;  %v2660_v49 = vadd.f32 %v2628_v59, %v2595_v55  ;;  %v2661_v50 = vadd.f32 %v2629_v60, %v2596_v16  ;;  %v4343_v11 = vpop.eup %4342 }
 0x1d2   : > { %v1295_v54 = vadd.s32 72, %v5055_v20  ;;  %v7764_v61 = vrot.slane %v7713_v21, 7  ;;  %v2983_v38 = vadd.f32 1.0, %v4341_v57  ;;  %4344 = vtanh.f32 %v2907_v13 }
 0x1d3   : > { %v6447_v27 = vsel %vm1989_vm0, %v7762_v24, %v7761_v40  ;;  %v7763_v22 = vmov %v7762_v24  ;;  %v1382_v0 = vand.u32 15, %v1294_v7  ;;  %v2139_v6 = vmul.f32 %v5080_v29, %v5380_v33 }
 0x1d4   : > { %v2017_v31 = vsel %vm1989_vm0, %v7764_v61, %v7763_v22  ;;  %v2984_v17 = vadd.f32 1.0, %v4343_v11  ;;  %4346 = vtanh.f32 %v2908_v43  ;;  %v2725_v59 = vadd.f32 %v2693_v53, %v2660_v49  ;;  %v7765_v43 = vld [vmem:[#allocation47_spill] sm:$0xff] }
 0x1d5   : > { %v2726_v60 = vadd.f32 %v2694_v1, %v2661_v50  ;;  %v3015_v55 = vmul.f32 0.5, %v2983_v38  ;;  %v1389_v16 = vand.u32 15, %v1295_v54  ;;  %vm1925_vm9 = vcmp.eq.s32.totalorder %v1382_v0, 0  ;;  %v7766_v1 = vld [vmem:[#allocation51_spill] sm:$0xff] }
 0x1d6   : > { %v2140_v21 = vmul.f32 %v5080_v29, %v5237_v5  ;;  %v3016_v40 = vmul.f32 0.5, %v2984_v17  ;;  %v6461_v24 = vadd.f32 %v6167_v19, %v2725_v59  ;;  %v6466_v7 = vsel %vm1925_vm9, 0.0, %v2017_v31 }
 0x1d7   : > { %v6464_v13 = vadd.f32 %v6167_v19, %v2726_v60  ;;  %v3047_v33 = vmul.f32 %v3015_v55, %v6348_v41  ;;  %v2171_v53 = vadd.f32 %v2139_v6, %v7765_v43  ;;  %v2204_v49 = vmul.f32 %v5082_v37, %v6162_v26 }
 0x1d8   : > { %v2172_v57 = vadd.f32 %v2140_v21, %v7766_v1  ;;  %v3048_v5 = vmul.f32 %v3016_v40, %v6351_v14  ;;  %v2793_v50 = vmul.f32 %v6461_v24, %v6461_v24  ;;  %v2205_v22 = vmul.f32 %v5082_v37, %v6134_v56  ;;  %v4345_v61 = vpop.eup %4344  ;;  %v7769_v40 = vld [vmem:[#allocation53_spill] sm:$0xff] }
 0x1d9   : > { %v2794_v54 = vmul.f32 %v6464_v13, %v6464_v13  ;;  %v2236_v41 = vadd.f32 %v2204_v49, %v2171_v53  ;;  %v2269_v31 = vmul.f32 %v5193_v10, %v6466_v7  ;;  %v2270_v11 = vmul.f32 %v5193_v10, %v6447_v27 }
 0x1da   : > { %vm6484_vm10 = vcmp.eq.s32.totalorder %v1389_v16, 15  ;;  %v4347_v14 = vpop.eup %4346  ;;  %v3072_v0 = vpack.c.bf16 %v3048_v5, %v3047_v33  ;;  %v2971_v6 = vadd.f32 1.0, %v4345_v61  ;;  %v2825_v17 = vmul.f32 %v2793_v50, %v6461_v24 }
 0x1db   : > { %v2826_v59 = vmul.f32 %v2794_v54, %v6464_v13  ;;  %v2972_v60 = vadd.f32 1.0, %v4347_v14  ;;  %v2237_v55 = vadd.f32 %v2205_v22, %v2172_v57  ;;  %v2301_v21 = vadd.f32 %v2269_v31, %v2236_v41 }
 0x1dc   : > { %v7770_v43 = vrot.slane %v7769_v40, 1  ;;  %v7771_v53 = vrot.slane %v7760_v28, 1  ;;  %3192 = vmatmul.bf16.vlgmr.msra.gmra.mxu3 %v3072_v0  ;;  %v3003_v1 = vmul.f32 0.5, %v2971_v6  ;;  %v2857_v49 = vmul.f32 0.044715, %v2825_v17 }
 0x1dd   : > { %v2858_v9 = vmul.f32 0.044715, %v2826_v59  ;;  %v7773_v5 = vrot.slane %v7745_v42, 1  ;;  %v3004_v57 = vmul.f32 0.5, %v2972_v60  ;;  %v2302_v54 = vadd.f32 %v2270_v11, %v2237_v55 }
 0x1de   : > { %v2427_v16 = vsel %vm2401_vm7, %v7771_v53, %v7770_v43  ;;  %v7772_v33 = vmov %v7771_v53  ;;  %v2551_v61 = vmul.f32 %v5187_v47, %v6060_v32  ;;  %v3035_v41 = vmul.f32 %v3003_v1, %v6385_v4  ;;  %v7774_v43 = vld [vmem:[#allocation36_spill] sm:$0xff] }
 0x1df   : > { %v6502_v50 = vsel %vm2401_vm7, %v7773_v5, %v7772_v33  ;;  %v6506_v22 = vsel %vm6484_vm10, 0.0, %v2427_v16  ;;  %v2889_v31 = vadd.f32 %v2857_v49, %v6461_v24  ;;  %v2890_v14 = vadd.f32 %v2858_v9, %v6464_v13 }
 0x1e0   : > { %v2552_v42 = vmul.f32 %v5187_v47, %v6084_v36  ;;  %v3036_v0 = vmul.f32 %v3004_v57, %v6388_v58  ;;  %v2583_v6 = vadd.f32 %v2551_v61, %v2301_v21  ;;  %v2616_v11 = vmul.f32 %v6086_v25, %v6333_v18 }
 0x1e1   : > { %v2617_v38 = vmul.f32 %v6086_v25, %v6336_v34  ;;  %v2921_v17 = vmul.f32 0.7978846, %v2889_v31  ;;  %v2922_v32 = vmul.f32 0.7978846, %v2890_v14  ;;  %v2681_v4 = vmul.f32 %v6120_v2, %v6502_v50 }
 0x1e2   : > { %v2584_v59 = vadd.f32 %v2552_v42, %v2302_v54  ;;  %v3066_v60 = vpack.c.bf16 %v3036_v0, %v3035_v41  ;;  %v2648_v9 = vadd.f32 %v2616_v11, %v2583_v6  ;;  %v2682_v36 = vmul.f32 %v6120_v2, %v6506_v22 }
 0x1e3   : > { %v1308_v58 = vadd.s32 176, %v5055_v20  ;;  %4348 = vtanh.f32 %v2921_v17  ;;  %v1309_v21 = vadd.s32 184, %v5055_v20  ;;  %v7775_v53 = vrot.slane %v7774_v43, 7 }
 0x1e4   : > { %v2649_v55 = vadd.f32 %v2617_v38, %v2584_v59  ;;  %v7776_v16 = vrot.slane %v7755_v48, 7  ;;  %3162 = vmatmul.bf16.gmra.mxu2 %v3066_v60  ;;  %4350 = vtanh.f32 %v2922_v32  ;;  %v2713_v49 = vadd.f32 %v2681_v4, %v2648_v9 }
 0x1e5   : > { %v1480_v33 = vand.u32 15, %v1308_v58  ;;  %v7778_v57 = vrot.slane %v7750_v39, 7  ;;  %v1487_v41 = vand.u32 15, %v1309_v21  ;;  %v2153_v31 = vmul.f32 %v5080_v29, %v6227_v62 }
 0x1e6   : > { %v6532_v1 = vsel %vm1989_vm0, %v7776_v16, %v7775_v53  ;;  %v7777_v5 = vmov %v7776_v16  ;;  %v2714_v61 = vadd.f32 %v2682_v36, %v2649_v55  ;;  %v2154_v14 = vmul.f32 %v5080_v29, %v6219_v23  ;;  %v7779_v36 = vld [vmem:[#allocation38_spill] sm:$0xff] }
 0x1e7   : > { %v2003_v54 = vsel %vm1989_vm0, %v7778_v57, %v7777_v5  ;;  %v6545_v42 = vadd.f32 %v6167_v19, %v2713_v49  ;;  %vm1939_vm11 = vcmp.eq.s32.totalorder %v1480_v33, 0  ;;  %v2218_v0 = vmul.f32 %v5082_v37, %v6394_v15 }
 0x1e8   : > { %v2219_v39 = vmul.f32 %v5082_v37, %v6370_v12  ;;  %v6552_v6 = vadd.f32 %v6167_v19, %v2714_v61  ;;  %v6554_v11 = vsel %vm1939_vm11, 0.0, %v2003_v54  ;;  %v2185_v62 = vadd.f32 %v2153_v31, %v6174_v46 }
 0x1e9   : > { %v2186_v38 = vadd.f32 %v2154_v14, %v6233_v44  ;;  %v2781_v23 = vmul.f32 %v6545_v42, %v6545_v42  ;;  %v2283_v17 = vmul.f32 %v5193_v10, %v6554_v11  ;;  %v2284_v32 = vmul.f32 %v5193_v10, %v6532_v1  ;;  %v4349_v59 = vpop.eup %4348 }
 0x1ea   : > { %vm2352_vm12 = vcmp.eq.s32.totalorder %v1487_v41, 15  ;;  %v2782_v4 = vmul.f32 %v6552_v6, %v6552_v6  ;;  %v2250_v60 = vadd.f32 %v2218_v0, %v2185_v62  ;;  %v7780_v46 = vrot.slane %v7779_v36, 1  ;;  %v4351_v55 = vpop.eup %4350 }
 0x1eb   : > { %v2251_v9 = vadd.f32 %v2219_v39, %v2186_v38  ;;  %v7781_v44 = vrot.slane %v7774_v43, 1  ;;  %v2985_v21 = vadd.f32 1.0, %v4349_v59  ;;  %v2813_v53 = vmul.f32 %v2781_v23, %v6545_v42 }
 0x1ec   : > { %v7783_v49 = vrot.slane %v7755_v48, 1  ;;  %v2986_v57 = vadd.f32 1.0, %v4351_v55  ;;  %v2814_v54 = vmul.f32 %v2782_v4, %v6552_v6  ;;  %v2315_v61 = vadd.f32 %v2283_v17, %v2250_v60 }
 0x1ed   : > { %v2413_v58 = vsel %vm2401_vm7, %v7781_v44, %v7780_v46  ;;  %v7782_v16 = vmov %v7781_v44  ;;  %v2316_v41 = vadd.f32 %v2284_v32, %v2251_v9  ;;  %v3017_v31 = vmul.f32 0.5, %v2985_v21 }
 0x1ee   : > { %v6579_v33 = vsel %vm2401_vm7, %v7783_v49, %v7782_v16  ;;  %v6581_v5 = vsel %vm2352_vm12, 0.0, %v2413_v58  ;;  %v2845_v14 = vmul.f32 0.044715, %v2813_v53  ;;  %v2565_v0 = vmul.f32 %v5187_v47, %v6259_v30  ;;  %v7784_v16 = vld [vmem:[#allocation57_spill] sm:$0xff] }
 0x1ef   : > { %v2566_v39 = vmul.f32 %v5187_v47, %v6295_v63  ;;  %v3018_v48 = vmul.f32 0.5, %v2986_v57  ;;  %v2846_v62 = vmul.f32 0.044715, %v2814_v54  ;;  %v2630_v38 = vmul.f32 %v6086_v25, %v6422_v52 }
 0x1f0   : > { %v2631_v23 = vmul.f32 %v6086_v25, %v6424_v51  ;;  %v3049_v59 = vmul.f32 %v3017_v31, %v6461_v24  ;;  %v2877_v17 = vadd.f32 %v2845_v14, %v6545_v42  ;;  %v2597_v32 = vadd.f32 %v2565_v0, %v2315_v61 }
 0x1f1   : > { %v2598_v4 = vadd.f32 %v2566_v39, %v2316_v41  ;;  %v3050_v60 = vmul.f32 %v3018_v48, %v6464_v13  ;;  %v2878_v30 = vadd.f32 %v2846_v62, %v6552_v6  ;;  %v2695_v63 = vmul.f32 %v6120_v2, %v6579_v33 }
 0x1f2   : > { %v2696_v9 = vmul.f32 %v6120_v2, %v6581_v5  ;;  %v2909_v46 = vmul.f32 0.7978846, %v2877_v17  ;;  %v2662_v44 = vadd.f32 %v2630_v38, %v2597_v32  ;;  %v1296_v55 = vadd.s32 80, %v5055_v20  ;;  %v7789_v17 = vld [vmem:[#allocation55_spill] sm:$0xff] }
 0x1f3   : > { %v2663_v58 = vadd.f32 %v2631_v23, %v2598_v4  ;;  %v3073_v24 = vpack.c.bf16 %v3050_v60, %v3049_v59  ;;  %v2910_v21 = vmul.f32 0.7978846, %v2878_v30  ;;  %v1297_v53 = vadd.s32 88, %v5055_v20  ;;  %v7790_v30 = vld [vmem:[#allocation59_spill] sm:$0xff] }
 0x1f4   : > { %v7785_v49 = vrot.slane %v7784_v16, 7  ;;  %v7786_v13 = vrot.slane %v7769_v40, 7  ;;  %4352 = vtanh.f32 %v2909_v46  ;;  %v2727_v54 = vadd.f32 %v2695_v63, %v2662_v44  ;;  %v7791_v44 = vld [vmem:[#allocation61_spill] sm:$0xff] }
 0x1f5   : > { %v2728_v61 = vadd.f32 %v2696_v9, %v2663_v58  ;;  %v1396_v41 = vand.u32 15, %v1296_v55  ;;  %3197 = vmatmul.bf16.gmra.mxu3 %v3073_v24  ;;  %4354 = vtanh.f32 %v2910_v21  ;;  %v1403_v31 = vand.u32 15, %v1297_v53 }
 0x1f6   : > { %v6608_v57 = vsel %vm1989_vm0, %v7786_v13, %v7785_v49  ;;  %v7787_v14 = vmov %v7786_v13  ;;  %v7788_v0 = vrot.slane %v7760_v28, 7  ;;  %v2141_v48 = vmul.f32 %v5080_v29, %v6162_v26 }
 0x1f7   : > { %v6619_v62 = vadd.f32 %v6167_v19, %v2727_v54  ;;  %v6622_v38 = vadd.f32 %v6167_v19, %v2728_v61  ;;  %vm1927_vm13 = vcmp.eq.s32.totalorder %v1396_v41, 0  ;;  %v2142_v23 = vmul.f32 %v5080_v29, %v6134_v56 }
 0x1f8   : > { %v2015_v39 = vsel %vm1989_vm0, %v7788_v0, %v7787_v14  ;;  %v2173_v28 = vadd.f32 %v2141_v48, %v7789_v17  ;;  %v2206_v32 = vmul.f32 %v5082_v37, %v6466_v7  ;;  %v2207_v26 = vmul.f32 %v5082_v37, %v6447_v27 }
 0x1f9   : > { %v6626_v59 = vsel %vm1927_vm13, 0.0, %v2015_v39  ;;  %v2795_v4 = vmul.f32 %v6619_v62, %v6619_v62  ;;  %v2796_v60 = vmul.f32 %v6622_v38, %v6622_v38  ;;  %v2174_v63 = vadd.f32 %v2142_v23, %v7790_v30 }
 0x1fa   : > { %v2271_v56 = vmul.f32 %v5193_v10, %v6626_v59  ;;  %v2238_v9 = vadd.f32 %v2206_v32, %v2173_v28  ;;  %v2272_v46 = vmul.f32 %v5193_v10, %v6608_v57  ;;  %vm2340_vm14 = vcmp.eq.s32.totalorder %v1403_v31, 15  ;;  %v4353_v21 = vpop.eup %4352 }
 0x1fb   : > { %v7792_v58 = vrot.slane %v7791_v44, 1  ;;  %v7793_v55 = vrot.slane %v7784_v16, 1  ;;  %v2827_v53 = vmul.f32 %v2795_v4, %v6619_v62  ;;  %v2828_v49 = vmul.f32 %v2796_v60, %v6622_v38  ;;  %v4355_v31 = vpop.eup %4354 }
 0x1fc   : > { %v2239_v13 = vadd.f32 %v2207_v26, %v2174_v63  ;;  %v7795_v61 = vrot.slane %v7769_v40, 1  ;;  %v2973_v14 = vadd.f32 1.0, %v4353_v21  ;;  %v2303_v0 = vadd.f32 %v2271_v56, %v2238_v9 }
 0x1fd   : > { %v2425_v24 = vsel %vm2401_vm7, %v7793_v55, %v7792_v58  ;;  %v7794_v54 = vmov %v7793_v55  ;;  %v2553_v48 = vmul.f32 %v5187_v47, %v6333_v18  ;;  %v2974_v23 = vadd.f32 1.0, %v4355_v31 }
 0x1fe   : > { %v6656_v41 = vsel %vm2401_vm7, %v7795_v61, %v7794_v54  ;;  %v6658_v39 = vsel %vm2340_vm14, 0.0, %v2425_v24  ;;  %v2859_v17 = vmul.f32 0.044715, %v2827_v53  ;;  %v2860_v28 = vmul.f32 0.044715, %v2828_v49 }
 0x1ff   : > { %v2304_v32 = vadd.f32 %v2272_v46, %v2239_v13  ;;  %v3005_v26 = vmul.f32 0.5, %v2973_v14  ;;  %v2554_v40 = vmul.f32 %v5187_v47, %v6336_v34  ;;  %v2585_v4 = vadd.f32 %v2553_v48, %v2303_v0 }
 0x200   : > { %v2618_v60 = vmul.f32 %v6086_v25, %v6502_v50  ;;  %v3006_v30 = vmul.f32 0.5, %v2974_v23  ;;  %v2891_v63 = vadd.f32 %v2859_v17, %v6619_v62  ;;  %v2892_v56 = vadd.f32 %v2860_v28, %v6622_v38 }
 0x201   : > { %v2619_v18 = vmul.f32 %v6086_v25, %v6506_v22  ;;  %v3037_v9 = vmul.f32 %v3005_v26, %v6545_v42  ;;  %v2586_v58 = vadd.f32 %v2554_v40, %v2304_v32  ;;  %v2683_v55 = vmul.f32 %v6120_v2, %v6656_v41  ;;  %v7796_v42 = vld [vmem:[#allocation42_spill] sm:$0xff] }
 0x202   : > { %v2650_v46 = vadd.f32 %v2618_v60, %v2585_v4  ;;  %v3038_v34 = vmul.f32 %v3006_v30, %v6552_v6  ;;  %v2923_v24 = vmul.f32 0.7978846, %v2891_v63  ;;  %v2924_v21 = vmul.f32 0.7978846, %v2892_v56 }
 0x203   : > { %v2684_v53 = vmul.f32 %v6120_v2, %v6658_v39  ;;  %v2651_v49 = vadd.f32 %v2619_v18, %v2586_v58  ;;  %v1310_v54 = vadd.s32 192, %v5055_v20  ;;  %v1311_v61 = vadd.s32 200, %v5055_v20  ;;  %v7802_v58 = vld [vmem:[#allocation44_spill] sm:$0xff] }
 0x204   : > { %v2715_v13 = vadd.f32 %v2683_v55, %v2650_v46  ;;  %v3067_v31 = vpack.c.bf16 %v3038_v34, %v3037_v9  ;;  %4356 = vtanh.f32 %v2923_v24  ;;  %v7797_v14 = vrot.slane %v7796_v42, 7  ;;  %v7801_v9 = vld [vmem:[#allocation40_spill] sm:$0xff] }
 0x205   : > { %v7798_v0 = vrot.slane %v7779_v36, 7  ;;  %v7800_v23 = vrot.slane %v7774_v43, 7  ;;  %4358 = vtanh.f32 %v2924_v21  ;;  %v2716_v28 = vadd.f32 %v2684_v53, %v2651_v49 }
 0x206   : > { %v6693_v32 = vadd.f32 %v6167_v19, %v2715_v13  ;;  %v1494_v26 = vand.u32 15, %v1310_v54  ;;  %3167 = vmatmul.bf16.gmra.mxu2 %v3067_v31  ;;  %v1501_v40 = vand.u32 15, %v1311_v61  ;;  %v2155_v4 = vmul.f32 %v5080_v29, %v6394_v15  ;;  %v7803_v13 = vld [vmem:[#allocation46_spill] sm:$0xff] }
 0x207   : > { %v6684_v6 = vsel %vm1989_vm0, %v7798_v0, %v7797_v14  ;;  %v7799_v48 = vmov %v7798_v0  ;;  %v2156_v60 = vmul.f32 %v5080_v29, %v6370_v12  ;;  %v2220_v43 = vmul.f32 %v5082_v37, %v6554_v11 }
 0x208   : > { %v2001_v17 = vsel %vm1989_vm0, %v7800_v23, %v7799_v48  ;;  %v6702_v30 = vadd.f32 %v6167_v19, %v2716_v28  ;;  %v2783_v63 = vmul.f32 %v6693_v32, %v6693_v32  ;;  %vm1941_vm15 = vcmp.eq.s32.totalorder %v1494_v26, 0 }
 0x209   : > { %v2221_v56 = vmul.f32 %v5082_v37, %v6532_v1  ;;  %v6708_v18 = vsel %vm1941_vm15, 0.0, %v2001_v17  ;;  %v2187_v15 = vadd.f32 %v2155_v4, %v7801_v9  ;;  %v2188_v46 = vadd.f32 %v2156_v60, %v7802_v58 }
 0x20a   : > { %v2286_v12 = vmul.f32 %v5193_v10, %v6684_v6  ;;  %v2784_v55 = vmul.f32 %v6702_v30, %v6702_v30  ;;  %v2815_v34 = vmul.f32 %v2783_v63, %v6693_v32  ;;  %v2285_v24 = vmul.f32 %v5193_v10, %v6708_v18  ;;  %v4357_v21 = vpop.eup %4356 }
 0x20b   : > { %vm2354_vm1 = vcmp.eq.s32.totalorder %v1501_v40, 15  ;;  %v2252_v53 = vadd.f32 %v2220_v43, %v2187_v15  ;;  %v2253_v49 = vadd.f32 %v2221_v56, %v2188_v46  ;;  %v7804_v54 = vrot.slane %v7803_v13, 1  ;;  %v4359_v23 = vpop.eup %4358 }
 0x20c   : > { %v7805_v61 = vrot.slane %v7796_v42, 1  ;;  %v7807_v0 = vrot.slane %v7779_v36, 1  ;;  %v2987_v17 = vadd.f32 1.0, %v4357_v21  ;;  %v2816_v28 = vmul.f32 %v2784_v55, %v6702_v30 }
 0x20d   : > { %v2847_v26 = vmul.f32 0.044715, %v2815_v34  ;;  %v2988_v4 = vadd.f32 1.0, %v4359_v23  ;;  %v2317_v60 = vadd.f32 %v2285_v24, %v2252_v53  ;;  %v2318_v43 = vadd.f32 %v2286_v12, %v2253_v49 }
 0x20e   : > { %v2411_v31 = vsel %vm2401_vm7, %v7805_v61, %v7804_v54  ;;  %v7806_v14 = vmov %v7805_v61  ;;  %v2567_v63 = vmul.f32 %v5187_v47, %v6422_v52  ;;  %v3019_v56 = vmul.f32 0.5, %v2987_v17  ;;  %v7808_v17 = vld [vmem:[#allocation66_spill] sm:$0xff] }
 0x20f   : > { %v6731_v48 = vsel %vm2401_vm7, %v7807_v0, %v7806_v14  ;;  %v6734_v40 = vsel %vm2354_vm1, 0.0, %v2411_v31  ;;  %v2848_v9 = vmul.f32 0.044715, %v2816_v28  ;;  %v2879_v36 = vadd.f32 %v2847_v26, %v6693_v32 }
 0x210   : > { %v2568_v15 = vmul.f32 %v5187_v47, %v6424_v51  ;;  %v3020_v58 = vmul.f32 0.5, %v2988_v4  ;;  %v2599_v46 = vadd.f32 %v2567_v63, %v2317_v60  ;;  %v2632_v55 = vmul.f32 %v6086_v25, %v6579_v33 }
 0x211   : > { %v2633_v34 = vmul.f32 %v6086_v25, %v6581_v5  ;;  %v3051_v12 = vmul.f32 %v3019_v56, %v6619_v62  ;;  %v2880_v24 = vadd.f32 %v2848_v9, %v6702_v30  ;;  %v2911_v52 = vmul.f32 0.7978846, %v2879_v36 }
 0x212   : > { %v2600_v21 = vadd.f32 %v2568_v15, %v2318_v43  ;;  %v3052_v53 = vmul.f32 %v3020_v58, %v6622_v38  ;;  %v2664_v49 = vadd.f32 %v2632_v55, %v2599_v46  ;;  %v2697_v51 = vmul.f32 %v6120_v2, %v6731_v48 }
 0x213   : > { %v2698_v54 = vmul.f32 %v6120_v2, %v6734_v40  ;;  %v2912_v61 = vmul.f32 0.7978846, %v2880_v24  ;;  %4360 = vtanh.f32 %v2911_v52  ;;  %v1298_v14 = vadd.s32 96, %v5055_v20  ;;  %v7813_v24 = vld [vmem:[#allocation63_spill] sm:$0xff]  ;;  %v7814_v52 = vld [vmem:[#allocation69_spill] sm:$0xff] }
 0x214   : > { %v2665_v31 = vadd.f32 %v2633_v34, %v2600_v21  ;;  %v3074_v0 = vpack.c.bf16 %v3052_v53, %v3051_v12  ;;  %v2729_v62 = vadd.f32 %v2697_v51, %v2664_v49  ;;  %v1299_v23 = vadd.s32 104, %v5055_v20 }
 0x215   : > { %v7809_v28 = vrot.slane %v7808_v17, 7  ;;  %v7810_v38 = vrot.slane %v7791_v44, 7  ;;  %4362 = vtanh.f32 %v2912_v61  ;;  %v1410_v60 = vand.u32 15, %v1298_v14 }
 0x216   : > { %v2730_v4 = vadd.f32 %v2698_v54, %v2665_v31  ;;  %v7812_v63 = vrot.slane %v7784_v16, 7  ;;  %3202 = vmatmul.bf16.gmra.mxu3 %v3074_v0  ;;  %v6769_v9 = vadd.f32 %v6167_v19, %v2729_v62  ;;  %v1417_v36 = vand.u32 15, %v1299_v23 }
 0x217   : > { %v6760_v26 = vsel %vm1989_vm0, %v7810_v38, %v7809_v28  ;;  %v7811_v43 = vmov %v7810_v38  ;;  %v2143_v15 = vmul.f32 %v5080_v29, %v6466_v7  ;;  %v2144_v58 = vmul.f32 %v5080_v29, %v6447_v27 }
 0x218   : > { %v2013_v56 = vsel %vm1989_vm0, %v7812_v63, %v7811_v43  ;;  %v6776_v46 = vadd.f32 %v6167_v19, %v2730_v4  ;;  %vm1929_vm2 = vcmp.eq.s32.totalorder %v1410_v60, 0  ;;  %v2208_v16 = vmul.f32 %v5082_v37, %v6626_v59 }
 0x219   : > { %v2209_v55 = vmul.f32 %v5082_v37, %v6608_v57  ;;  %v2797_v34 = vmul.f32 %v6769_v9, %v6769_v9  ;;  %v6784_v12 = vsel %vm1929_vm2, 0.0, %v2013_v56  ;;  %v2175_v7 = vadd.f32 %v2143_v15, %v7813_v24  ;;  %v4361_v27 = vpop.eup %4360 }
 0x21a   : > { %v2176_v21 = vadd.f32 %v2144_v58, %v7814_v52  ;;  %v2798_v53 = vmul.f32 %v6776_v46, %v6776_v46  ;;  %v2273_v49 = vmul.f32 %v5193_v10, %v6784_v12  ;;  %v2274_v51 = vmul.f32 %v5193_v10, %v6760_v26 }
 0x21b   : > { %vm6794_vm3 = vcmp.eq.s32.totalorder %v1417_v36, 15  ;;  %v2975_v61 = vadd.f32 1.0, %v4361_v27  ;;  %v2829_v31 = vmul.f32 %v2797_v34, %v6769_v9  ;;  %v2240_v14 = vadd.f32 %v2208_v16, %v2175_v7  ;;  %v4363_v62 = vpop.eup %4362 }
 0x21c   : > { %v2241_v0 = vadd.f32 %v2209_v55, %v2176_v21  ;;  %v2830_v23 = vmul.f32 %v2798_v53, %v6776_v46  ;;  %v7817_v28 = vrot.slane %v5710_v3, 1  ;;  %v7818_v38 = vrot.slane %v7808_v17, 1 }
 0x21d   : > { %v7820_v43 = vrot.slane %v7791_v44, 1  ;;  %v2555_v56 = vmul.f32 %v5187_v47, %v6502_v50  ;;  %v2976_v36 = vadd.f32 1.0, %v4363_v62  ;;  %v3007_v15 = vmul.f32 0.5, %v2975_v61 }
 0x21e   : > { %v2423_v4 = vsel %vm2401_vm7, %v7818_v38, %v7817_v28  ;;  %v7819_v60 = vmov %v7818_v38  ;;  %v2861_v58 = vmul.f32 0.044715, %v2829_v31  ;;  %v2305_v3 = vadd.f32 %v2273_v49, %v2240_v14 }
 0x21f   : > { %v6812_v63 = vsel %vm2401_vm7, %v7820_v43, %v7819_v60  ;;  %v2862_v16 = vmul.f32 0.044715, %v2830_v23  ;;  %v2306_v55 = vadd.f32 %v2274_v51, %v2241_v0  ;;  %v6818_v34 = vsel %vm6794_vm3, 0.0, %v2423_v4  ;;  %v7821_v23 = vld [vmem:[#allocation50_spill] sm:$0xff] }
 0x220   : > { %v2556_v44 = vmul.f32 %v5187_v47, %v6506_v22  ;;  %v3008_v17 = vmul.f32 0.5, %v2976_v36  ;;  %v3039_v24 = vmul.f32 %v3007_v15, %v6693_v32  ;;  %v2893_v7 = vadd.f32 %v2861_v58, %v6769_v9 }
 0x221   : > { %v2587_v52 = vadd.f32 %v2555_v56, %v2305_v3  ;;  %v2894_v50 = vadd.f32 %v2862_v16, %v6776_v46  ;;  %v2620_v27 = vmul.f32 %v6086_v25, %v6656_v41  ;;  %v2621_v53 = vmul.f32 %v6086_v25, %v6658_v39 }
 0x222   : > { %v2588_v21 = vadd.f32 %v2556_v44, %v2306_v55  ;;  %v3040_v49 = vmul.f32 %v3008_v17, %v6702_v30  ;;  %v2925_v51 = vmul.f32 0.7978846, %v2893_v7  ;;  %v2685_v22 = vmul.f32 %v6120_v2, %v6812_v63 }
 0x223   : > { %v2686_v32 = vmul.f32 %v6120_v2, %v6818_v34  ;;  %v2926_v54 = vmul.f32 0.7978846, %v2894_v50  ;;  %v2652_v61 = vadd.f32 %v2620_v27, %v2587_v52  ;;  %v1312_v14 = vadd.s32 208, %v5055_v20  ;;  %v7827_v52 = vld [vmem:[#allocation52_spill] sm:$0xff] }
 0x224   : > { %v2653_v31 = vadd.f32 %v2621_v53, %v2588_v21  ;;  %v3068_v0 = vpack.c.bf16 %v3040_v49, %v3039_v24  ;;  %4364 = vtanh.f32 %v2925_v51  ;;  %v1313_v62 = vadd.s32 216, %v5055_v20  ;;  %v7826_v24 = vld [vmem:[#allocation48_spill] sm:$0xff] }
 0x225   : > { %v7822_v28 = vrot.slane %v7821_v23, 7  ;;  %v7823_v30 = vrot.slane %v7803_v13, 7  ;;  %4366 = vtanh.f32 %v2926_v54  ;;  %v2717_v4 = vadd.f32 %v2685_v22, %v2652_v61  ;;  %v7828_v22 = vld [vmem:[#allocation54_spill] sm:$0xff] }
 0x226   : > { %v2718_v60 = vadd.f32 %v2686_v32, %v2653_v31  ;;  %v1508_v43 = vand.u32 15, %v1312_v14  ;;  %3172 = vmatmul.bf16.gmra.mxu2 %v3068_v0  ;;  %v1515_v56 = vand.u32 15, %v1313_v62  ;;  %v7825_v15 = vrot.slane %v7796_v42, 7 }
 0x227   : > { %v6842_v38 = vsel %vm1989_vm0, %v7823_v30, %v7822_v28  ;;  %v7824_v36 = vmov %v7823_v30  ;;  %v2157_v3 = vmul.f32 %v5080_v29, %v6554_v11  ;;  %v2158_v16 = vmul.f32 %v5080_v29, %v6532_v1 }
 0x228   : > { %v1999_v58 = vsel %vm1989_vm0, %v7825_v15, %v7824_v36  ;;  %v6855_v55 = vadd.f32 %v6167_v19, %v2717_v4  ;;  %v6858_v44 = vadd.f32 %v6167_v19, %v2718_v60  ;;  %vm1943_vm4 = vcmp.eq.s32.totalorder %v1508_v43, 0 }
 0x229   : > { %v2222_v17 = vmul.f32 %v5082_v37, %v6708_v18  ;;  %v6862_v42 = vsel %vm1943_vm4, 0.0, %v1999_v58  ;;  %v2189_v7 = vadd.f32 %v2157_v3, %v7826_v24  ;;  %v2190_v50 = vadd.f32 %v2158_v16, %v7827_v52 }
 0x22a   : > { %v2223_v11 = vmul.f32 %v5082_v37, %v6684_v6  ;;  %v2785_v1 = vmul.f32 %v6855_v55, %v6855_v55  ;;  %v2786_v19 = vmul.f32 %v6858_v44, %v6858_v44  ;;  %v2287_v21 = vmul.f32 %v5193_v10, %v6862_v42  ;;  %v4365_v53 = vpop.eup %4364 }
 0x22b   : > { %v2288_v27 = vmul.f32 %v5193_v10, %v6842_v38  ;;  %v2254_v49 = vadd.f32 %v2222_v17, %v2189_v7  ;;  %vm2356_vm0 = vcmp.eq.s32.totalorder %v1515_v56, 15  ;;  %v7829_v32 = vrot.slane %v7828_v22, 1  ;;  %v4367_v31 = vpop.eup %4366 }
 0x22c   : > { %v2255_v51 = vadd.f32 %v2223_v11, %v2190_v50  ;;  %v7830_v54 = vrot.slane %v7821_v23, 1  ;;  %v2989_v14 = vadd.f32 1.0, %v4365_v53  ;;  %v2817_v0 = vmul.f32 %v2785_v1, %v6855_v55 }
 0x22d   : > { %v2818_v62 = vmul.f32 %v2786_v19, %v6858_v44  ;;  %v7832_v30 = vrot.slane %v7803_v13, 1  ;;  %v2990_v60 = vadd.f32 1.0, %v4367_v31  ;;  %v2319_v43 = vadd.f32 %v2287_v21, %v2254_v49 }
 0x22e   : > { %v2409_v61 = vsel %vm2401_vm7, %v7830_v54, %v7829_v32  ;;  %v7831_v28 = vmov %v7830_v54  ;;  %v2320_v56 = vadd.f32 %v2288_v27, %v2255_v51  ;;  %v3021_v15 = vmul.f32 0.5, %v2989_v14 }
 0x22f   : > { %v6890_v4 = vsel %vm2401_vm7, %v7832_v30, %v7831_v28  ;;  %v6892_v36 = vsel %vm2356_vm0, 0.0, %v2409_v61  ;;  %v2849_v58 = vmul.f32 0.044715, %v2817_v0  ;;  %v2850_v3 = vmul.f32 0.044715, %v2818_v62  ;;  %v7833_v61 = vld [vmem:[#allocation73_spill] sm:$0xff] }
 0x230   : > { %v2569_v16 = vmul.f32 %v5187_v47, %v6579_v33  ;;  %v3022_v17 = vmul.f32 0.5, %v2990_v60  ;;  %v2570_v23 = vmul.f32 %v5187_v47, %v6581_v5  ;;  %v2634_v13 = vmul.f32 %v6086_v25, %v6731_v48  ;;  %v7834_v62 = vld [vmem:[#allocation81_spill] sm:$0xff]  ;;  %v7835_v28 = vld [vmem:[#allocation74_spill] sm:$0xff] }
 0x231   : > { %v2635_v24 = vmul.f32 %v6086_v25, %v6734_v40  ;;  %v3053_v7 = vmul.f32 %v3021_v15, %v6769_v9  ;;  %v2881_v52 = vadd.f32 %v2849_v58, %v6855_v55  ;;  %v2882_v50 = vadd.f32 %v2850_v3, %v6858_v44 }
 0x232   : > { %v2601_v11 = vadd.f32 %v2569_v16, %v2319_v43  ;;  %v3054_v1 = vmul.f32 %v3022_v17, %v6776_v46  ;;  %v2602_v33 = vadd.f32 %v2570_v23, %v2320_v56  ;;  %v2699_v19 = vmul.f32 %v6120_v2, %v6890_v4  ;;  %v7836_v56 = vld [vmem:[#allocation85_spill] sm:$0xff] }
 0x233   : > { %v2700_v5 = vmul.f32 %v6120_v2, %v6892_v36  ;;  %v2913_v21 = vmul.f32 0.7978846, %v2881_v52  ;;  %v2914_v27 = vmul.f32 0.7978846, %v2882_v50  ;;  %v2145_v9 = vmul.f32 %v5080_v29, %v6626_v59  ;;  %v7837_v52 = vld [vmem:[#allocation41_spill] sm:$0xff] }
 0x234   : > { %v2666_v53 = vadd.f32 %v2634_v13, %v2601_v11  ;;  %v3075_v49 = vpack.c.bf16 %v3054_v1, %v3053_v7  ;;  %v2667_v51 = vadd.f32 %v2635_v24, %v2602_v33  ;;  %v2146_v32 = vmul.f32 %v5080_v29, %v6608_v57  ;;  %v6925_v57 = vld [vmem:[%s7487_s6] ss:$0 sm:$0xff]  ;;  %v7838_v1 = vld [vmem:[#allocation29_spill] sm:$0xff] }
 0x235   : > { %v2210_v46 = vmul.f32 %v5082_v37, %v6784_v12  ;;  %4368 = vtanh.f32 %v2913_v21  ;;  %v2177_v31 = vadd.f32 %v2145_v9, %v7833_v61  ;;  %v2211_v14 = vmul.f32 %v5082_v37, %v6760_v26 }
 0x236   : > { %v2731_v54 = vadd.f32 %v2699_v19, %v2666_v53  ;;  %3207 = vmatmul.bf16.gmra.mxu3 %v3075_v49  ;;  %4370 = vtanh.f32 %v2914_v27  ;;  %v2732_v0 = vadd.f32 %v2700_v5, %v2667_v51  ;;  %v2178_v59 = vadd.f32 %v2146_v32, %v7834_v62 }
 0x237   : > { %v2275_v30 = vmul.f32 %v5193_v10, %v7835_v28  ;;  %v2242_v43 = vadd.f32 %v2210_v46, %v2177_v31  ;;  %v2276_v15 = vmul.f32 %v5193_v10, %v7836_v56  ;;  %v2557_v58 = vmul.f32 %v5187_v47, %v6656_v41  ;;  %v7839_v46 = vld [vmem:[#allocation56_spill] sm:$0xff] }
 0x238   : > { %v6928_v60 = vadd.f32 %v6925_v57, %v2731_v54  ;;  %v6935_v3 = vadd.f32 %v6925_v57, %v2732_v0  ;;  %v2243_v16 = vadd.f32 %v2211_v14, %v2178_v59  ;;  %v2558_v17 = vmul.f32 %v5187_v47, %v6658_v39 }
 0x239   : > { %v2622_v23 = vmul.f32 %v6086_v25, %v6812_v63  ;;  %v2307_v24 = vadd.f32 %v2275_v30, %v2242_v43  ;;  %v2623_v7 = vmul.f32 %v6086_v25, %v6818_v34  ;;  %v2687_v41 = vmul.f32 %v6120_v2, %v7837_v52  ;;  %v7840_v30 = vld [vmem:[#allocation60_spill] sm:$0xff] }
 0x23a   : > { %v2799_v13 = vmul.f32 %v6928_v60, %v6928_v60  ;;  %v2800_v50 = vmul.f32 %v6935_v3, %v6935_v3  ;;  %v2308_v11 = vadd.f32 %v2276_v15, %v2243_v16  ;;  %v2688_v39 = vmul.f32 %v6120_v2, %v7838_v1 }
 0x23b   : > { %v2159_v33 = vmul.f32 %v5080_v29, %v6708_v18  ;;  %v4369_v19 = vpop.eup %4368  ;;  %v2589_v21 = vadd.f32 %v2557_v58, %v2307_v24  ;;  %v1315_v27 = vadd.s32 232, %v5055_v20  ;;  %v2160_v53 = vmul.f32 %v5080_v29, %v6684_v6 }
 0x23c   : > { %v2831_v5 = vmul.f32 %v2799_v13, %v6928_v60  ;;  %v4371_v9 = vpop.eup %4370  ;;  %v2977_v49 = vadd.f32 1.0, %v4369_v19  ;;  %v2832_v51 = vmul.f32 %v2800_v50, %v6935_v3  ;;  %v2590_v32 = vadd.f32 %v2558_v17, %v2308_v11 }
 0x23d   : > { %v2191_v54 = vadd.f32 %v2159_v33, %v7839_v46  ;;  %v2978_v61 = vadd.f32 1.0, %v4371_v9  ;;  %v2654_v14 = vadd.f32 %v2622_v23, %v2589_v21  ;;  %v1529_v18 = vand.u32 15, %v1315_v27  ;;  %v7841_v21 = vld [vmem:[#allocation64_spill] sm:$0xff]  ;;  %v7843_v46 = vld [vmem:[#allocation62_spill] sm:$0xff] }
 0x23e   : > { %v2863_v31 = vmul.f32 0.044715, %v2831_v5  ;;  %v3009_v0 = vmul.f32 0.5, %v2977_v49  ;;  %v2864_v62 = vmul.f32 0.044715, %v2832_v51  ;;  %v2655_v59 = vadd.f32 %v2623_v7, %v2590_v32 }
 0x23f   : > { %v2192_v43 = vadd.f32 %v2160_v53, %v7840_v30  ;;  %v3010_v15 = vmul.f32 0.5, %v2978_v61  ;;  %v2719_v6 = vadd.f32 %v2687_v41, %v2654_v14  ;;  %v2224_v16 = vmul.f32 %v5082_v37, %v6862_v42  ;;  %v7842_v53 = vld [vmem:[#allocation67_spill] sm:$0xff]  ;;  %v7845_v61 = vld [vmem:[#allocation58_spill] sm:$0xff] }
 0x240   : > { %v2895_v58 = vadd.f32 %v2863_v31, %v6928_v60  ;;  %v3041_v17 = vmul.f32 %v3009_v0, %v6855_v55  ;;  %v2896_v13 = vadd.f32 %v2864_v62, %v6935_v3  ;;  %v2720_v24 = vadd.f32 %v2688_v39, %v2655_v59 }
 0x241   : > { %v2225_v23 = vmul.f32 %v5082_v37, %v6842_v38  ;;  %v3042_v50 = vmul.f32 %v3010_v15, %v6858_v44  ;;  %v6969_v11 = vadd.f32 %v6925_v57, %v2719_v6  ;;  %v2256_v33 = vadd.f32 %v2224_v16, %v2191_v54 }
 0x242   : > { %v2927_v7 = vmul.f32 0.7978846, %v2895_v58  ;;  %v2928_v19 = vmul.f32 0.7978846, %v2896_v13  ;;  %v6972_v41 = vadd.f32 %v6925_v57, %v2720_v24  ;;  %v2289_v55 = vmul.f32 %v5193_v10, %v7841_v21 }
 0x243   : > { %v2257_v5 = vadd.f32 %v2225_v23, %v2192_v43  ;;  %v3069_v27 = vpack.c.bf16 %v3042_v50, %v3041_v17  ;;  %v2787_v39 = vmul.f32 %v6969_v11, %v6969_v11  ;;  %v2290_v44 = vmul.f32 %v5193_v10, %v7842_v53 }
 0x244   : > { %4372 = vtanh.f32 %v2927_v7  ;;  %v2788_v9 = vmul.f32 %v6972_v41, %v6972_v41  ;;  %v2321_v49 = vadd.f32 %v2289_v55, %v2256_v33  ;;  %vm2358_vm5 = vcmp.eq.s32.totalorder %v1529_v18, 15 }
 0x245   : > { %4374 = vtanh.f32 %v2928_v19  ;;  %3177 = vmatmul.bf16.gmra.mxu2 %v3069_v27  ;;  %v2819_v51 = vmul.f32 %v2787_v39, %v6969_v11  ;;  %v2322_v32 = vadd.f32 %v2290_v44, %v2257_v5  ;;  %v7844_v54 = vrot.slane %v7843_v46, 1 }
 0x246   : > { %v7846_v31 = vrot.slane %v7845_v61, 1  ;;  %v7848_v62 = vrot.slane %v7828_v22, 1  ;;  %v2820_v18 = vmul.f32 %v2788_v9, %v6972_v41  ;;  %v2571_v43 = vmul.f32 %v5187_v47, %v6731_v48 }
 0x247   : > { %v2572_v15 = vmul.f32 %v5187_v47, %v6734_v40  ;;  %v2851_v58 = vmul.f32 0.044715, %v2819_v51  ;;  %v2636_v6 = vmul.f32 %v6086_v25, %v6890_v4  ;;  %v2637_v22 = vmul.f32 %v6086_v25, %v6892_v36  ;;  %v7849_v51 = vld [vmem:[#allocation90_spill] sm:$0xff] }
 0x248   : > { %v2407_v14 = vsel %vm2401_vm7, %v7846_v31, %v7844_v54  ;;  %v7847_v0 = vmov %v7846_v31  ;;  %v2852_v17 = vmul.f32 0.044715, %v2820_v18  ;;  %v2603_v13 = vadd.f32 %v2571_v43, %v2321_v49 }
 0x249   : > { %v6995_v59 = vsel %vm2401_vm7, %v7848_v62, %v7847_v0  ;;  %v6998_v30 = vsel %vm2358_vm5, 0.0, %v2407_v14  ;;  %v2604_v24 = vadd.f32 %v2572_v15, %v2322_v32  ;;  %v2883_v50 = vadd.f32 %v2851_v58, %v6969_v11 }
 0x24a   : > { %v2701_v16 = vmul.f32 %v6120_v2, %v6995_v59  ;;  %v2702_v23 = vmul.f32 %v6120_v2, %v6998_v30  ;;  %v4373_v48 = vpop.eup %4372  ;;  %v2147_v40 = vmul.f32 %v5080_v29, %v6784_v12  ;;  %v2161_v7 = vmul.f32 %v5080_v29, %v6862_v42 }
 0x24b   : > { %v2162_v33 = vmul.f32 %v5080_v29, %v6842_v38  ;;  %v4375_v19 = vpop.eup %4374  ;;  %v2991_v5 = vadd.f32 1.0, %v4373_v48  ;;  %v2884_v55 = vadd.f32 %v2852_v17, %v6972_v41  ;;  %v2668_v27 = vadd.f32 %v2636_v6, %v2603_v13  ;;  %v7850_v38 = vld [vmem:[#allocation92_spill] sm:$0xff] }
 0x24c   : > { %v2669_v39 = vadd.f32 %v2637_v22, %v2604_v24  ;;  %v2992_v44 = vadd.f32 1.0, %v4375_v19  ;;  %v2915_v9 = vmul.f32 0.7978846, %v2883_v50  ;;  %v2148_v49 = vmul.f32 %v5080_v29, %v6760_v26 }
 0x24d   : > { %v2179_v32 = vadd.f32 %v2147_v40, %v7849_v51  ;;  %v3023_v12 = vmul.f32 0.5, %v2991_v5  ;;  %v2916_v54 = vmul.f32 0.7978846, %v2884_v55  ;;  %v2733_v61 = vadd.f32 %v2701_v16, %v2668_v27  ;;  %v7851_v40 = vld [vmem:[#allocation30_spill] sm:$0xff] }
 0x24e   : > { %v2734_v42 = vadd.f32 %v2702_v23, %v2669_v39  ;;  %v3024_v31 = vmul.f32 0.5, %v2992_v44  ;;  %4376 = vtanh.f32 %v2915_v9  ;;  %v2180_v14 = vadd.f32 %v2148_v49, %v7850_v38 }
 0x24f   : > { %v2212_v0 = vmul.f32 %v5082_v37, %v7835_v28  ;;  %v3055_v62 = vmul.f32 %v3023_v12, %v6928_v60  ;;  %4378 = vtanh.f32 %v2916_v54  ;;  %v7028_v18 = vadd.f32 %v6925_v57, %v2733_v61 }
 0x250   : > { %v7031_v29 = vadd.f32 %v6925_v57, %v2734_v42  ;;  %v3056_v26 = vmul.f32 %v3024_v31, %v6935_v3  ;;  %v2213_v43 = vmul.f32 %v5082_v37, %v7836_v56  ;;  %v2277_v58 = vmul.f32 %v5193_v10, %v6225_v35  ;;  %v7853_v31 = vld [vmem:[#allocation70_spill] sm:$0xff] }
 0x251   : > { %v2244_v15 = vadd.f32 %v2212_v0, %v2179_v32  ;;  %v2801_v28 = vmul.f32 %v7028_v18, %v7028_v18  ;;  %v2278_v6 = vmul.f32 %v5193_v10, %v6050_v45  ;;  %v2559_v22 = vmul.f32 %v5187_v47, %v6812_v63 }
 0x252   : > { %v2802_v60 = vmul.f32 %v7031_v29, %v7031_v29  ;;  %v3076_v3 = vpack.c.bf16 %v3056_v26, %v3055_v62  ;;  %v2245_v16 = vadd.f32 %v2213_v43, %v2180_v14  ;;  %v2560_v56 = vmul.f32 %v5187_v47, %v6818_v34 }
 0x253   : > { %v2309_v17 = vadd.f32 %v2277_v58, %v2244_v15  ;;  %v2833_v35 = vmul.f32 %v2801_v28, %v7028_v18  ;;  %v2624_v24 = vmul.f32 %v6086_v25, %v7837_v52  ;;  %v2625_v23 = vmul.f32 %v6086_v25, %v7838_v1  ;;  %v7852_v1 = vld [vmem:[#allocation65_spill] sm:$0xff] }
 0x254   : > { %v2834_v13 = vmul.f32 %v2802_v60, %v7031_v29  ;;  %v4377_v45 = vpop.eup %4376  ;;  %3212 = vmatmul.bf16.gmra.mxu3 %v3076_v3  ;;  %v2310_v48 = vadd.f32 %v2278_v6, %v2245_v16  ;;  %v2689_v50 = vmul.f32 %v6120_v2, %v6273_v8  ;;  %v2690_v34 = vmul.f32 %v6120_v2, %v7851_v40  ;;  %v7854_v60 = vld [vmem:[#allocation71_spill] sm:$0xff] }
 0x255   : > { %v2591_v63 = vadd.f32 %v2559_v22, %v2309_v17  ;;  %v4379_v19 = vpop.eup %4378  ;;  %v2979_v5 = vadd.f32 1.0, %v4377_v45  ;;  %v2865_v55 = vmul.f32 0.044715, %v2833_v35  ;;  %v1317_v39 = vadd.s32 248, %v5055_v20 }
 0x256   : > { %v2866_v27 = vmul.f32 0.044715, %v2834_v13  ;;  %v2980_v52 = vadd.f32 1.0, %v4379_v19  ;;  %v2592_v44 = vadd.f32 %v2560_v56, %v2310_v48  ;;  %v2193_v49 = vadd.f32 %v2161_v7, %v7852_v1  ;;  %v7858_v56 = vld [vmem:[#allocation68_spill] sm:$0xff] }
 0x257   : > { %v2656_v9 = vadd.f32 %v2624_v24, %v2591_v63  ;;  %v3011_v51 = vmul.f32 0.5, %v2979_v5  ;;  %v2897_v32 = vadd.f32 %v2865_v55, %v7028_v18  ;;  %v1543_v8 = vand.u32 15, %v1317_v39 }
 0x258   : > { %v2898_v12 = vadd.f32 %v2866_v27, %v7031_v29  ;;  %v3012_v54 = vmul.f32 0.5, %v2980_v52  ;;  %v2657_v61 = vadd.f32 %v2625_v23, %v2592_v44  ;;  %v2194_v38 = vadd.f32 %v2162_v33, %v7853_v31 }
 0x259   : > { %v2721_v42 = vadd.f32 %v2689_v50, %v2656_v9  ;;  %v3043_v14 = vmul.f32 %v3011_v51, %v6969_v11  ;;  %v2929_v0 = vmul.f32 0.7978846, %v2897_v32  ;;  %v2226_v26 = vmul.f32 %v5082_v37, %v7841_v21  ;;  %v7855_v11 = vld [vmem:[#allocation76_spill] sm:$0xff] }
 0x25a   : > { %v2930_v62 = vmul.f32 0.7978846, %v2898_v12  ;;  %v3044_v7 = vmul.f32 %v3012_v54, %v6972_v41  ;;  %v2722_v43 = vadd.f32 %v2690_v34, %v2657_v61  ;;  %v2227_v58 = vmul.f32 %v5082_v37, %v7842_v53  ;;  %v7856_v53 = vld [vmem:[#allocation72_spill] sm:$0xff] }
 0x25b   : > { %v7068_v15 = vadd.f32 %v6925_v57, %v2721_v42  ;;  %4380 = vtanh.f32 %v2929_v0  ;;  %v2258_v28 = vadd.f32 %v2226_v26, %v2193_v49  ;;  %v2291_v33 = vmul.f32 %v5193_v10, %v7854_v60  ;;  %v7862_v0 = vld [vmem:[#allocation75_spill] sm:$0xff] }
 0x25c   : > { %v2292_v6 = vmul.f32 %v5193_v10, %v7855_v11  ;;  %v3070_v22 = vpack.c.bf16 %v3044_v7, %v3043_v14  ;;  %4382 = vtanh.f32 %v2930_v62  ;;  %v7077_v21 = vadd.f32 %v6925_v57, %v2722_v43 }
 0x25d   : > { %v2789_v41 = vmul.f32 %v7068_v15, %v7068_v15  ;;  %v2259_v3 = vadd.f32 %v2227_v58, %v2194_v38  ;;  %v2323_v16 = vadd.f32 %v2291_v33, %v2258_v28  ;;  %vm2360_vm8 = vcmp.eq.s32.totalorder %v1543_v8, 15 }
 0x25e   : > { %v7857_v17 = vrot.slane %v7856_v53, 1  ;;  %v7859_v35 = vrot.slane %v7858_v56, 1  ;;  %3182 = vmatmul.bf16.gmra.mxu2 %v3070_v22  ;;  %v2790_v24 = vmul.f32 %v7077_v21, %v7077_v21  ;;  %v7861_v48 = vrot.slane %v7843_v46, 1 }
 0x25f   : > { %v2821_v23 = vmul.f32 %v2789_v41, %v7068_v15  ;;  %v2324_v40 = vadd.f32 %v2292_v6, %v2259_v3  ;;  %v2573_v34 = vmul.f32 %v5187_v47, %v6890_v4  ;;  %v2574_v19 = vmul.f32 %v5187_v47, %v6892_v36  ;;  %v7864_v41 = vld [vmem:[#allocation77_spill] sm:$0xff] }
 0x260   : > { %v2405_v13 = vsel %vm2401_vm7, %v7859_v35, %v7857_v17  ;;  %v7860_v45 = vmov %v7859_v35  ;;  %v2638_v5 = vmul.f32 %v6086_v25, %v6995_v59  ;;  %v2822_v55 = vmul.f32 %v2790_v24, %v7077_v21  ;;  %v7868_v35 = vld [vmem:[#allocation82_spill] sm:$0xff] }
 0x261   : > { %v7096_v63 = vsel %vm2401_vm7, %v7861_v48, %v7860_v45  ;;  %v7098_v50 = vsel %vm2360_vm8, 0.0, %v2405_v13  ;;  %v2853_v27 = vmul.f32 0.044715, %v2821_v23  ;;  %v2639_v46 = vmul.f32 %v6086_v25, %v6998_v30  ;;  %v4381_v52 = vpop.eup %4380 }
 0x262   : > { %v2703_v39 = vmul.f32 %v6120_v2, %v7096_v63  ;;  %v2605_v44 = vadd.f32 %v2573_v34, %v2323_v16  ;;  %v2606_v9 = vadd.f32 %v2574_v19, %v2324_v40  ;;  %v2704_v4 = vmul.f32 %v6120_v2, %v7098_v50  ;;  %v4383_v1 = vpop.eup %4382  ;;  %v7865_v16 = vld [vmem:[#allocation84_spill] sm:$0xff] }
 0x263   : > { %v2228_v36 = vmul.f32 %v5082_v37, %v7854_v60  ;;  %v2993_v49 = vadd.f32 1.0, %v4381_v52  ;;  %v2854_v51 = vmul.f32 0.044715, %v2822_v55  ;;  %v2885_v32 = vadd.f32 %v2853_v27, %v7068_v15 }
 0x264   : > { %v2229_v12 = vmul.f32 %v5082_v37, %v7855_v11  ;;  %v2994_v8 = vadd.f32 1.0, %v4383_v1  ;;  %v2670_v54 = vadd.f32 %v2638_v5, %v2605_v44  ;;  %v2671_v61 = vadd.f32 %v2639_v46, %v2606_v9  ;;  %v7863_v37 = vld [vmem:[#allocation86_spill] sm:$0xff] }
 0x265   : > { %v1319_v42 = vadd.s32 264, %v5055_v20  ;;  %v3025_v31 = vmul.f32 0.5, %v2993_v49  ;;  %v2886_v38 = vadd.f32 %v2854_v51, %v7077_v21  ;;  %v2917_v14 = vmul.f32 0.7978846, %v2885_v32 }
 0x266   : > { %v2260_v62 = vadd.f32 %v2228_v36, %v7862_v0  ;;  %v3026_v26 = vmul.f32 0.5, %v2994_v8  ;;  %v2735_v7 = vadd.f32 %v2703_v39, %v2670_v54  ;;  %v2736_v43 = vadd.f32 %v2704_v4, %v2671_v61  ;;  %v7873_v61 = vld [vmem:[#allocation83_spill] sm:$0xff] }
 0x267   : > { %v1557_v58 = vand.u32 15, %v1319_v42  ;;  %v3057_v28 = vmul.f32 %v3025_v31, %v7028_v18  ;;  %v2918_v60 = vmul.f32 0.7978846, %v2886_v38  ;;  %4384 = vtanh.f32 %v2917_v14  ;;  %v7866_v18 = vld [vmem:[#allocation78_spill] sm:$0xff]  ;;  %v7875_v38 = vld [vmem:[#allocation89_spill] sm:$0xff]  ;;  %v7876_v14 = vld [vmem:[#allocation88_spill] sm:$0xff] }
 0x268   : > { %v2261_v33 = vadd.f32 %v2229_v12, %v7863_v37  ;;  %v3058_v11 = vmul.f32 %v3026_v26, %v7031_v29  ;;  %v7125_v6 = vadd.f32 %v6925_v57, %v2735_v7  ;;  %v7128_v22 = vadd.f32 %v6925_v57, %v2736_v43  ;;  %v7877_v37 = vld [vmem:[#allocation80_spill] sm:$0xff] }
 0x269   : > { %v2293_v3 = vmul.f32 %v5193_v10, %v7864_v41  ;;  %4386 = vtanh.f32 %v2918_v60  ;;  %v2294_v17 = vmul.f32 %v5193_v10, %v7865_v16  ;;  %vm2362_vm9 = vcmp.eq.s32.totalorder %v1557_v58, 15 }
 0x26a   : > { %v7867_v56 = vrot.slane %v7866_v18, 1  ;;  %v7869_v13 = vrot.slane %v7868_v35, 1  ;;  %v3077_v24 = vpack.c.bf16 %v3058_v11, %v3057_v28  ;;  %v2803_v23 = vmul.f32 %v7125_v6, %v7125_v6  ;;  %v7880_v35 = vld [vmem:[#allocation87_spill] sm:$0xff] }
 0x26b   : > { %v2804_v45 = vmul.f32 %v7128_v22, %v7128_v22  ;;  %v2325_v48 = vadd.f32 %v2293_v3, %v2260_v62  ;;  %v2326_v40 = vadd.f32 %v2294_v17, %v2261_v33  ;;  %v7871_v19 = vrot.slane %v7856_v53, 1 }
 0x26c   : > { %v2403_v29 = vsel %vm2401_vm7, %v7869_v13, %v7867_v56  ;;  %v7870_v34 = vmov %v7869_v13  ;;  %v2575_v27 = vmul.f32 %v5187_v47, %v6995_v59  ;;  %3217 = vmatmul.bf16.gmra.mxu3 %v3077_v24  ;;  %v2835_v46 = vmul.f32 %v2803_v23, %v7125_v6 }
 0x26d   : > { %v2404_v5 = vsel %vm2401_vm7, %v7871_v19, %v7870_v34  ;;  %v2543_v55 = vsel %vm2362_vm9, 0.0, %v2403_v29  ;;  %v2836_v39 = vmul.f32 %v2804_v45, %v7128_v22  ;;  %v2576_v52 = vmul.f32 %v5187_v47, %v6998_v30  ;;  %v4385_v9 = vpop.eup %4384  ;;  %v7192_v45 = vld [vmem:[%s7489_s8] ss:$0 sm:$0xff] }
 0x26e   : > { %v2640_v44 = vmul.f32 %v6086_v25, %v7096_v63  ;;  %v2607_v53 = vadd.f32 %v2575_v27, %v2325_v48  ;;  %v2641_v4 = vmul.f32 %v6086_v25, %v7098_v50  ;;  %v2705_v36 = vmul.f32 %v6120_v2, %v2404_v5  ;;  %v3158_v48 = vpop.f32.mrf.mxu2 }
 0x26f   : > { %v2706_v59 = vmul.f32 %v6120_v2, %v2543_v55  ;;  %v2981_v1 = vadd.f32 1.0, %v4385_v9  ;;  %v2867_v49 = vmul.f32 0.044715, %v2835_v46  ;;  %v2868_v51 = vmul.f32 0.044715, %v2836_v39  ;;  %v4387_v12 = vpop.eup %4386 }
 0x270   : > { %v2608_v32 = vadd.f32 %v2576_v52, %v2326_v40  ;;  %v2672_v8 = vadd.f32 %v2640_v44, %v2607_v53  ;;  %v1321_v30 = vadd.s32 280, %v5055_v20  ;;  %v7874_v42 = vsel %vm5841_vm6, 0.0, %v7873_v61  ;;  %v7883_v40 = vld [vmem:[#allocation91_spill] sm:$0xff] }
 0x271   : > { %v2295_v31 = vmul.f32 %v5193_v10, %v7874_v42  ;;  %v2328_v0 = vadd.f32 %v7876_v14, %v7875_v38  ;;  %v2982_v62 = vadd.f32 1.0, %v4387_v12  ;;  %v3013_v26 = vmul.f32 0.5, %v2981_v1 }
 0x272   : > { %v2899_v7 = vadd.f32 %v2867_v49, %v7125_v6  ;;  %v2900_v43 = vadd.f32 %v2868_v51, %v7128_v22  ;;  %v2673_v58 = vadd.f32 %v2641_v4, %v2608_v32  ;;  %v2737_v28 = vadd.f32 %v2705_v36, %v2672_v8 }
 0x273   : > { %v1571_v60 = vand.u32 15, %v1321_v30  ;;  %v2327_v33 = vadd.f32 %v2295_v31, %v7877_v37  ;;  %v3014_v11 = vmul.f32 0.5, %v2982_v62  ;;  %v3045_v41 = vmul.f32 %v3013_v26, %v7068_v15  ;;  %v562_v15 = vld [vmem:[%s4970_s24] sm:$0xff]  }
 0x274   : > { %v2931_v3 = vmul.f32 0.7978846, %v2899_v7  ;;  %v2932_v10 = vmul.f32 0.7978846, %v2900_v43  ;;  %v2738_v16 = vadd.f32 %v2706_v59, %v2673_v58  ;;  %v7175_v17 = vadd.f32 %v6925_v57, %v2737_v28 }
 0x275   : > { %vm7177_vm6 = vcmp.eq.s32.totalorder %v1571_v60, 15  ;;  %v7881_v13 = vrot.slane %v7880_v35, 1  ;;  %v7882_v29 = vrot.slane %v7866_v18, 1  ;;  %v3046_v23 = vmul.f32 %v3014_v11, %v7077_v21 }
 0x276   : > { %4388 = vtanh.f32 %v2931_v3  ;;  %v7884_v34 = vrot.slane %v7883_v40, 1  ;;  %v2577_v27 = vmul.f32 %v5187_v47, %v7096_v63  ;;  %v7203_v21 = vadd.f32 %v6925_v57, %v2738_v16  ;;  %v3160_v14 = vpop.f32.mrf.mxu2 }
 0x277   : > { %v2402_v24 = vsel %vm2401_vm7, %v7882_v29, %v7881_v13  ;;  %v7885_v19 = vmov %v7881_v13  ;;  %4390 = vtanh.f32 %v2932_v10  ;;  %v2805_v46 = vmul.f32 %v7175_v17, %v7175_v17 }
 0x278   : > { %v2437_v18 = vsel %vm2401_vm7, %v7885_v19, %v7884_v34  ;;  %v3238_v39 = vunpack.c.l.bf16 %v562_v15  ;;  %v3071_v52 = vpack.c.bf16 %v3046_v23, %v3045_v41  ;;  %v3159_v44 = vadd.f32 %v7192_v45, %v3158_v48  ;;  %v576_v23 = vld [vmem:[%s4970_s24 + $0x38] sm:$0xff]   ;;  %v564_v48 = vld [vmem:[%s4970_s24 + $0x8] sm:$0xff]  }
 0x279   : > { %v2545_v9 = vsel %vm7177_vm6, 0.0, %v2437_v18  ;;  %v2806_v20 = vmul.f32 %v7203_v21, %v7203_v21  ;;  %v2837_v53 = vmul.f32 %v2805_v46, %v7175_v17  ;;  %v2578_v63 = vmul.f32 %v5187_v47, %v7098_v50 }
 0x27a   : > { %v2609_v4 = vadd.f32 %v2577_v27, %v2327_v33  ;;  %3187 = vmatmul.bf16.gmra.mxu2 %v3071_v52  ;;  %v7215_v36 = vadd.f32 %v3238_v39, %v3159_v44  ;;  %v2642_v59 = vmul.f32 %v6086_v25, %v2404_v5  ;;  %v2643_v1 = vmul.f32 %v6086_v25, %v2543_v55 }
 0x27b   : > { %v2707_v49 = vmul.f32 %v6120_v2, %v2402_v24  ;;  %v2838_v51 = vmul.f32 %v2806_v20, %v7203_v21  ;;  %v2869_v32 = vmul.f32 0.044715, %v2837_v53  ;;  %v2610_v12 = vadd.f32 %v2578_v63, %v2328_v0 }
 0x27c   : > { %v4389_v8 = vpop.eup %4388  ;;  %v3302_v30 = vmul.f32 %v7215_v36, %v7215_v36  ;;  %v3239_v54 = vunpack.c.h.bf16 %v562_v15  ;;  %v2674_v47 = vadd.f32 %v2642_v59, %v2609_v4  ;;  %v2708_v50 = vmul.f32 %v6120_v2, %v2545_v9  ;;  %v3193_v15 = vpop.f32.mrf.mxu3 }
 0x27d   : > { %v4391_v61 = vpop.eup %4390  ;;  %v2995_v42 = vadd.f32 1.0, %v4389_v8  ;;  %v2870_v31 = vmul.f32 0.044715, %v2838_v51  ;;  %v2901_v5 = vadd.f32 %v2869_v32, %v7175_v17  ;;  %v2675_v25 = vadd.f32 %v2643_v1, %v2610_v12 }
 0x27e   : > { %v2996_v55 = vadd.f32 1.0, %v4391_v61  ;;  %v3334_v38 = vmul.f32 %v3302_v30, %v7215_v36  ;;  %v2739_v62 = vadd.f32 %v2707_v49, %v2674_v47  ;;  %v3161_v43 = vadd.f32 %v7192_v45, %v3160_v14  ;;  %v3163_v40 = vpop.f32.mrf.mxu2 }
 0x27f   : > { %v3027_v0 = vmul.f32 0.5, %v2995_v42  ;;  %v2902_v26 = vadd.f32 %v2870_v31, %v7203_v21  ;;  %v2933_v7 = vmul.f32 0.7978846, %v2901_v5  ;;  %v2740_v2 = vadd.f32 %v2708_v50, %v2675_v25 }
 0x280   : > { %v3028_v58 = vmul.f32 0.5, %v2996_v55  ;;  %v3366_v28 = vmul.f32 0.044715, %v3334_v38  ;;  %v7229_v60 = vadd.f32 %v6925_v57, %v2739_v62  ;;  %v7232_v11 = vadd.f32 %v3239_v54, %v3161_v43 }
 0x281   : > { %v3059_v37 = vmul.f32 %v3027_v0, %v7125_v6  ;;  %v2934_v33 = vmul.f32 0.7978846, %v2902_v26  ;;  %4392 = vtanh.f32 %v2933_v7  ;;  %v7237_v10 = vadd.f32 %v6925_v57, %v2740_v2 }
 0x282   : > { %v3060_v41 = vmul.f32 %v3028_v58, %v7128_v22  ;;  %v3398_v3 = vadd.f32 %v3366_v28, %v7215_v36  ;;  %v2807_v16 = vmul.f32 %v7229_v60, %v7229_v60  ;;  %v3303_v6 = vmul.f32 %v7232_v11, %v7232_v11 }
 0x283   : > { %4394 = vtanh.f32 %v2934_v33  ;;  %v2808_v13 = vmul.f32 %v7237_v10, %v7237_v10  ;;  %v3194_v18 = vadd.f32 %v7192_v45, %v3193_v15  ;;  %v3252_v27 = vunpack.c.l.bf16 %v576_v23 }
 0x284   : > { %v3078_v56 = vpack.c.bf16 %v3060_v41, %v3059_v37  ;;  %v3430_v35 = vmul.f32 0.7978846, %v3398_v3  ;;  %v2839_v22 = vmul.f32 %v2807_v16, %v7229_v60  ;;  %v3335_v29 = vmul.f32 %v3303_v6, %v7232_v11  ;;  %v3195_v25 = vpop.f32.mrf.mxu3  ;;  %v578_v37 = vld [vmem:[%s4970_s24 + $0x40] sm:$0xff]  }
 0x285   : > { %v2840_v57 = vmul.f32 %v2808_v13, %v7237_v10  ;;  %v3164_v46 = vadd.f32 %v7192_v45, %v3163_v40  ;;  %v3240_v9 = vunpack.c.l.bf16 %v564_v48  ;;  %v7254_v63 = vadd.f32 %v3252_v27, %v3194_v18 }
 0x286   : > { %3222 = vmatmul.bf16.gmra.mxu3 %v3078_v56  ;;  %4396 = vtanh.f32 %v3430_v35  ;;  %v2871_v24 = vmul.f32 0.044715, %v2839_v22  ;;  %v3367_v19 = vmul.f32 0.044715, %v3335_v29  ;;  %v3253_v47 = vunpack.c.h.bf16 %v576_v23  ;;  %v3165_v55 = vpop.f32.mrf.mxu2  ;;  %v566_v56 = vld [vmem:[%s4970_s24 + $0x10] sm:$0xff]  }
 0x287   : > { %v4393_v34 = vpop.eup %4392  ;;  %v2872_v52 = vmul.f32 0.044715, %v2840_v57  ;;  %v3316_v32 = vmul.f32 %v7254_v63, %v7254_v63  ;;  %v7259_v12 = vadd.f32 %v3240_v9, %v3164_v46  ;;  %v3241_v38 = vunpack.c.h.bf16 %v564_v48 }
 0x288   : > { %v2997_v39 = vadd.f32 1.0, %v4393_v34  ;;  %v2903_v44 = vadd.f32 %v2871_v24, %v7229_v60  ;;  %v3399_v53 = vadd.f32 %v3367_v19, %v7232_v11  ;;  %v3166_v26 = vadd.f32 %v7192_v45, %v3165_v55 }
 0x289   : > { %v4395_v20 = vpop.eup %4394  ;;  %v2904_v1 = vadd.f32 %v2872_v52, %v7237_v10  ;;  %v3348_v61 = vmul.f32 %v3316_v32, %v7254_v63  ;;  %v3304_v42 = vmul.f32 %v7259_v12, %v7259_v12  ;;  %v3254_v23 = vunpack.c.l.bf16 %v578_v37 }
 0x28a   : > { %v2998_v4 = vadd.f32 1.0, %v4395_v20  ;;  %v3029_v59 = vmul.f32 0.5, %v2997_v39  ;;  %v2935_v49 = vmul.f32 0.7978846, %v2903_v44  ;;  %v3431_v51 = vmul.f32 0.7978846, %v3399_v53 }
 0x28b   : > { %v2936_v54 = vmul.f32 0.7978846, %v2904_v1  ;;  %v3380_v14 = vmul.f32 0.044715, %v3348_v61  ;;  %v3336_v62 = vmul.f32 %v3304_v42, %v7259_v12  ;;  %v7272_v2 = vadd.f32 %v3241_v38, %v3166_v26 }
 0x28c   : > { %v4397_v8 = vpop.eup %4396  ;;  %v3030_v30 = vmul.f32 0.5, %v2998_v4  ;;  %4398 = vtanh.f32 %v2935_v49  ;;  %v3061_v50 = vmul.f32 %v3029_v59, %v7175_v17  ;;  %v3196_v17 = vadd.f32 %v7192_v45, %v3195_v25  ;;  %v3198_v34 = vpop.f32.mrf.mxu3 }
 0x28d   : > { %4400 = vtanh.f32 %v3431_v51  ;;  %v3494_v5 = vadd.f32 1.0, %v4397_v8  ;;  %v3412_v7 = vadd.f32 %v3380_v14, %v7254_v63  ;;  %v3368_v43 = vmul.f32 0.044715, %v3336_v62 }
 0x28e   : > { %v3062_v31 = vmul.f32 %v3030_v30, %v7203_v21  ;;  %4402 = vtanh.f32 %v2936_v54  ;;  %v7270_v58 = vadd.f32 %v3253_v47, %v3196_v17  ;;  %v3305_v22 = vmul.f32 %v7272_v2, %v7272_v2  ;;  %v3168_v19 = vpop.f32.mrf.mxu2 }
 0x28f   : > { %v3526_v28 = vmul.f32 0.5, %v3494_v5  ;;  %v3444_v3 = vmul.f32 0.7978846, %v3412_v7  ;;  %v3400_v16 = vadd.f32 %v3368_v43, %v7259_v12  ;;  %v3242_v18 = vunpack.c.l.bf16 %v566_v56 }
 0x290   : > { %v3079_v0 = vpack.c.bf16 %v3062_v31, %v3061_v50  ;;  %v3317_v6 = vmul.f32 %v7270_v58, %v7270_v58  ;;  %v3337_v40 = vmul.f32 %v3305_v22, %v7272_v2  ;;  %v3199_v39 = vadd.f32 %v7192_v45, %v3198_v34 }
 0x291   : > { %v3432_v24 = vmul.f32 0.7978846, %v3400_v16  ;;  %v3558_v27 = vmul.f32 %v3526_v28, %v7215_v36  ;;  %4404 = vtanh.f32 %v3444_v3  ;;  %v3169_v20 = vadd.f32 %v7192_v45, %v3168_v19 }
 0x292   : > { %v4399_v21 = vpop.eup %4398  ;;  %v3349_v48 = vmul.f32 %v3317_v6, %v7270_v58  ;;  %v3369_v9 = vmul.f32 0.044715, %v3337_v40  ;;  %v7289_v59 = vadd.f32 %v3254_v23, %v3199_v39  ;;  %v3255_v47 = vunpack.c.h.bf16 %v578_v37 }
 0x293   : > { %v4401_v33 = vpop.eup %4400  ;;  %v2999_v41 = vadd.f32 1.0, %v4399_v21  ;;  %4406 = vtanh.f32 %v3432_v24  ;;  %v7293_v51 = vadd.f32 %v3242_v18, %v3169_v20  ;;  %v3243_v50 = vunpack.c.h.bf16 %v566_v56  ;;  %v580_v21 = vld [vmem:[%s4970_s24 + $0x48] sm:$0xff]  }
 0x294   : > { %v4403_v35 = vpop.eup %4402  ;;  %v3495_v13 = vadd.f32 1.0, %v4401_v33  ;;  %v3381_v44 = vmul.f32 0.044715, %v3349_v48  ;;  %v3401_v49 = vadd.f32 %v3369_v9, %v7272_v2  ;;  %v3200_v42 = vpop.f32.mrf.mxu3  ;;  %v3256_v22 = vunpack.c.l.bf16 %v580_v21 }
 0x295   : > { %v3000_v29 = vadd.f32 1.0, %v4403_v35  ;;  %v3031_v57 = vmul.f32 0.5, %v2999_v41  ;;  %v3306_v8 = vmul.f32 %v7293_v51, %v7293_v51  ;;  %v3201_v55 = vadd.f32 %v7192_v45, %v3200_v42 }
 0x296   : > { %3227 = vmatmul.bf16.gmra.mxu3 %v3079_v0  ;;  %v3527_v15 = vmul.f32 0.5, %v3495_v13  ;;  %v3413_v36 = vadd.f32 %v3381_v44, %v7270_v58  ;;  %v3170_v31 = vpop.f32.mrf.mxu2 }
 0x297   : > { %v3032_v46 = vmul.f32 0.5, %v3000_v29  ;;  %v3063_v53 = vmul.f32 %v3031_v57, %v7229_v60  ;;  %v4405_v30 = vpop.eup %4404  ;;  %v3338_v61 = vmul.f32 %v3306_v8, %v7293_v51  ;;  %v3171_v38 = vadd.f32 %v7192_v45, %v3170_v31 }
 0x298   : > { %v3559_v52 = vmul.f32 %v3527_v15, %v7232_v11  ;;  %v3318_v11 = vmul.f32 %v7289_v59, %v7289_v59  ;;  %v3445_v60 = vmul.f32 0.7978846, %v3413_v36  ;;  %v3508_v14 = vadd.f32 1.0, %v4405_v30 }
 0x299   : > { %v3064_v4 = vmul.f32 %v3032_v46, %v7237_v10  ;;  %v3433_v10 = vmul.f32 0.7978846, %v3401_v49  ;;  %v4407_v5 = vpop.eup %4406  ;;  %v3370_v62 = vmul.f32 0.044715, %v3338_v61  ;;  %v7309_v0 = vadd.f32 %v3255_v47, %v3201_v55 }
 0x29a   : > { %v4045_v1 = vpack.c.bf16 %v3559_v52, %v3558_v27  ;;  %v3350_v54 = vmul.f32 %v3318_v11, %v7289_v59  ;;  %4408 = vtanh.f32 %v3445_v60  ;;  %v7311_v26 = vadd.f32 %v3243_v50, %v3171_v38 }
 0x29b   : > { %v3080_v32 = vpack.c.bf16 %v3064_v4, %v3063_v53  ;;  %4410 = vtanh.f32 %v3433_v10  ;;  %v3496_v7 = vadd.f32 1.0, %v4407_v5  ;;  %v3402_v43 = vadd.f32 %v3370_v62, %v7293_v51  ;;  %v568_v4 = vld [vmem:[%s4970_s24 + $0x18] sm:$0xff]  }
 0x29c   : > { %4046 = vst [vmem:[%s7299_s11] sm:$0xff] %v4045_v1   ;;  %v3382_v25 = vmul.f32 0.044715, %v3350_v54  ;;  %v3319_v37 = vmul.f32 %v7309_v0, %v7309_v0  ;;  %v3307_v33 = vmul.f32 %v7311_v26, %v7311_v26  ;;  %v3540_v3 = vmul.f32 0.5, %v3508_v14  ;;  %v3203_v24 = vpop.f32.mrf.mxu3 }
 0x29d   : > { %v3434_v16 = vmul.f32 0.7978846, %v3402_v43  ;;  %v3528_v29 = vmul.f32 0.5, %v3496_v7  ;;  %v3204_v40 = vadd.f32 %v7192_v45, %v3203_v24  ;;  %v3257_v49 = vunpack.c.h.bf16 %v580_v21 }
 0x29e   : > { %v3414_v17 = vadd.f32 %v3382_v25, %v7289_v59  ;;  %v3351_v35 = vmul.f32 %v3319_v37, %v7309_v0  ;;  %v3339_v13 = vmul.f32 %v3307_v33, %v7311_v26  ;;  %v3572_v34 = vmul.f32 %v3540_v3, %v7254_v63 }
 0x29f   : > { %v7326_v39 = vadd.f32 %v3256_v22, %v3204_v40  ;;  %v3560_v52 = vmul.f32 %v3528_v29, %v7259_v12  ;;  %v3244_v12 = vunpack.c.l.bf16 %v568_v4  ;;  %v582_v29 = vld [vmem:[%s4970_s24 + $0x50] sm:$0xff]  }
 0x2a0   : > { %v3446_v28 = vmul.f32 0.7978846, %v3414_v17  ;;  %v4409_v41 = vpop.eup %4408  ;;  %v3383_v15 = vmul.f32 0.044715, %v3351_v35  ;;  %v3371_v48 = vmul.f32 0.044715, %v3339_v13 }
 0x2a1   : > { %v4411_v6 = vpop.eup %4410  ;;  %v3509_v56 = vadd.f32 1.0, %v4409_v41  ;;  %v3320_v63 = vmul.f32 %v7326_v39, %v7326_v39 }
 0x2a2   : > { %v3497_v57 = vadd.f32 1.0, %v4411_v6  ;;  %4412 = vtanh.f32 %v3446_v28  ;;  %v3415_v27 = vadd.f32 %v3383_v15, %v7309_v0  ;;  %v3403_v46 = vadd.f32 %v3371_v48, %v7311_v26 }
 0x2a3   : > { %v3541_v23 = vmul.f32 0.5, %v3509_v56  ;;  %4414 = vtanh.f32 %v3434_v16  ;;  %v3352_v36 = vmul.f32 %v3320_v63, %v7326_v39  ;;  %v3245_v28 = vunpack.c.h.bf16 %v568_v4 }
 0x2a4   : > { %v3529_v19 = vmul.f32 0.5, %v3497_v57  ;;  %v3447_v20 = vmul.f32 0.7978846, %v3415_v27  ;;  %v3435_v53 = vmul.f32 0.7978846, %v3403_v46  ;;  %v3205_v11 = vpop.f32.mrf.mxu3 }
 0x2a5   : > { %v3573_v18 = vmul.f32 %v3541_v23, %v7270_v58  ;;  %v3206_v10 = vadd.f32 %v7192_v45, %v3205_v11 }
 0x2a6   : > { %3232 = vmatmul.bf16.gmra.mxu3 %v3080_v32  ;;  %v3561_v44 = vmul.f32 %v3529_v19, %v7272_v2  ;;  %4416 = vtanh.f32 %v3447_v20  ;;  %v3384_v2 = vmul.f32 0.044715, %v3352_v36 }
 0x2a7   : > { %v4080_v9 = vpack.c.bf16 %v3573_v18, %v3572_v34  ;;  %4418 = vtanh.f32 %v3435_v53  ;;  %v3289_v50 = vadd.f32 %v3257_v49, %v3206_v10  ;;  %v570_v10 = vld [vmem:[%s4970_s24 + $0x20] sm:$0xff]  }
 0x2a8   : > { %v4413_v1 = vpop.eup %4412  ;;  %v4050_v58 = vpack.c.bf16 %v3561_v44, %v3560_v52  ;;  %v3416_v47 = vadd.f32 %v3384_v2, %v7326_v39 }
 0x2a9   : > { %4129 = vst [vmem:[%s7299_s11 + $0x38] sm:$0xff] %v4080_v9   ;;  %v4415_v32 = vpop.eup %4414  ;;  %v3173_v60 = vpop.f32.mrf.mxu2  ;;  %v3510_v8 = vadd.f32 1.0, %v4413_v1  ;;  %v3321_v5 = vmul.f32 %v3289_v50, %v3289_v50 }
 0x2aa   : > { %4123 = vst [vmem:[%s7299_s11 + $0x8] sm:$0xff] %v4050_v58   ;;  %v3174_v30 = vadd.f32 %v7192_v45, %v3173_v60  ;;  %v3498_v54 = vadd.f32 1.0, %v4415_v32  ;;  %v3448_v31 = vmul.f32 0.7978846, %v3416_v47  ;;  %v3259_v32 = vunpack.c.h.bf16 %v582_v29 }
 0x2ab   : > { %v3542_v55 = vmul.f32 0.5, %v3510_v8  ;;  %v3353_v7 = vmul.f32 %v3321_v5, %v3289_v50 }
 0x2ac   : > { %v7339_v61 = vadd.f32 %v3244_v12, %v3174_v30  ;;  %v4417_v42 = vpop.eup %4416  ;;  %v3530_v62 = vmul.f32 0.5, %v3498_v54  ;;  %4420 = vtanh.f32 %v3448_v31 }
 0x2ad   : > { %v4419_v25 = vpop.eup %4418  ;;  %v3511_v38 = vadd.f32 1.0, %v4417_v42  ;;  %v3385_v33 = vmul.f32 0.044715, %v3353_v7  ;;  %v3574_v3 = vmul.f32 %v3542_v55, %v7289_v59  ;;  %v3246_v42 = vunpack.c.l.bf16 %v570_v10 }
 0x2ae   : > { %v3308_v14 = vmul.f32 %v7339_v61, %v7339_v61  ;;  %v3499_v17 = vadd.f32 1.0, %v4419_v25  ;;  %v3562_v35 = vmul.f32 %v3530_v62, %v7293_v51 }
 0x2af   : > { %v3543_v43 = vmul.f32 0.5, %v3511_v38  ;;  %v3417_v22 = vadd.f32 %v3385_v33, %v3289_v50 }
 0x2b0   : > { %v3340_v21 = vmul.f32 %v3308_v14, %v7339_v61  ;;  %v3531_v37 = vmul.f32 0.5, %v3499_v17 }
 0x2b1   : > { %v3175_v41 = vpop.f32.mrf.mxu2  ;;  %v3575_v16 = vmul.f32 %v3543_v43, %v7309_v0  ;;  %v3449_v48 = vmul.f32 0.7978846, %v3417_v22  ;;  %v3258_v0 = vunpack.c.l.bf16 %v582_v29 }
 0x2b2   : > { %v3372_v6 = vmul.f32 0.044715, %v3340_v21  ;;  %v3176_v56 = vadd.f32 %v7192_v45, %v3175_v41  ;;  %v3563_v13 = vmul.f32 %v3531_v37, %v7311_v26  ;;  %v4421_v34 = vpop.eup %4420 }
 0x2b3   : > { %v4085_v57 = vpack.c.bf16 %v3575_v16, %v3574_v3  ;;  %4422 = vtanh.f32 %v3449_v48  ;;  %v3512_v26 = vadd.f32 1.0, %v4421_v34  ;;  %v3247_v3 = vunpack.c.h.bf16 %v570_v10 }
 0x2b4   : > { %v3404_v24 = vadd.f32 %v3372_v6, %v7339_v61  ;;  %v3277_v23 = vadd.f32 %v3245_v28, %v3176_v56  ;;  %v4055_v15 = vpack.c.bf16 %v3563_v13, %v3562_v35  ;;  %v584_v13 = vld [vmem:[%s4970_s24 + $0x58] sm:$0xff]  }
 0x2b5   : > { %4130 = vst [vmem:[%s7299_s11 + $0x40] sm:$0xff] %v4085_v57   ;;  %v3544_v20 = vmul.f32 0.5, %v3512_v26 }
 0x2b6   : > { %v3436_v59 = vmul.f32 0.7978846, %v3404_v24  ;;  %v3309_v40 = vmul.f32 %v3277_v23, %v3277_v23  ;;  %4124 = vst [vmem:[%s7299_s11 + $0x10] sm:$0xff] %v4055_v15  }
 0x2b7   : > { %v3576_v11 = vmul.f32 %v3544_v20, %v7326_v39 }
 0x2b8   : > { %v3341_v18 = vmul.f32 %v3309_v40, %v3277_v23  ;;  %4424 = vtanh.f32 %v3436_v59 }
 0x2b9   : > { %v3208_v19 = vpop.f32.mrf.mxu3  ;;  %v4423_v9 = vpop.eup %4422 }
 0x2ba   : > { %v3209_v51 = vadd.f32 %v7192_v45, %v3208_v19  ;;  %v3373_v27 = vmul.f32 0.044715, %v3341_v18  ;;  %v3513_v53 = vadd.f32 1.0, %v4423_v9  ;;  %v572_v9 = vld [vmem:[%s4970_s24 + $0x28] sm:$0xff]  }
 0x2bc   : > { %v7354_v46 = vadd.f32 %v3258_v0, %v3209_v51  ;;  %v3405_v52 = vadd.f32 %v3373_v27, %v3277_v23  ;;  %v3545_v58 = vmul.f32 0.5, %v3513_v53 }
 0x2be   : > { %v3322_v44 = vmul.f32 %v7354_v46, %v7354_v46  ;;  %v3437_v63 = vmul.f32 0.7978846, %v3405_v52  ;;  %v4425_v1 = vpop.eup %4424  ;;  %v3577_v2 = vmul.f32 %v3545_v58, %v3289_v50 }
 0x2bf   : > { %v3500_v8 = vadd.f32 1.0, %v4425_v1 }
 0x2c0   : > { %v3354_v4 = vmul.f32 %v3322_v44, %v7354_v46  ;;  %4426 = vtanh.f32 %v3437_v63  ;;  %v4090_v54 = vpack.c.bf16 %v3577_v2, %v3576_v11  ;;  %v3261_v63 = vunpack.c.h.bf16 %v584_v13 }
 0x2c1   : > { %v3210_v49 = vpop.f32.mrf.mxu3  ;;  %v3532_v55 = vmul.f32 0.5, %v3500_v8 }
 0x2c2   : > { %v3386_v36 = vmul.f32 0.044715, %v3354_v4  ;;  %v3211_v12 = vadd.f32 %v7192_v45, %v3210_v49  ;;  %4131 = vst [vmem:[%s7299_s11 + $0x48] sm:$0xff] %v4090_v54   ;;  %v3248_v49 = vunpack.c.l.bf16 %v572_v9 }
 0x2c3   : > { %v3564_v7 = vmul.f32 %v3532_v55, %v7339_v61 }
 0x2c4   : > { %v3418_v60 = vadd.f32 %v3386_v36, %v7354_v46  ;;  %v3291_v30 = vadd.f32 %v3259_v32, %v3211_v12 }
 0x2c6   : > { %v3450_v47 = vmul.f32 0.7978846, %v3418_v60  ;;  %v3323_v31 = vmul.f32 %v3291_v30, %v3291_v30  ;;  %v4427_v5 = vpop.eup %4426 }
 0x2c7   : > { %v3501_v38 = vadd.f32 1.0, %v4427_v5 }
 0x2c8   : > { %v3178_v25 = vpop.f32.mrf.mxu2  ;;  %v3355_v62 = vmul.f32 %v3323_v31, %v3291_v30  ;;  %4428 = vtanh.f32 %v3450_v47 }
 0x2c9   : > { %v3179_v14 = vadd.f32 %v7192_v45, %v3178_v25  ;;  %v3533_v39 = vmul.f32 0.5, %v3501_v38  ;;  %v3249_v38 = vunpack.c.h.bf16 %v572_v9 }
 0x2ca   : > { %v3387_v17 = vmul.f32 0.044715, %v3355_v62 }
 0x2cb   : > { %v7365_v50 = vadd.f32 %v3246_v42, %v3179_v14  ;;  %v3565_v43 = vmul.f32 %v3533_v39, %v3277_v23  ;;  %v3260_v23 = vunpack.c.l.bf16 %v584_v13 }
 0x2cc   : > { %v3419_v28 = vadd.f32 %v3387_v17, %v3291_v30 }
 0x2cd   : > { %v3310_v21 = vmul.f32 %v7365_v50, %v7365_v50  ;;  %v4060_v37 = vpack.c.bf16 %v3565_v43, %v3564_v7  ;;  %v586_v43 = vld [vmem:[%s4970_s24 + $0x60] sm:$0xff]  }
 0x2ce   : > { %v3451_v41 = vmul.f32 0.7978846, %v3419_v28  ;;  %v4429_v6 = vpop.eup %4428 }
 0x2cf   : > { %v3342_v33 = vmul.f32 %v3310_v21, %v7365_v50  ;;  %4125 = vst [vmem:[%s7299_s11 + $0x18] sm:$0xff] %v4060_v37   ;;  %v3514_v29 = vadd.f32 1.0, %v4429_v6 }
 0x2d0   : > { %v3180_v16 = vpop.f32.mrf.mxu2  ;;  %4430 = vtanh.f32 %v3451_v41 }
 0x2d1   : > { %v3374_v56 = vmul.f32 0.044715, %v3342_v33  ;;  %v3181_v35 = vadd.f32 %v7192_v45, %v3180_v16  ;;  %v3546_v0 = vmul.f32 0.5, %v3514_v29  ;;  %v3262_v16 = vunpack.c.l.bf16 %v586_v43 }
 0x2d3   : > { %v3406_v61 = vadd.f32 %v3374_v56, %v7365_v50  ;;  %v3279_v22 = vadd.f32 %v3247_v3, %v3181_v35  ;;  %v3578_v52 = vmul.f32 %v3546_v0, %v7354_v46  ;;  %v574_v0 = vld [vmem:[%s4970_s24 + $0x30] sm:$0xff]  }
 0x2d4   : > { %v3250_v9 = vunpack.c.l.bf16 %v574_v0 }
 0x2d5   : > { %v3438_v57 = vmul.f32 0.7978846, %v3406_v61  ;;  %v3311_v24 = vmul.f32 %v3279_v22, %v3279_v22 }
 0x2d6   : > { %v4431_v48 = vpop.eup %4430 }
 0x2d7   : > { %v3213_v15 = vpop.f32.mrf.mxu3  ;;  %v3343_v59 = vmul.f32 %v3311_v24, %v3279_v22  ;;  %v3515_v34 = vadd.f32 1.0, %v4431_v48  ;;  %4432 = vtanh.f32 %v3438_v57 }
 0x2d8   : > { %v3214_v40 = vadd.f32 %v7192_v45, %v3213_v15 }
 0x2d9   : > { %v3375_v19 = vmul.f32 0.044715, %v3343_v59  ;;  %v3547_v51 = vmul.f32 0.5, %v3515_v34  ;;  %v3263_v34 = vunpack.c.h.bf16 %v586_v43 }
 0x2da   : > { %v7376_v18 = vadd.f32 %v3260_v23, %v3214_v40 }
 0x2db   : > { %v3407_v26 = vadd.f32 %v3375_v19, %v3279_v22  ;;  %v3579_v44 = vmul.f32 %v3547_v51, %v3291_v30 }
 0x2dc   : > { %v3324_v27 = vmul.f32 %v7376_v18, %v7376_v18 }
 0x2dd   : > { %v3439_v20 = vmul.f32 0.7978846, %v3407_v26  ;;  %v4095_v4 = vpack.c.bf16 %v3579_v44, %v3578_v52  ;;  %v4433_v58 = vpop.eup %4432 }
 0x2de   : > { %v3356_v53 = vmul.f32 %v3324_v27, %v7376_v18  ;;  %v3502_v60 = vadd.f32 1.0, %v4433_v58 }
 0x2df   : > { %v3215_v1 = vpop.f32.mrf.mxu3  ;;  %4434 = vtanh.f32 %v3439_v20  ;;  %4132 = vst [vmem:[%s7299_s11 + $0x50] sm:$0xff] %v4095_v4  }
 0x2e0   : > { %v3388_v36 = vmul.f32 0.044715, %v3356_v53  ;;  %v3216_v32 = vadd.f32 %v7192_v45, %v3215_v1  ;;  %v3534_v31 = vmul.f32 0.5, %v3502_v60 }
 0x2e1   : > { %v3183_v12 = vpop.f32.mrf.mxu2 }
 0x2e2   : > { %v3420_v11 = vadd.f32 %v3388_v36, %v7376_v18  ;;  %v3184_v46 = vadd.f32 %v7192_v45, %v3183_v12  ;;  %v3293_v2 = vadd.f32 %v3261_v63, %v3216_v32  ;;  %v3566_v21 = vmul.f32 %v3534_v31, %v7365_v50 }
 0x2e4   : > { %v3452_v10 = vmul.f32 0.7978846, %v3420_v11  ;;  %v7387_v8 = vadd.f32 %v3248_v49, %v3184_v46  ;;  %v3325_v30 = vmul.f32 %v3293_v2, %v3293_v2 }
 0x2e5   : > { %v4435_v54 = vpop.eup %4434 }
 0x2e6   : > { %v3312_v47 = vmul.f32 %v7387_v8, %v7387_v8  ;;  %v3357_v42 = vmul.f32 %v3325_v30, %v3293_v2  ;;  %v3503_v5 = vadd.f32 1.0, %v4435_v54  ;;  %4436 = vtanh.f32 %v3452_v10 }
 0x2e8   : > { %v3344_v25 = vmul.f32 %v3312_v47, %v7387_v8  ;;  %v3389_v55 = vmul.f32 0.044715, %v3357_v42  ;;  %v3535_v14 = vmul.f32 0.5, %v3503_v5  ;;  %v3251_v42 = vunpack.c.h.bf16 %v574_v0 }
 0x2e9   : > { %v3185_v62 = vpop.f32.mrf.mxu2 }
 0x2ea   : > { %v3376_v39 = vmul.f32 0.044715, %v3344_v25  ;;  %v3421_v17 = vadd.f32 %v3389_v55, %v3293_v2  ;;  %v3186_v7 = vadd.f32 %v7192_v45, %v3185_v62  ;;  %v3567_v28 = vmul.f32 %v3535_v14, %v3279_v22  ;;  %v588_v25 = vld [vmem:[%s4970_s24 + $0x68] sm:$0xff]  }
 0x2ec   : > { %v3408_v37 = vadd.f32 %v3376_v39, %v7387_v8  ;;  %v3453_v33 = vmul.f32 0.7978846, %v3421_v17  ;;  %v3281_v41 = vadd.f32 %v3249_v38, %v3186_v7  ;;  %v4065_v3 = vpack.c.bf16 %v3567_v28, %v3566_v21  ;;  %v4437_v6 = vpop.eup %4436 }
 0x2ed   : > { %v3516_v57 = vadd.f32 1.0, %v4437_v6  ;;  %v3264_v28 = vunpack.c.l.bf16 %v588_v25 }
 0x2ee   : > { %v3440_v56 = vmul.f32 0.7978846, %v3408_v37  ;;  %4438 = vtanh.f32 %v3453_v33  ;;  %v3313_v35 = vmul.f32 %v3281_v41, %v3281_v41  ;;  %4126 = vst [vmem:[%s7299_s11 + $0x20] sm:$0xff] %v4065_v3  }
 0x2ef   : > { %v3218_v13 = vpop.f32.mrf.mxu3  ;;  %v3548_v48 = vmul.f32 0.5, %v3516_v57 }
 0x2f0   : > { %v3219_v61 = vadd.f32 %v7192_v45, %v3218_v13  ;;  %v3345_v29 = vmul.f32 %v3313_v35, %v3281_v41  ;;  %4440 = vtanh.f32 %v3440_v56 }
 0x2f1   : > { %v3580_v20 = vmul.f32 %v3548_v48, %v7376_v18 }
 0x2f2   : > { %v7398_v24 = vadd.f32 %v3262_v16, %v3219_v61  ;;  %v3377_v50 = vmul.f32 0.044715, %v3345_v29 }
 0x2f4   : > { %v3326_v22 = vmul.f32 %v7398_v24, %v7398_v24  ;;  %v4439_v23 = vpop.eup %4438  ;;  %v3409_v15 = vadd.f32 %v3377_v50, %v3281_v41 }
 0x2f5   : > { %v3517_v59 = vadd.f32 1.0, %v4439_v23 }
 0x2f6   : > { %v3358_v40 = vmul.f32 %v3326_v22, %v7398_v24  ;;  %v3441_v19 = vmul.f32 0.7978846, %v3409_v15  ;;  %v4441_v44 = vpop.eup %4440  ;;  %v3265_v22 = vunpack.c.h.bf16 %v588_v25 }
 0x2f7   : > { %v3220_v51 = vpop.f32.mrf.mxu3  ;;  %v3549_v26 = vmul.f32 0.5, %v3517_v59  ;;  %v3504_v58 = vadd.f32 1.0, %v4441_v44 }
 0x2f8   : > { %v3390_v27 = vmul.f32 0.044715, %v3358_v40  ;;  %v3221_v52 = vadd.f32 %v7192_v45, %v3220_v51  ;;  %4442 = vtanh.f32 %v3441_v19 }
 0x2f9   : > { %v3581_v53 = vmul.f32 %v3549_v26, %v3293_v2  ;;  %v3536_v10 = vmul.f32 0.5, %v3504_v58 }
 0x2fa   : > { %v3422_v63 = vadd.f32 %v3390_v27, %v7398_v24  ;;  %v3295_v4 = vadd.f32 %v3263_v34, %v3221_v52  ;;  %v590_v27 = vld [vmem:[%s4970_s24 + $0x70] sm:$0xff]  }
 0x2fb   : > { %v4100_v36 = vpack.c.bf16 %v3581_v53, %v3580_v20  ;;  %v3568_v55 = vmul.f32 %v3536_v10, %v7387_v8 }
 0x2fc   : > { %v3454_v49 = vmul.f32 0.7978846, %v3422_v63  ;;  %v3327_v12 = vmul.f32 %v3295_v4, %v3295_v4  ;;  %v3266_v63 = vunpack.c.l.bf16 %v590_v27 }
 0x2fd   : > { %v3188_v1 = vpop.f32.mrf.mxu2  ;;  %4133 = vst [vmem:[%s7299_s11 + $0x58] sm:$0xff] %v4100_v36  }
 0x2fe   : > { %v3189_v32 = vadd.f32 %v7192_v45, %v3188_v1  ;;  %v4443_v46 = vpop.eup %4442  ;;  %v3359_v60 = vmul.f32 %v3327_v12, %v3295_v4  ;;  %4444 = vtanh.f32 %v3454_v49 }
 0x2ff   : > { %v3505_v30 = vadd.f32 1.0, %v4443_v46 }
 0x300   : > { %v7409_v11 = vadd.f32 %v3250_v9, %v3189_v32  ;;  %v3391_v2 = vmul.f32 0.044715, %v3359_v60 }
 0x301   : > { %v3537_v54 = vmul.f32 0.5, %v3505_v30 }
 0x302   : > { %v3314_v18 = vmul.f32 %v7409_v11, %v7409_v11  ;;  %v3423_v31 = vadd.f32 %v3391_v2, %v3295_v4 }
 0x303   : > { %v3569_v38 = vmul.f32 %v3537_v54, %v3281_v41 }
 0x304   : > { %v3346_v47 = vmul.f32 %v3314_v18, %v7409_v11  ;;  %v3455_v39 = vmul.f32 0.7978846, %v3423_v31  ;;  %v4445_v17 = vpop.eup %4444 }
 0x305   : > { %v3190_v5 = vpop.f32.mrf.mxu2  ;;  %v4070_v7 = vpack.c.bf16 %v3569_v38, %v3568_v55  ;;  %v3518_v6 = vadd.f32 1.0, %v4445_v17 }
 0x306   : > { %v3378_v14 = vmul.f32 0.044715, %v3346_v47  ;;  %v3191_v62 = vadd.f32 %v7192_v45, %v3190_v5  ;;  %4446 = vtanh.f32 %v3455_v39  ;;  %v3267_v47 = vunpack.c.h.bf16 %v590_v27 }
 0x307   : > { %4127 = vst [vmem:[%s7299_s11 + $0x28] sm:$0xff] %v4070_v7   ;;  %v3550_v61 = vmul.f32 0.5, %v3518_v6 }
 0x308   : > { %v3410_v43 = vadd.f32 %v3378_v14, %v7409_v11  ;;  %v3283_v21 = vadd.f32 %v3251_v42, %v3191_v62  ;;  %v592_v62 = vld [vmem:[%s4970_s24 + $0x78] sm:$0xff]   ;;  %s3672_s24 = sshll.u32 %s3669_s13, 4  ;;  %s3673_s24 = int_to_ptr.hbm [resolvable:$true] %s3672_s24 }
 0x309   : > { %v3223_v37 = vpop.f32.mrf.mxu3  ;;  %v3582_v0 = vmul.f32 %v3550_v61, %v7398_v24  ;;  %s4663_s15 = sshra.s32 %s3673_s24, 4  ;;  %s4664_s15 = int_to_ptr.hbm [resolvable:$true] %s4663_s15 }
 0x30a   : > { %v3442_v33 = vmul.f32 0.7978846, %v3410_v43  ;;  %v3315_v3 = vmul.f32 %v3283_v21, %v3283_v21  ;;  %v3224_v16 = vadd.f32 %v7192_v45, %v3223_v37  ;;  %s4665_s12 = scalar_lea.hbm %s4664_s15, 128  ;;  %p4670_p8 = scmp.lt.s32.totalorder %s4664_s15, %s7490_s9 }
 0x30b   : > { %p4666_p1 = scmp.ne.s32.totalorder %s4664_s15, %s4665_s12  ;;  %p4671_p10 = scmp.lt.s32.totalorder %s4669_s28, %s4665_s12 }
 0x30c   : > { %v3347_v8 = vmul.f32 %v3315_v3, %v3283_v21  ;;  %v7420_v41 = vadd.f32 %v3264_v28, %v3224_v16  ;;  %4448 = vtanh.f32 %v3442_v33  ;;  %v4447_v13 = vpop.eup %4446  ;;  %v3268_v28 = vunpack.c.l.bf16 %v592_v62 }
 0x30d   : > { %v3519_v29 = vadd.f32 1.0, %v4447_v13  ;;  %p4667_p2 = pnand %p4666_p1, %p4882_p5  ;;  %p4672_p11 = por %p4671_p10, %p4670_p8 }
 0x30e   : > { %v3379_v56 = vmul.f32 0.044715, %v3347_v8  ;;  %v3328_v35 = vmul.f32 %v7420_v41, %v7420_v41 }
 0x30f   : > { %v3551_v15 = vmul.f32 0.5, %v3519_v29  ;;  %p4668_p4 = pneg %p4667_p2 }
 0x310   : > { %v3411_v57 = vadd.f32 %v3379_v56, %v3283_v21  ;;  %v3360_v50 = vmul.f32 %v3328_v35, %v7420_v41 }
 0x311   : > { %v3225_v23 = vpop.f32.mrf.mxu3  ;;  %v3583_v19 = vmul.f32 %v3551_v15, %v3295_v4  ;;  %p4673_p12 = pnand %p4672_p11, %p4668_p4 }
 0x312   : > { %v3443_v48 = vmul.f32 0.7978846, %v3411_v57  ;;  %v3392_v59 = vmul.f32 0.044715, %v3360_v50  ;;  %v3226_v40 = vadd.f32 %v7192_v45, %v3225_v23  ;;  %v4449_v34 = vpop.eup %4448 }
 0x313   : > { %v4105_v52 = vpack.c.bf16 %v3583_v19, %v3582_v0  ;;  %v3506_v20 = vadd.f32 1.0, %v4449_v34 }
 0x314   : > { %4450 = vtanh.f32 %v3443_v48  ;;  %v3424_v51 = vadd.f32 %v3392_v59, %v7420_v41  ;;  %v3297_v26 = vadd.f32 %v3265_v22, %v3226_v40  ;;  %v3269_v22 = vunpack.c.h.bf16 %v592_v62 }
 0x315   : > { %4134 = vst [vmem:[%s7299_s11 + $0x60] sm:$0xff] %v4105_v52   ;;  %v3538_v49 = vmul.f32 0.5, %v3506_v20 }
 0x316   : > { %v3456_v44 = vmul.f32 0.7978846, %v3424_v51  ;;  %v3329_v9 = vmul.f32 %v3297_v26, %v3297_v26 }
 0x317   : > { %v3570_v30 = vmul.f32 %v3538_v49, %v7409_v11 }
 0x318   : > { %v3361_v53 = vmul.f32 %v3329_v9, %v3297_v26  ;;  %4452 = vtanh.f32 %v3456_v44 }
 0x319   : > { %v3228_v1 = vpop.f32.mrf.mxu3 }
 0x31a   : > { %v4451_v58 = vpop.eup %4450  ;;  %v3393_v36 = vmul.f32 0.044715, %v3361_v53  ;;  %v3229_v24 = vadd.f32 %v7192_v45, %v3228_v1 }
 0x31b   : > { %v3507_v4 = vadd.f32 1.0, %v4451_v58 }
 0x31c   : > { %v3425_v32 = vadd.f32 %v3393_v36, %v3297_v26  ;;  %v3298_v12 = vadd.f32 %v3266_v63, %v3229_v24 }
 0x31d   : > { %v3539_v46 = vmul.f32 0.5, %v3507_v4 }
 0x31e   : > { %v3457_v60 = vmul.f32 0.7978846, %v3425_v32  ;;  %v3330_v10 = vmul.f32 %v3298_v12, %v3298_v12  ;;  %v4453_v2 = vpop.eup %4452 }
 0x31f   : > { %v3571_v18 = vmul.f32 %v3539_v46, %v3283_v21  ;;  %v3520_v55 = vadd.f32 1.0, %v4453_v2 }
 0x320   : > { %4454 = vtanh.f32 %v3457_v60  ;;  %v3362_v54 = vmul.f32 %v3330_v10, %v3298_v12 }
 0x321   : > { %v4075_v42 = vpack.c.bf16 %v3571_v18, %v3570_v30  ;;  %v3230_v31 = vpop.f32.mrf.mxu3  ;;  %v3552_v43 = vmul.f32 0.5, %v3520_v55 }
 0x322   : > { %v3394_v5 = vmul.f32 0.044715, %v3362_v54  ;;  %v3231_v25 = vadd.f32 %v7192_v45, %v3230_v31  ;;  %v4468_v45 = vld [vmem:[%s7489_s8] ss:$0 sm:$0xff] }
 0x323   : > { %4128 = vst [vmem:[%s7299_s11 + $0x30] sm:$0xff] %v4075_v42   ;;  %v3584_v6 = vmul.f32 %v3552_v43, %v7420_v41 }
 0x324   : > { %v3426_v38 = vadd.f32 %v3394_v5, %v3298_v12  ;;  %v3299_v14 = vadd.f32 %v3267_v47, %v3231_v25 }
 0x326   : > { %v4455_v39 = vpop.eup %4454  ;;  %v3458_v17 = vmul.f32 0.7978846, %v3426_v38  ;;  %v3331_v7 = vmul.f32 %v3299_v14, %v3299_v14 }
 0x327   : > { %v3521_v11 = vadd.f32 1.0, %v4455_v39 }
 0x328   : > { %v3363_v21 = vmul.f32 %v3331_v7, %v3299_v14  ;;  %4456 = vtanh.f32 %v3458_v17 }
 0x329   : > { %v3553_v37 = vmul.f32 0.5, %v3521_v11  ;;  %v3233_v33 = vpop.f32.mrf.mxu3 }
 0x32a   : > { %v3395_v3 = vmul.f32 0.044715, %v3363_v21  ;;  %v3234_v16 = vadd.f32 %v4468_v45, %v3233_v33 }
 0x32b   : > { %v3585_v8 = vmul.f32 %v3553_v37, %v3297_v26 }
 0x32c   : > { %v3427_v56 = vadd.f32 %v3395_v3, %v3299_v14  ;;  %v3300_v35 = vadd.f32 %v3268_v28, %v3234_v16 }
 0x32d   : > { %v4110_v13 = vpack.c.bf16 %v3585_v8, %v3584_v6 }
 0x32e   : > { %v3459_v61 = vmul.f32 0.7978846, %v3427_v56  ;;  %v3332_v29 = vmul.f32 %v3300_v35, %v3300_v35  ;;  %v4457_v57 = vpop.eup %4456 }
 0x32f   : > { %4135 = vst [vmem:[%s7299_s11 + $0x68] sm:$0xff] %v4110_v13   ;;  %v3522_v59 = vadd.f32 1.0, %v4457_v57 }
 0x330   : > { %4458 = vtanh.f32 %v3459_v61  ;;  %v3364_v50 = vmul.f32 %v3332_v29, %v3300_v35 }
 0x331   : > { %v3235_v23 = vpop.f32.mrf.mxu3  ;;  %v3554_v51 = vmul.f32 0.5, %v3522_v59 }
 0x332   : > { %v3396_v15 = vmul.f32 0.044715, %v3364_v50  ;;  %v3236_v48 = vadd.f32 %v4468_v45, %v3235_v23 }
 0x333   : > { %v3586_v9 = vmul.f32 %v3554_v51, %v3298_v12 }
 0x334   : > { %v3428_v40 = vadd.f32 %v3396_v15, %v3300_v35  ;;  %v3301_v0 = vadd.f32 %v3269_v22, %v3236_v48 }
 0x336   : > { %v4459_v34 = vpop.eup %4458  ;;  %v3460_v41 = vmul.f32 0.7978846, %v3428_v40  ;;  %v3333_v19 = vmul.f32 %v3301_v0, %v3301_v0 }
 0x337   : > { %v3523_v26 = vadd.f32 1.0, %v4459_v34 }
 0x338   : > { %v3365_v27 = vmul.f32 %v3333_v19, %v3301_v0  ;;  %4460 = vtanh.f32 %v3460_v41 }
 0x339   : > { %v3555_v52 = vmul.f32 0.5, %v3523_v26 }
 0x33a   : > { %v3397_v44 = vmul.f32 0.044715, %v3365_v27 }
 0x33b   : > { %v3587_v20 = vmul.f32 %v3555_v52, %v3299_v14 }
 0x33c   : > { %v3429_v53 = vadd.f32 %v3397_v44, %v3301_v0 }
 0x33d   : > { %v4115_v63 = vpack.c.bf16 %v3587_v20, %v3586_v9 }
 0x33e   : > { %v3461_v1 = vmul.f32 0.7978846, %v3429_v53  ;;  %v4461_v58 = vpop.eup %4460 }
 0x33f   : > { %4136 = vst [vmem:[%s7299_s11 + $0x70] sm:$0xff] %v4115_v63   ;;  %v3524_v36 = vadd.f32 1.0, %v4461_v58 }
 0x340   : > { %4462 = vtanh.f32 %v3461_v1 }
 0x341   : > { %v3556_v49 = vmul.f32 0.5, %v3524_v36 }
 0x343   : > { %v3588_v12 = vmul.f32 %v3556_v49, %v3300_v35 }
 0x346   : > { %v4463_v24 = vpop.eup %4462 }
 0x347   : > { %v3525_v4 = vadd.f32 1.0, %v4463_v24 }
 0x349   : > { %v3557_v32 = vmul.f32 0.5, %v3525_v4 }
 0x34b   : > { %v3589_v46 = vmul.f32 %v3557_v32, %v3301_v0 }
 0x34d   : > { %v4120_v60 = vpack.c.bf16 %v3589_v46, %v3588_v12 }
 0x34f   : > { %4137 = vst [vmem:[%s7299_s11 + $0x78] sm:$0xff] %v4120_v60  }
 0x350   : > { %4676 = shalt.err (!%p4673_p12)
}
 0x351   : > { %s4750_s1 = smov 64   ;;  %s4751_s25 = smov 4  }
 0x352   : > { %4172 = dma.vmem_to_hbm [thread:$0]  (%p4882_p5), %s3671_s23, 2048, %s3673_s24, %s3655_s29, %s4750_s1, %s4750_s1, %s4751_s25  }
 0x353 PF: > { %s7887_s30 = sld [smem:[#allocation20_spill]] }
 0x354   : > { %s7889_s18 = sld [smem:[#allocation23_spill]] }
 0x359   : > { %s3687_s11 = sand.u32 1, %s7887_s30  }
 0x35a   : > { %p7890_p13 = scmp.ge.s32.totalorder %s7889_s18, 2  ;;  %s3688_s16 = scalar_lea.sflag [#allocation5], %s3687_s11 }
 0x35c   : > { %p4195_p0 = pnand %p7890_p13, %p4847_p6 }
 0x35e   : > { %p4196_p3 = pneg %p4195_p0 }
 0x360   : > { %4718 = dma.done.wait (%p4196_p3), %s3688_s16, 2048  }
 0x361   : > { %4720 = vsyncadd (%p4196_p3), %s3688_s16, 4294965248  ;;  %s30_s14 = sadd.s32 1, %s7889_s18   ;;  %s7891_s27 = sld [smem:[#allocation21_spill]] }
 0x362   : > { %p27_p7 = scmp.ge.s32.totalorder %s30_s14, 4   ;;  %s7892_s11 = sld [smem:[#allocation27_spill]] }
 0x363   : > { %s7893_s12 = sld [smem:[#allocation22_spill]]  ;;  %s7895_s30 = smov %s4727_s10 }
 0x364   : > { %s7894_s13 = sld [smem:[#allocation25_spill]]  ;;  %29 = sbr.rel (!%p27_p7) target bundleno = 14 (0xe), region = 137 }
 0x367   : > { %s7896_s10 = smov %s7891_s27 }
 0x369   :  { %3694 = vsyncpa [#allocation4], 1 }
 0x36a   :  { %3696 = vsyncpa [#allocation4 + $0x1], 1 }
 0x36b   :  { %3697 = vsyncpa [#allocation7], 1 }
 0x36c   :  { %3699 = vsyncpa [#allocation7 + $0x1], 1 }
 0x36d   :  { %3700 = vsyncpa [#allocation10], 1 }
 0x36e   :  { %3701 = vsyncpa [#allocation13], 1 }
 0x36f   :  { %3702 = vsyncpa [#allocation5], 1 }
 0x370   :  { %3704 = vsyncpa [#allocation5 + $0x1], 1 }

</bundles_post_ra>
